<compile_context>
chip_gen: v7x
topology: tpu7x:2x2x1
jax: 0.10.0
libtpu: 0.0.40
codegen_flags: <defaults>
</compile_context>

<pallas_src>
import functools

import jax
import jax.numpy as jnp
from jax.experimental import pallas as pl
from jax.experimental.pallas import tpu as pltpu


# -----------------------------------------------------------------------------
# Tiling helper
# -----------------------------------------------------------------------------
def _pick_tile_h(h_out, max_th=8):
    """Largest divisor of h_out that is <= max_th.

    Keeps the per-tile im2col patch + accumulator small (safe on all TPU
    generations, including v7x's 64 MiB physical VMEM) while giving a grid
    deep enough to pipeline.  For realistic spherical range images this is
    the knob to re-derive per generation.
    """
    th = min(h_out, max_th)
    while h_out % th:
        th -= 1
    return max(th, 1)


# -----------------------------------------------------------------------------
# In-kernel im2col: gather the kh*kw taps for `th` output rows and stack them
# along the channel (lane) axis so the whole conv is a single MXU matmul with
# K = kh*kw*Cin.
# -----------------------------------------------------------------------------
def _im2col(x_ref, r0, th, w_out, kh, kw):
    cin = x_ref.shape[3]
    taps = []
    for i in range(kh):
        rows = x_ref[0, pl.ds(r0 + i, th), :, :]          # (th, Wp, cin) bf16
        for j in range(kw):
            taps.append(rows[:, j:j + w_out, :])          # (th, W, cin)
    patch = jnp.concatenate(taps, axis=-1)                # (th, W, kh*kw*cin)
    return patch.reshape(th * w_out, kh * kw * cin)       # leading-dim merge


# -----------------------------------------------------------------------------
# Kernel 1: KxK "same" conv + bias (+ ReLU), one batch element x one row tile
# per grid step, single fused matmul per tile (used for enc1 / enc2).
# -----------------------------------------------------------------------------
def _conv_kernel(x_ref, w_ref, b_ref, o_ref, *, kh, kw, th, relu):
    # x_ref: (1, Hp, Wp, Cin) padded image (bf16)   w_ref: (kh*kw*Cin, Cout) bf16
    # b_ref: (1, Cout) f32                          o_ref: (1, th, W, Cout)
    h = pl.program_id(1)
    w_out = o_ref.shape[2]
    cout = o_ref.shape[3]
    r0 = pl.multiple_of(h * th, th)

    patch = _im2col(x_ref, r0, th, w_out, kh, kw)                  # (th*W, K)
    acc = jnp.dot(patch, w_ref[...], preferred_element_type=jnp.float32)
    acc = acc + b_ref[...]                                         # f32 bias
    if relu:
        acc = jnp.maximum(acc, 0.0)
    o_ref[0] = acc.reshape(th, w_out, cout).astype(o_ref.dtype)


def conv2d_bias_act(x, w, b, *, relu, out_dtype=jnp.bfloat16):
    """x: (N,H,W,Cin) bf16; w: (kh,kw,Cin,Cout) f32; b: (Cout,) f32."""
    n, h, wd, cin = x.shape
    kh, kw, _, cout = w.shape
    ph, pw = kh // 2, kw // 2
    # TODO(synk): fold the SAME padding into the kernel (zero halo rows under
    # pl.when) to delete this extra HBM pass per layer.
    xp = jnp.pad(x, ((0, 0), (ph, ph), (pw, pw), (0, 0)))
    hp, wp = h + 2 * ph, wd + 2 * pw
    th = _pick_tile_h(h)
    wf = w.reshape(kh * kw * cin, cout).astype(jnp.bfloat16)
    b2 = b.reshape(1, cout).astype(jnp.float32)

    kernel = functools.partial(_conv_kernel, kh=kh, kw=kw, th=th, relu=relu)
    return pl.pallas_call(
        kernel,
        out_shape=jax.ShapeDtypeStruct((n, h, wd, cout), out_dtype),
        grid=(n, h // th),
        in_specs=[
            # Full padded image per batch element; the block index is constant
            # along the (arbitrary) h axis, so it is fetched once per image.
            # TODO(synk): switch to true halo row-blocks for large range images.
            pl.BlockSpec((1, hp, wp, cin), lambda bn, bh: (bn, 0, 0, 0)),
            pl.BlockSpec((kh * kw * cin, cout), lambda bn, bh: (0, 0)),
            pl.BlockSpec((1, cout), lambda bn, bh: (0, 0)),
        ],
        out_specs=pl.BlockSpec((1, th, wd, cout), lambda bn, bh: (bn, bh, 0, 0)),
        compiler_params=pltpu.CompilerParams(
            dimension_semantics=("parallel", "arbitrary")),
    )(xp, wf, b2)


# -----------------------------------------------------------------------------
# Kernel 2: fused decoder + head.
# conv3x3 over [upsampled-bottom, skip] with split weights (no HBM concat),
# ReLU, then the 1x1 classification head -- logits written directly; the
# decoder feature map never leaves VMEM.
# -----------------------------------------------------------------------------
def _dec_head_kernel(up_ref, skip_ref, wb_ref, ws_ref, db_ref, hw_ref, hb_ref,
                     o_ref, *, kh, kw, th):
    h = pl.program_id(1)
    w_out = o_ref.shape[2]
    ncls = o_ref.shape[3]
    r0 = pl.multiple_of(h * th, th)

    patch_b = _im2col(up_ref, r0, th, w_out, kh, kw)      # (th*W, 9*c2)
    patch_s = _im2col(skip_ref, r0, th, w_out, kh, kw)    # (th*W, 9*c1)
    acc = jnp.dot(patch_b, wb_ref[...], preferred_element_type=jnp.float32)
    acc = acc + jnp.dot(patch_s, ws_ref[...], preferred_element_type=jnp.float32)
    acc = acc + db_ref[...]
    feat = jnp.maximum(acc, 0.0).astype(jnp.bfloat16)     # (th*W, c1)

    logits = jnp.dot(feat, hw_ref[...], preferred_element_type=jnp.float32)
    logits = logits + hb_ref[...]
    # TODO(synk): store logits lane-dense / NCHW directly from the kernel to
    # avoid sub-128-lane masked stores and the trailing XLA transpose.
    o_ref[0] = logits.reshape(th, w_out, ncls).astype(o_ref.dtype)


def decoder_head(up, skip, dec_w, dec_b, head_w, head_b):
    """up: (N,H,W,c2) bf16 (nearest-2x upsampled bottom); skip: (N,H,W,c1) bf16."""
    n, h, wd, c2 = up.shape
    c1 = skip.shape[3]
    kh, kw, cin_total, cdec = dec_w.shape
    assert cin_total == c2 + c1
    ncls = head_w.shape[-1]
    ph, pw = kh // 2, kw // 2
    up_p = jnp.pad(up, ((0, 0), (ph, ph), (pw, pw), (0, 0)))
    sk_p = jnp.pad(skip, ((0, 0), (ph, ph), (pw, pw), (0, 0)))
    hp, wp = h + 2 * ph, wd + 2 * pw
    th = _pick_tile_h(h)

    # Split the decoder weights at the concat boundary (first c2 input channels
    # belong to the upsampled bottom, last c1 to the skip) and flatten to the
    # fused-K layout used by _im2col.
    wb = dec_w[:, :, :c2, :].reshape(kh * kw * c2, cdec).astype(jnp.bfloat16)
    ws = dec_w[:, :, c2:, :].reshape(kh * kw * c1, cdec).astype(jnp.bfloat16)
    db = dec_b.reshape(1, cdec).astype(jnp.float32)
    hw = head_w.reshape(cdec, ncls).astype(jnp.bfloat16)
    hb = head_b.reshape(1, ncls).astype(jnp.float32)

    kernel = functools.partial(_dec_head_kernel, kh=kh, kw=kw, th=th)
    return pl.pallas_call(
        kernel,
        out_shape=jax.ShapeDtypeStruct((n, h, wd, ncls), jnp.float32),
        grid=(n, h // th),
        in_specs=[
            pl.BlockSpec((1, hp, wp, c2), lambda bn, bh: (bn, 0, 0, 0)),
            pl.BlockSpec((1, hp, wp, c1), lambda bn, bh: (bn, 0, 0, 0)),
            pl.BlockSpec((kh * kw * c2, cdec), lambda bn, bh: (0, 0)),
            pl.BlockSpec((kh * kw * c1, cdec), lambda bn, bh: (0, 0)),
            pl.BlockSpec((1, cdec), lambda bn, bh: (0, 0)),
            pl.BlockSpec((cdec, ncls), lambda bn, bh: (0, 0)),
            pl.BlockSpec((1, ncls), lambda bn, bh: (0, 0)),
        ],
        out_specs=pl.BlockSpec((1, th, wd, ncls), lambda bn, bh: (bn, bh, 0, 0)),
        compiler_params=pltpu.CompilerParams(
            dimension_semantics=("parallel", "arbitrary")),
    )(up_p, sk_p, wb, ws, db, hw, hb)


# -----------------------------------------------------------------------------
# Model: parameters + forward (encoder -> decoder -> head)
# -----------------------------------------------------------------------------
class SphericalSegmentation:
    def __init__(self, parms, key):
        if parms["encoder"] != "Salsa":
            raise ValueError(f"{parms['encoder']} is not supported")
        if parms["decoder"] != "Salsa":
            raise ValueError(f"{parms['decoder']} is not supported")
        if parms["head"] != "Salsa":
            raise ValueError(f"{parms['head']} is not supported")
        in_ch = parms["encoder_parm"]["in_ch"]
        c1 = parms["encoder_parm"]["c1"]
        c2 = parms["encoder_parm"]["c2"]
        n_cls = parms["head_parm"]["num_classes"]
        self.c1, self.c2, self.n_cls = c1, c2, n_cls

        ks = jax.random.split(key, 8)

        def conv_init(kw_key, kb_key, kh, kw, cin, cout):
            fan_in = kh * kw * cin
            w = jax.random.normal(kw_key, (kh, kw, cin, cout), jnp.float32)
            w = w * (2.0 / fan_in) ** 0.5
            b = jax.random.normal(kb_key, (cout,), jnp.float32) * 0.1
            return w, b

        p = {}
        p["enc1_w"], p["enc1_b"] = conv_init(ks[0], ks[1], 3, 3, in_ch, c1)
        p["enc2_w"], p["enc2_b"] = conv_init(ks[2], ks[3], 3, 3, 4 * c1, c2)
        p["dec_w"], p["dec_b"] = conv_init(ks[4], ks[5], 3, 3, c2 + c1, c1)
        p["head_w"], p["head_b"] = conv_init(ks[6], ks[7], 1, 1, c1, n_cls)
        self.params = p

    # --- sub-modules -------------------------------------------------------
    def encoder(self, x):                                   # x: (N,H,W,Cin) bf16
        p = self.params
        skip = conv2d_bias_act(x, p["enc1_w"], p["enc1_b"], relu=True)
        n, h, w, c = skip.shape
        assert h % 2 == 0 and w % 2 == 0, "pixel-unshuffle needs even H, W"
        # glue: pixel-unshuffle (space-to-depth) /2 downsample.
        # TODO(synk): fuse this re-layout into enc1's output store.
        d = skip.reshape(n, h // 2, 2, w // 2, 2, c)
        d = d.transpose(0, 1, 3, 2, 4, 5).reshape(n, h // 2, w // 2, 4 * c)
        bottom = conv2d_bias_act(d, p["enc2_w"], p["enc2_b"], relu=True)
        return (skip, bottom)

    def decoder_and_head(self, conn):
        skip, bottom = conn
        p = self.params
        # glue: nearest 2x upsample of the small bottom map.
        # TODO(synk): fold the nearest upsample into the decoder kernel via
        # parity-split weights to delete this HBM pass as well.
        up = jnp.repeat(jnp.repeat(bottom, 2, axis=1), 2, axis=2)
        # decoder conv + ReLU + 1x1 head fused in one Pallas kernel.
        return decoder_head(up, skip, p["dec_w"], p["dec_b"],
                            p["head_w"], p["head_b"])

    # --- forward (matches the PyTorch module's forward) --------------------
    def __call__(self, x_nchw):
        x = jnp.transpose(x_nchw, (0, 2, 3, 1)).astype(jnp.bfloat16)  # NCHW->NHWC
        conn = self.encoder(x)
        pred = self.decoder_and_head(conn)                  # decoder + head
        return jnp.transpose(pred, (0, 3, 1, 2))            # NHWC->NCHW logits


# -----------------------------------------------------------------------------
# Pure-JAX reference (lax.conv, same bf16-activation / f32-accumulate policy)
# -----------------------------------------------------------------------------
def _ref_conv(x, w, b, relu, out_dtype):
    y = jax.lax.conv_general_dilated(
        x.astype(jnp.bfloat16), w.astype(jnp.bfloat16),
        window_strides=(1, 1), padding="SAME",
        dimension_numbers=("NHWC", "HWIO", "NHWC"),
        preferred_element_type=jnp.float32)
    y = y + b[None, None, None, :].astype(jnp.float32)
    if relu:
        y = jnp.maximum(y, 0.0)
    return y.astype(out_dtype)


def reference_forward(model, x_nchw):
    p = model.params
    x = jnp.transpose(x_nchw, (0, 2, 3, 1)).astype(jnp.bfloat16)
    skip = _ref_conv(x, p["enc1_w"], p["enc1_b"], True, jnp.bfloat16)
    n, h, w, c = skip.shape
    d = skip.reshape(n, h // 2, 2, w // 2, 2, c)
    d = d.transpose(0, 1, 3, 2, 4, 5).reshape(n, h // 2, w // 2, 4 * c)
    bottom = _ref_conv(d, p["enc2_w"], p["enc2_b"], True, jnp.bfloat16)
    up = jnp.repeat(jnp.repeat(bottom, 2, axis=1), 2, axis=2)
    cat = jnp.concatenate([up, skip], axis=-1)
    dec = _ref_conv(cat, p["dec_w"], p["dec_b"], True, jnp.bfloat16)
    pred = _ref_conv(dec, p["head_w"], p["head_b"], False, jnp.float32)
    return jnp.transpose(pred, (0, 3, 1, 2))


# -----------------------------------------------------------------------------
if __name__ == "__main__":
    key = jax.random.PRNGKey(0)
    k_x, k_p = jax.random.split(key)

    N, C_IN, H, W = 2, 5, 16, 16          # small spherical range-image batch
    parms = {
        "encoder": "Salsa", "decoder": "Salsa", "head": "Salsa",
        "encoder_parm": {"in_ch": C_IN, "c1": 16, "c2": 32},
        "decoder_parm": {},
        "head_parm": {"num_classes": 4},
    }

    model = SphericalSegmentation(parms, k_p)
    x = jax.random.normal(k_x, (N, C_IN, H, W), jnp.float32)   # NCHW, like PyTorch

    fwd = jax.jit(lambda inp: model(inp))
    pred = jax.block_until_ready(fwd(x))

    assert pred.shape == (N, parms["head_parm"]["num_classes"], H, W), pred.shape
    ref = jax.block_until_ready(jax.jit(lambda inp: reference_forward(model, inp))(x))
    err = float(jnp.max(jnp.abs(pred - ref)))
    assert err < 5e-2, f"max abs error vs reference: {err}"

    print("KERNEL_OK")
</pallas_src>

<mosaic_0001>
module attributes {stable_mosaic.version = 11 : i64} {
  func.func @_conv_kernel(%arg0: i32, %arg1: i32, %arg2: memref<1x18x18x5xbf16, #tpu.memory_space<vmem>>, %arg3: memref<45x16xbf16, #tpu.memory_space<vmem>>, %arg4: memref<1x16xf32, #tpu.memory_space<vmem>>, %arg5: memref<1x8x16x16xbf16, #tpu.memory_space<vmem>>) attributes {dimension_semantics = [#tpu.dimension_semantics<parallel>, #tpu.dimension_semantics<arbitrary>], iteration_bounds = array<i64: 2, 2>, scalar_prefetch = 0 : i64, scratch_operands = 0 : i64, tpu.core_type = #tpu.core_type<tc>, window_params = [{transform_indices = @transform_0, window_bounds = array<i64: 1, 18, 18, 5>}, {pipeline_mode = #tpu.pipeline_mode<synchronous>, transform_indices = @transform_1, window_bounds = array<i64: 45, 16>}, {pipeline_mode = #tpu.pipeline_mode<synchronous>, transform_indices = @transform_2, window_bounds = array<i64: 1, 16>}, {transform_indices = @transform_3, window_bounds = array<i64: 1, 8, 16, 16>}]} {
    %c8_i32 = arith.constant 8 : i32
    %0 = arith.muli %arg1, %c8_i32 : i32
    %1 = tpu.assume_multiple %0, 8 : i32
    %c0_i32 = arith.constant 0 : i32
    %2 = arith.addi %1, %c0_i32 : i32
    %c0 = arith.constant 0 : index
    %3 = arith.index_cast %2 : i32 to index
    %c0_0 = arith.constant 0 : index
    %c0_1 = arith.constant 0 : index
    %4 = vector.load %arg2[%c0, %3, %c0_0, %c0_1] : memref<1x18x18x5xbf16, #tpu.memory_space<vmem>>, vector<1x8x18x5xbf16>
    %5 = vector.shape_cast %4 : vector<1x8x18x5xbf16> to vector<8x18x5xbf16>
    %6 = vector.extract_strided_slice %5 {offsets = [0, 0, 0], sizes = [8, 16, 5], strides = [1, 1, 1]} : vector<8x18x5xbf16> to vector<8x16x5xbf16>
    %7 = vector.extract_strided_slice %5 {offsets = [0, 1, 0], sizes = [8, 16, 5], strides = [1, 1, 1]} : vector<8x18x5xbf16> to vector<8x16x5xbf16>
    %8 = vector.extract_strided_slice %5 {offsets = [0, 2, 0], sizes = [8, 16, 5], strides = [1, 1, 1]} : vector<8x18x5xbf16> to vector<8x16x5xbf16>
    %c1_i32 = arith.constant 1 : i32
    %9 = arith.addi %1, %c1_i32 : i32
    %c0_2 = arith.constant 0 : index
    %10 = arith.index_cast %9 : i32 to index
    %c0_3 = arith.constant 0 : index
    %c0_4 = arith.constant 0 : index
    %11 = vector.load %arg2[%c0_2, %10, %c0_3, %c0_4] : memref<1x18x18x5xbf16, #tpu.memory_space<vmem>>, vector<1x8x18x5xbf16>
    %12 = vector.shape_cast %11 : vector<1x8x18x5xbf16> to vector<8x18x5xbf16>
    %13 = vector.extract_strided_slice %12 {offsets = [0, 0, 0], sizes = [8, 16, 5], strides = [1, 1, 1]} : vector<8x18x5xbf16> to vector<8x16x5xbf16>
    %14 = vector.extract_strided_slice %12 {offsets = [0, 1, 0], sizes = [8, 16, 5], strides = [1, 1, 1]} : vector<8x18x5xbf16> to vector<8x16x5xbf16>
    %15 = vector.extract_strided_slice %12 {offsets = [0, 2, 0], sizes = [8, 16, 5], strides = [1, 1, 1]} : vector<8x18x5xbf16> to vector<8x16x5xbf16>
    %c2_i32 = arith.constant 2 : i32
    %16 = arith.addi %1, %c2_i32 : i32
    %c0_5 = arith.constant 0 : index
    %17 = arith.index_cast %16 : i32 to index
    %c0_6 = arith.constant 0 : index
    %c0_7 = arith.constant 0 : index
    %18 = vector.load %arg2[%c0_5, %17, %c0_6, %c0_7] : memref<1x18x18x5xbf16, #tpu.memory_space<vmem>>, vector<1x8x18x5xbf16>
    %19 = vector.shape_cast %18 : vector<1x8x18x5xbf16> to vector<8x18x5xbf16>
    %20 = vector.extract_strided_slice %19 {offsets = [0, 0, 0], sizes = [8, 16, 5], strides = [1, 1, 1]} : vector<8x18x5xbf16> to vector<8x16x5xbf16>
    %21 = vector.extract_strided_slice %19 {offsets = [0, 1, 0], sizes = [8, 16, 5], strides = [1, 1, 1]} : vector<8x18x5xbf16> to vector<8x16x5xbf16>
    %22 = vector.extract_strided_slice %19 {offsets = [0, 2, 0], sizes = [8, 16, 5], strides = [1, 1, 1]} : vector<8x18x5xbf16> to vector<8x16x5xbf16>
    %23 = tpu.concatenate %6, %7, %8, %13, %14, %15, %20, %21, %22 in 2 : vector<8x16x5xbf16>, vector<8x16x5xbf16>, vector<8x16x5xbf16>, vector<8x16x5xbf16>, vector<8x16x5xbf16>, vector<8x16x5xbf16>, vector<8x16x5xbf16>, vector<8x16x5xbf16>, vector<8x16x5xbf16> -> vector<8x16x45xbf16>
    %24 = vector.shape_cast %23 : vector<8x16x45xbf16> to vector<128x45xbf16>
    %c0_8 = arith.constant 0 : index
    %c0_9 = arith.constant 0 : index
    %25 = vector.load %arg3[%c0_8, %c0_9] : memref<45x16xbf16, #tpu.memory_space<vmem>>, vector<45x16xbf16>
    %cst = arith.constant dense<0.000000e+00> : vector<128x16xf32>
    %26 = tpu.matmul %24, %25, %cst {dimension_numbers = #tpu.dot_dimension_numbers<[1], [0], [0], [1], [0, 0, 1, 1], [], []>} : vector<128x45xbf16>, vector<45x16xbf16>, vector<128x16xf32> -> vector<128x16xf32>
    %c0_10 = arith.constant 0 : index
    %c0_11 = arith.constant 0 : index
    %27 = vector.load %arg4[%c0_10, %c0_11] : memref<1x16xf32, #tpu.memory_space<vmem>>, vector<1x16xf32>
    %28 = vector.broadcast %27 : vector<1x16xf32> to vector<128x16xf32>
    %29 = arith.addf %26, %28 : vector<128x16xf32>
    %cst_12 = arith.constant 0.000000e+00 : f32
    %30 = vector.broadcast %cst_12 : f32 to vector<128x16xf32>
    %31 = arith.maximumf %29, %30 : vector<128x16xf32>
    %32 = vector.shape_cast %31 : vector<128x16xf32> to vector<8x16x16xf32>
    %33 = arith.truncf %32 : vector<8x16x16xf32> to vector<8x16x16xbf16>
    %c0_13 = arith.constant 0 : index
    %c0_14 = arith.constant 0 : index
    %c0_15 = arith.constant 0 : index
    %c0_16 = arith.constant 0 : index
    %34 = vector.load %arg5[%c0_13, %c0_14, %c0_15, %c0_16] : memref<1x8x16x16xbf16, #tpu.memory_space<vmem>>, vector<1x8x16x16xbf16>
    %35 = vector.shape_cast %34 : vector<1x8x16x16xbf16> to vector<8x16x16xbf16>
    %36 = vector.shape_cast %33 : vector<8x16x16xbf16> to vector<1x8x16x16xbf16>
    tpu.vector_store %arg5[%c0_13, %c0_14, %c0_15, %c0_16], %36 {strides = array<i32>} : memref<1x8x16x16xbf16, #tpu.memory_space<vmem>>, vector<1x8x16x16xbf16>,
    return
  }
  func.func @transform_0(%arg0: i32, %arg1: i32) -> (i32, i32, i32, i32) {
    %c0_i32 = arith.constant 0 : i32
    %c0_i32_0 = arith.constant 0 : i32
    %c0_i32_1 = arith.constant 0 : i32
    %c0_i32_2 = arith.constant 0 : i32
    return %arg0, %c0_i32, %c0_i32_0, %c0_i32_1 : i32, i32, i32, i32
  }
  func.func @transform_1(%arg0: i32, %arg1: i32) -> (i32, i32) {
    %c0_i32 = arith.constant 0 : i32
    %c0_i32_0 = arith.constant 0 : i32
    %c0_i32_1 = arith.constant 0 : i32
    return %c0_i32, %c0_i32_0 : i32, i32
  }
  func.func @transform_2(%arg0: i32, %arg1: i32) -> (i32, i32) {
    %c0_i32 = arith.constant 0 : i32
    %c0_i32_0 = arith.constant 0 : i32
    %c0_i32_1 = arith.constant 0 : i32
    return %c0_i32, %c0_i32_0 : i32, i32
  }
  func.func @transform_3(%arg0: i32, %arg1: i32) -> (i32, i32, i32, i32) {
    %c0_i32 = arith.constant 0 : i32
    %c0_i32_0 = arith.constant 0 : i32
    %c0_i32_1 = arith.constant 0 : i32
    return %arg0, %arg1, %c0_i32, %c0_i32_0 : i32, i32, i32, i32
  }
}

module attributes {stable_mosaic.version = 11 : i64} {
  func.func @_conv_kernel(%arg0: i32, %arg1: i32, %arg2: memref<1x10x10x64xbf16, #tpu.memory_space<vmem>>, %arg3: memref<576x32xbf16, #tpu.memory_space<vmem>>, %arg4: memref<1x32xf32, #tpu.memory_space<vmem>>, %arg5: memref<1x8x8x32xbf16, #tpu.memory_space<vmem>>) attributes {dimension_semantics = [#tpu.dimension_semantics<parallel>, #tpu.dimension_semantics<arbitrary>], iteration_bounds = array<i64: 2, 1>, scalar_prefetch = 0 : i64, scratch_operands = 0 : i64, tpu.core_type = #tpu.core_type<tc>, window_params = [{transform_indices = @transform_0, window_bounds = array<i64: 1, 10, 10, 64>}, {pipeline_mode = #tpu.pipeline_mode<synchronous>, transform_indices = @transform_1, window_bounds = array<i64: 576, 32>}, {pipeline_mode = #tpu.pipeline_mode<synchronous>, transform_indices = @transform_2, window_bounds = array<i64: 1, 32>}, {transform_indices = @transform_3, window_bounds = array<i64: 1, 8, 8, 32>}]} {
    %c8_i32 = arith.constant 8 : i32
    %0 = arith.muli %arg1, %c8_i32 : i32
    %1 = tpu.assume_multiple %0, 8 : i32
    %c0_i32 = arith.constant 0 : i32
    %2 = arith.addi %1, %c0_i32 : i32
    %c0 = arith.constant 0 : index
    %3 = arith.index_cast %2 : i32 to index
    %c0_0 = arith.constant 0 : index
    %c0_1 = arith.constant 0 : index
    %4 = vector.load %arg2[%c0, %3, %c0_0, %c0_1] : memref<1x10x10x64xbf16, #tpu.memory_space<vmem>>, vector<1x8x10x64xbf16>
    %5 = vector.shape_cast %4 : vector<1x8x10x64xbf16> to vector<8x10x64xbf16>
    %6 = vector.extract_strided_slice %5 {offsets = [0, 0, 0], sizes = [8, 8, 64], strides = [1, 1, 1]} : vector<8x10x64xbf16> to vector<8x8x64xbf16>
    %7 = vector.extract_strided_slice %5 {offsets = [0, 1, 0], sizes = [8, 8, 64], strides = [1, 1, 1]} : vector<8x10x64xbf16> to vector<8x8x64xbf16>
    %8 = vector.extract_strided_slice %5 {offsets = [0, 2, 0], sizes = [8, 8, 64], strides = [1, 1, 1]} : vector<8x10x64xbf16> to vector<8x8x64xbf16>
    %c1_i32 = arith.constant 1 : i32
    %9 = arith.addi %1, %c1_i32 : i32
    %c0_2 = arith.constant 0 : index
    %10 = arith.index_cast %9 : i32 to index
    %c0_3 = arith.constant 0 : index
    %c0_4 = arith.constant 0 : index
    %11 = vector.load %arg2[%c0_2, %10, %c0_3, %c0_4] : memref<1x10x10x64xbf16, #tpu.memory_space<vmem>>, vector<1x8x10x64xbf16>
    %12 = vector.shape_cast %11 : vector<1x8x10x64xbf16> to vector<8x10x64xbf16>
    %13 = vector.extract_strided_slice %12 {offsets = [0, 0, 0], sizes = [8, 8, 64], strides = [1, 1, 1]} : vector<8x10x64xbf16> to vector<8x8x64xbf16>
    %14 = vector.extract_strided_slice %12 {offsets = [0, 1, 0], sizes = [8, 8, 64], strides = [1, 1, 1]} : vector<8x10x64xbf16> to vector<8x8x64xbf16>
    %15 = vector.extract_strided_slice %12 {offsets = [0, 2, 0], sizes = [8, 8, 64], strides = [1, 1, 1]} : vector<8x10x64xbf16> to vector<8x8x64xbf16>
    %c2_i32 = arith.constant 2 : i32
    %16 = arith.addi %1, %c2_i32 : i32
    %c0_5 = arith.constant 0 : index
    %17 = arith.index_cast %16 : i32 to index
    %c0_6 = arith.constant 0 : index
    %c0_7 = arith.constant 0 : index
    %18 = vector.load %arg2[%c0_5, %17, %c0_6, %c0_7] : memref<1x10x10x64xbf16, #tpu.memory_space<vmem>>, vector<1x8x10x64xbf16>
    %19 = vector.shape_cast %18 : vector<1x8x10x64xbf16> to vector<8x10x64xbf16>
    %20 = vector.extract_strided_slice %19 {offsets = [0, 0, 0], sizes = [8, 8, 64], strides = [1, 1, 1]} : vector<8x10x64xbf16> to vector<8x8x64xbf16>
    %21 = vector.extract_strided_slice %19 {offsets = [0, 1, 0], sizes = [8, 8, 64], strides = [1, 1, 1]} : vector<8x10x64xbf16> to vector<8x8x64xbf16>
    %22 = vector.extract_strided_slice %19 {offsets = [0, 2, 0], sizes = [8, 8, 64], strides = [1, 1, 1]} : vector<8x10x64xbf16> to vector<8x8x64xbf16>
    %23 = tpu.concatenate %6, %7, %8, %13, %14, %15, %20, %21, %22 in 2 : vector<8x8x64xbf16>, vector<8x8x64xbf16>, vector<8x8x64xbf16>, vector<8x8x64xbf16>, vector<8x8x64xbf16>, vector<8x8x64xbf16>, vector<8x8x64xbf16>, vector<8x8x64xbf16>, vector<8x8x64xbf16> -> vector<8x8x576xbf16>
    %24 = vector.shape_cast %23 : vector<8x8x576xbf16> to vector<64x576xbf16>
    %c0_8 = arith.constant 0 : index
    %c0_9 = arith.constant 0 : index
    %25 = vector.load %arg3[%c0_8, %c0_9] : memref<576x32xbf16, #tpu.memory_space<vmem>>, vector<576x32xbf16>
    %cst = arith.constant dense<0.000000e+00> : vector<64x32xf32>
    %26 = tpu.matmul %24, %25, %cst {dimension_numbers = #tpu.dot_dimension_numbers<[1], [0], [0], [1], [0, 0, 1, 1], [], []>} : vector<64x576xbf16>, vector<576x32xbf16>, vector<64x32xf32> -> vector<64x32xf32>
    %c0_10 = arith.constant 0 : index
    %c0_11 = arith.constant 0 : index
    %27 = vector.load %arg4[%c0_10, %c0_11] : memref<1x32xf32, #tpu.memory_space<vmem>>, vector<1x32xf32>
    %28 = vector.broadcast %27 : vector<1x32xf32> to vector<64x32xf32>
    %29 = arith.addf %26, %28 : vector<64x32xf32>
    %cst_12 = arith.constant 0.000000e+00 : f32
    %30 = vector.broadcast %cst_12 : f32 to vector<64x32xf32>
    %31 = arith.maximumf %29, %30 : vector<64x32xf32>
    %32 = vector.shape_cast %31 : vector<64x32xf32> to vector<8x8x32xf32>
    %33 = arith.truncf %32 : vector<8x8x32xf32> to vector<8x8x32xbf16>
    %c0_13 = arith.constant 0 : index
    %c0_14 = arith.constant 0 : index
    %c0_15 = arith.constant 0 : index
    %c0_16 = arith.constant 0 : index
    %34 = vector.load %arg5[%c0_13, %c0_14, %c0_15, %c0_16] : memref<1x8x8x32xbf16, #tpu.memory_space<vmem>>, vector<1x8x8x32xbf16>
    %35 = vector.shape_cast %34 : vector<1x8x8x32xbf16> to vector<8x8x32xbf16>
    %36 = vector.shape_cast %33 : vector<8x8x32xbf16> to vector<1x8x8x32xbf16>
    tpu.vector_store %arg5[%c0_13, %c0_14, %c0_15, %c0_16], %36 {strides = array<i32>} : memref<1x8x8x32xbf16, #tpu.memory_space<vmem>>, vector<1x8x8x32xbf16>,
    return
  }
  func.func @transform_0(%arg0: i32, %arg1: i32) -> (i32, i32, i32, i32) {
    %c0_i32 = arith.constant 0 : i32
    %c0_i32_0 = arith.constant 0 : i32
    %c0_i32_1 = arith.constant 0 : i32
    %c0_i32_2 = arith.constant 0 : i32
    return %arg0, %c0_i32, %c0_i32_0, %c0_i32_1 : i32, i32, i32, i32
  }
  func.func @transform_1(%arg0: i32, %arg1: i32) -> (i32, i32) {
    %c0_i32 = arith.constant 0 : i32
    %c0_i32_0 = arith.constant 0 : i32
    %c0_i32_1 = arith.constant 0 : i32
    return %c0_i32, %c0_i32_0 : i32, i32
  }
  func.func @transform_2(%arg0: i32, %arg1: i32) -> (i32, i32) {
    %c0_i32 = arith.constant 0 : i32
    %c0_i32_0 = arith.constant 0 : i32
    %c0_i32_1 = arith.constant 0 : i32
    return %c0_i32, %c0_i32_0 : i32, i32
  }
  func.func @transform_3(%arg0: i32, %arg1: i32) -> (i32, i32, i32, i32) {
    %c0_i32 = arith.constant 0 : i32
    %c0_i32_0 = arith.constant 0 : i32
    %c0_i32_1 = arith.constant 0 : i32
    return %arg0, %arg1, %c0_i32, %c0_i32_0 : i32, i32, i32, i32
  }
}

module attributes {stable_mosaic.version = 11 : i64} {
  func.func @_dec_head_kernel(%arg0: i32, %arg1: i32, %arg2: memref<1x18x18x32xbf16, #tpu.memory_space<vmem>>, %arg3: memref<1x18x18x16xbf16, #tpu.memory_space<vmem>>, %arg4: memref<288x16xbf16, #tpu.memory_space<vmem>>, %arg5: memref<144x16xbf16, #tpu.memory_space<vmem>>, %arg6: memref<1x16xf32, #tpu.memory_space<vmem>>, %arg7: memref<16x4xbf16, #tpu.memory_space<vmem>>, %arg8: memref<1x4xf32, #tpu.memory_space<vmem>>, %arg9: memref<1x8x16x4xf32, #tpu.memory_space<vmem>>) attributes {dimension_semantics = [#tpu.dimension_semantics<parallel>, #tpu.dimension_semantics<arbitrary>], iteration_bounds = array<i64: 2, 2>, scalar_prefetch = 0 : i64, scratch_operands = 0 : i64, tpu.core_type = #tpu.core_type<tc>, window_params = [{transform_indices = @transform_0, window_bounds = array<i64: 1, 18, 18, 32>}, {transform_indices = @transform_1, window_bounds = array<i64: 1, 18, 18, 16>}, {pipeline_mode = #tpu.pipeline_mode<synchronous>, transform_indices = @transform_2, window_bounds = array<i64: 288, 16>}, {pipeline_mode = #tpu.pipeline_mode<synchronous>, transform_indices = @transform_3, window_bounds = array<i64: 144, 16>}, {pipeline_mode = #tpu.pipeline_mode<synchronous>, transform_indices = @transform_4, window_bounds = array<i64: 1, 16>}, {pipeline_mode = #tpu.pipeline_mode<synchronous>, transform_indices = @transform_5, window_bounds = array<i64: 16, 4>}, {pipeline_mode = #tpu.pipeline_mode<synchronous>, transform_indices = @transform_6, window_bounds = array<i64: 1, 4>}, {transform_indices = @transform_7, window_bounds = array<i64: 1, 8, 16, 4>}]} {
    %c8_i32 = arith.constant 8 : i32
    %0 = arith.muli %arg1, %c8_i32 : i32
    %1 = tpu.assume_multiple %0, 8 : i32
    %c0_i32 = arith.constant 0 : i32
    %2 = arith.addi %1, %c0_i32 : i32
    %c0 = arith.constant 0 : index
    %3 = arith.index_cast %2 : i32 to index
    %c0_0 = arith.constant 0 : index
    %c0_1 = arith.constant 0 : index
    %4 = vector.load %arg2[%c0, %3, %c0_0, %c0_1] : memref<1x18x18x32xbf16, #tpu.memory_space<vmem>>, vector<1x8x18x32xbf16>
    %5 = vector.shape_cast %4 : vector<1x8x18x32xbf16> to vector<8x18x32xbf16>
    %6 = vector.extract_strided_slice %5 {offsets = [0, 0, 0], sizes = [8, 16, 32], strides = [1, 1, 1]} : vector<8x18x32xbf16> to vector<8x16x32xbf16>
    %7 = vector.extract_strided_slice %5 {offsets = [0, 1, 0], sizes = [8, 16, 32], strides = [1, 1, 1]} : vector<8x18x32xbf16> to vector<8x16x32xbf16>
    %8 = vector.extract_strided_slice %5 {offsets = [0, 2, 0], sizes = [8, 16, 32], strides = [1, 1, 1]} : vector<8x18x32xbf16> to vector<8x16x32xbf16>
    %c1_i32 = arith.constant 1 : i32
    %9 = arith.addi %1, %c1_i32 : i32
    %c0_2 = arith.constant 0 : index
    %10 = arith.index_cast %9 : i32 to index
    %c0_3 = arith.constant 0 : index
    %c0_4 = arith.constant 0 : index
    %11 = vector.load %arg2[%c0_2, %10, %c0_3, %c0_4] : memref<1x18x18x32xbf16, #tpu.memory_space<vmem>>, vector<1x8x18x32xbf16>
    %12 = vector.shape_cast %11 : vector<1x8x18x32xbf16> to vector<8x18x32xbf16>
    %13 = vector.extract_strided_slice %12 {offsets = [0, 0, 0], sizes = [8, 16, 32], strides = [1, 1, 1]} : vector<8x18x32xbf16> to vector<8x16x32xbf16>
    %14 = vector.extract_strided_slice %12 {offsets = [0, 1, 0], sizes = [8, 16, 32], strides = [1, 1, 1]} : vector<8x18x32xbf16> to vector<8x16x32xbf16>
    %15 = vector.extract_strided_slice %12 {offsets = [0, 2, 0], sizes = [8, 16, 32], strides = [1, 1, 1]} : vector<8x18x32xbf16> to vector<8x16x32xbf16>
    %c2_i32 = arith.constant 2 : i32
    %16 = arith.addi %1, %c2_i32 : i32
    %c0_5 = arith.constant 0 : index
    %17 = arith.index_cast %16 : i32 to index
    %c0_6 = arith.constant 0 : index
    %c0_7 = arith.constant 0 : index
    %18 = vector.load %arg2[%c0_5, %17, %c0_6, %c0_7] : memref<1x18x18x32xbf16, #tpu.memory_space<vmem>>, vector<1x8x18x32xbf16>
    %19 = vector.shape_cast %18 : vector<1x8x18x32xbf16> to vector<8x18x32xbf16>
    %20 = vector.extract_strided_slice %19 {offsets = [0, 0, 0], sizes = [8, 16, 32], strides = [1, 1, 1]} : vector<8x18x32xbf16> to vector<8x16x32xbf16>
    %21 = vector.extract_strided_slice %19 {offsets = [0, 1, 0], sizes = [8, 16, 32], strides = [1, 1, 1]} : vector<8x18x32xbf16> to vector<8x16x32xbf16>
    %22 = vector.extract_strided_slice %19 {offsets = [0, 2, 0], sizes = [8, 16, 32], strides = [1, 1, 1]} : vector<8x18x32xbf16> to vector<8x16x32xbf16>
    %23 = tpu.concatenate %6, %7, %8, %13, %14, %15, %20, %21, %22 in 2 : vector<8x16x32xbf16>, vector<8x16x32xbf16>, vector<8x16x32xbf16>, vector<8x16x32xbf16>, vector<8x16x32xbf16>, vector<8x16x32xbf16>, vector<8x16x32xbf16>, vector<8x16x32xbf16>, vector<8x16x32xbf16> -> vector<8x16x288xbf16>
    %24 = vector.shape_cast %23 : vector<8x16x288xbf16> to vector<128x288xbf16>
    %c0_i32_8 = arith.constant 0 : i32
    %25 = arith.addi %1, %c0_i32_8 : i32
    %c0_9 = arith.constant 0 : index
    %26 = arith.index_cast %25 : i32 to index
    %c0_10 = arith.constant 0 : index
    %c0_11 = arith.constant 0 : index
    %27 = vector.load %arg3[%c0_9, %26, %c0_10, %c0_11] : memref<1x18x18x16xbf16, #tpu.memory_space<vmem>>, vector<1x8x18x16xbf16>
    %28 = vector.shape_cast %27 : vector<1x8x18x16xbf16> to vector<8x18x16xbf16>
    %29 = vector.extract_strided_slice %28 {offsets = [0, 0, 0], sizes = [8, 16, 16], strides = [1, 1, 1]} : vector<8x18x16xbf16> to vector<8x16x16xbf16>
    %30 = vector.extract_strided_slice %28 {offsets = [0, 1, 0], sizes = [8, 16, 16], strides = [1, 1, 1]} : vector<8x18x16xbf16> to vector<8x16x16xbf16>
    %31 = vector.extract_strided_slice %28 {offsets = [0, 2, 0], sizes = [8, 16, 16], strides = [1, 1, 1]} : vector<8x18x16xbf16> to vector<8x16x16xbf16>
    %c1_i32_12 = arith.constant 1 : i32
    %32 = arith.addi %1, %c1_i32_12 : i32
    %c0_13 = arith.constant 0 : index
    %33 = arith.index_cast %32 : i32 to index
    %c0_14 = arith.constant 0 : index
    %c0_15 = arith.constant 0 : index
    %34 = vector.load %arg3[%c0_13, %33, %c0_14, %c0_15] : memref<1x18x18x16xbf16, #tpu.memory_space<vmem>>, vector<1x8x18x16xbf16>
    %35 = vector.shape_cast %34 : vector<1x8x18x16xbf16> to vector<8x18x16xbf16>
    %36 = vector.extract_strided_slice %35 {offsets = [0, 0, 0], sizes = [8, 16, 16], strides = [1, 1, 1]} : vector<8x18x16xbf16> to vector<8x16x16xbf16>
    %37 = vector.extract_strided_slice %35 {offsets = [0, 1, 0], sizes = [8, 16, 16], strides = [1, 1, 1]} : vector<8x18x16xbf16> to vector<8x16x16xbf16>
    %38 = vector.extract_strided_slice %35 {offsets = [0, 2, 0], sizes = [8, 16, 16], strides = [1, 1, 1]} : vector<8x18x16xbf16> to vector<8x16x16xbf16>
    %c2_i32_16 = arith.constant 2 : i32
    %39 = arith.addi %1, %c2_i32_16 : i32
    %c0_17 = arith.constant 0 : index
    %40 = arith.index_cast %39 : i32 to index
    %c0_18 = arith.constant 0 : index
    %c0_19 = arith.constant 0 : index
    %41 = vector.load %arg3[%c0_17, %40, %c0_18, %c0_19] : memref<1x18x18x16xbf16, #tpu.memory_space<vmem>>, vector<1x8x18x16xbf16>
    %42 = vector.shape_cast %41 : vector<1x8x18x16xbf16> to vector<8x18x16xbf16>
    %43 = vector.extract_strided_slice %42 {offsets = [0, 0, 0], sizes = [8, 16, 16], strides = [1, 1, 1]} : vector<8x18x16xbf16> to vector<8x16x16xbf16>
    %44 = vector.extract_strided_slice %42 {offsets = [0, 1, 0], sizes = [8, 16, 16], strides = [1, 1, 1]} : vector<8x18x16xbf16> to vector<8x16x16xbf16>
    %45 = vector.extract_strided_slice %42 {offsets = [0, 2, 0], sizes = [8, 16, 16], strides = [1, 1, 1]} : vector<8x18x16xbf16> to vector<8x16x16xbf16>
    %46 = tpu.concatenate %29, %30, %31, %36, %37, %38, %43, %44, %45 in 2 : vector<8x16x16xbf16>, vector<8x16x16xbf16>, vector<8x16x16xbf16>, vector<8x16x16xbf16>, vector<8x16x16xbf16>, vector<8x16x16xbf16>, vector<8x16x16xbf16>, vector<8x16x16xbf16>, vector<8x16x16xbf16> -> vector<8x16x144xbf16>
    %47 = vector.shape_cast %46 : vector<8x16x144xbf16> to vector<128x144xbf16>
    %c0_20 = arith.constant 0 : index
    %c0_21 = arith.constant 0 : index
    %48 = vector.load %arg4[%c0_20, %c0_21] : memref<288x16xbf16, #tpu.memory_space<vmem>>, vector<288x16xbf16>
    %cst = arith.constant dense<0.000000e+00> : vector<128x16xf32>
    %49 = tpu.matmul %24, %48, %cst {dimension_numbers = #tpu.dot_dimension_numbers<[1], [0], [0], [1], [0, 0, 1, 1], [], []>} : vector<128x288xbf16>, vector<288x16xbf16>, vector<128x16xf32> -> vector<128x16xf32>
    %c0_22 = arith.constant 0 : index
    %c0_23 = arith.constant 0 : index
    %50 = vector.load %arg5[%c0_22, %c0_23] : memref<144x16xbf16, #tpu.memory_space<vmem>>, vector<144x16xbf16>
    %cst_24 = arith.constant dense<0.000000e+00> : vector<128x16xf32>
    %51 = tpu.matmul %47, %50, %cst_24 {dimension_numbers = #tpu.dot_dimension_numbers<[1], [0], [0], [1], [0, 0, 1, 1], [], []>} : vector<128x144xbf16>, vector<144x16xbf16>, vector<128x16xf32> -> vector<128x16xf32>
    %52 = arith.addf %49, %51 : vector<128x16xf32>
    %c0_25 = arith.constant 0 : index
    %c0_26 = arith.constant 0 : index
    %53 = vector.load %arg6[%c0_25, %c0_26] : memref<1x16xf32, #tpu.memory_space<vmem>>, vector<1x16xf32>
    %54 = vector.broadcast %53 : vector<1x16xf32> to vector<128x16xf32>
    %55 = arith.addf %52, %54 : vector<128x16xf32>
    %cst_27 = arith.constant 0.000000e+00 : f32
    %56 = vector.broadcast %cst_27 : f32 to vector<128x16xf32>
    %57 = arith.maximumf %55, %56 : vector<128x16xf32>
    %58 = arith.truncf %57 : vector<128x16xf32> to vector<128x16xbf16>
    %c0_28 = arith.constant 0 : index
    %c0_29 = arith.constant 0 : index
    %59 = vector.load %arg7[%c0_28, %c0_29] : memref<16x4xbf16, #tpu.memory_space<vmem>>, vector<16x4xbf16>
    %cst_30 = arith.constant dense<0.000000e+00> : vector<128x4xf32>
    %60 = tpu.matmul %58, %59, %cst_30 {dimension_numbers = #tpu.dot_dimension_numbers<[1], [0], [0], [1], [0, 0, 1, 1], [], []>} : vector<128x16xbf16>, vector<16x4xbf16>, vector<128x4xf32> -> vector<128x4xf32>
    %c0_31 = arith.constant 0 : index
    %c0_32 = arith.constant 0 : index
    %61 = vector.load %arg8[%c0_31, %c0_32] : memref<1x4xf32, #tpu.memory_space<vmem>>, vector<1x4xf32>
    %62 = vector.broadcast %61 : vector<1x4xf32> to vector<128x4xf32>
    %63 = arith.addf %60, %62 : vector<128x4xf32>
    %64 = vector.shape_cast %63 : vector<128x4xf32> to vector<8x16x4xf32>
    %c0_33 = arith.constant 0 : index
    %c0_34 = arith.constant 0 : index
    %c0_35 = arith.constant 0 : index
    %c0_36 = arith.constant 0 : index
    %65 = vector.load %arg9[%c0_33, %c0_34, %c0_35, %c0_36] : memref<1x8x16x4xf32, #tpu.memory_space<vmem>>, vector<1x8x16x4xf32>
    %66 = vector.shape_cast %65 : vector<1x8x16x4xf32> to vector<8x16x4xf32>
    %67 = vector.shape_cast %64 : vector<8x16x4xf32> to vector<1x8x16x4xf32>
    tpu.vector_store %arg9[%c0_33, %c0_34, %c0_35, %c0_36], %67 {strides = array<i32>} : memref<1x8x16x4xf32, #tpu.memory_space<vmem>>, vector<1x8x16x4xf32>,
    return
  }
  func.func @transform_0(%arg0: i32, %arg1: i32) -> (i32, i32, i32, i32) {
    %c0_i32 = arith.constant 0 : i32
    %c0_i32_0 = arith.constant 0 : i32
    %c0_i32_1 = arith.constant 0 : i32
    %c0_i32_2 = arith.constant 0 : i32
    return %arg0, %c0_i32, %c0_i32_0, %c0_i32_1 : i32, i32, i32, i32
  }
  func.func @transform_1(%arg0: i32, %arg1: i32) -> (i32, i32, i32, i32) {
    %c0_i32 = arith.constant 0 : i32
    %c0_i32_0 = arith.constant 0 : i32
    %c0_i32_1 = arith.constant 0 : i32
    %c0_i32_2 = arith.constant 0 : i32
    return %arg0, %c0_i32, %c0_i32_0, %c0_i32_1 : i32, i32, i32, i32
  }
  func.func @transform_2(%arg0: i32, %arg1: i32) -> (i32, i32) {
    %c0_i32 = arith.constant 0 : i32
    %c0_i32_0 = arith.constant 0 : i32
    %c0_i32_1 = arith.constant 0 : i32
    return %c0_i32, %c0_i32_0 : i32, i32
  }
  func.func @transform_3(%arg0: i32, %arg1: i32) -> (i32, i32) {
    %c0_i32 = arith.constant 0 : i32
    %c0_i32_0 = arith.constant 0 : i32
    %c0_i32_1 = arith.constant 0 : i32
    return %c0_i32, %c0_i32_0 : i32, i32
  }
  func.func @transform_4(%arg0: i32, %arg1: i32) -> (i32, i32) {
    %c0_i32 = arith.constant 0 : i32
    %c0_i32_0 = arith.constant 0 : i32
    %c0_i32_1 = arith.constant 0 : i32
    return %c0_i32, %c0_i32_0 : i32, i32
  }
  func.func @transform_5(%arg0: i32, %arg1: i32) -> (i32, i32) {
    %c0_i32 = arith.constant 0 : i32
    %c0_i32_0 = arith.constant 0 : i32
    %c0_i32_1 = arith.constant 0 : i32
    return %c0_i32, %c0_i32_0 : i32, i32
  }
  func.func @transform_6(%arg0: i32, %arg1: i32) -> (i32, i32) {
    %c0_i32 = arith.constant 0 : i32
    %c0_i32_0 = arith.constant 0 : i32
    %c0_i32_1 = arith.constant 0 : i32
    return %c0_i32, %c0_i32_0 : i32, i32
  }
  func.func @transform_7(%arg0: i32, %arg1: i32) -> (i32, i32, i32, i32) {
    %c0_i32 = arith.constant 0 : i32
    %c0_i32_0 = arith.constant 0 : i32
    %c0_i32_1 = arith.constant 0 : i32
    return %arg0, %arg1, %c0_i32, %c0_i32_0 : i32, i32, i32, i32
  }
}

</mosaic_0001>

<bundles_post_ra>
// kernel: _lambda_.3
= control target key start
LH: loop header
LB: loop body
LE: loop exit
PB: predicated region body
PF: predicated region fallthrough
CT: control target
= control target key end

     0   :  { %s1816_s12 = smov 0   ;;  %s1818_s13 = smov 0   ;;  %s2334_s0 = inlined_call_operand.vmem [shape: bf16[2,18,18,5], index: 0, kind: input, shape index: {}]   ;;  %s2335_s1 = inlined_call_operand.vmem [shape: bf16[45,16], index: 1, kind: input, shape index: {}]   ;;  %s2336_s2 = inlined_call_operand.vmem [shape: f32[1,16], index: 2, kind: input, shape index: {}]   ;;  %s2337_s3 = inlined_call_operand.vmem [shape: bf16[2,16,16,16], index: 3, kind: output, shape index: {}]  }
   0x1   :  { %s1820_s14 = smov 0   ;;  %s1822_s15 = smov 0  }
   0x2   :  { %s1824_s16 = smov 0  }
   0x3 LB: > { %s22_s17 = sadd.s32 1, %s1777_s14  ;;  %s25_s18 = sadd.s32 1, %s1781_s15  ;;  %s1785_s16 = sphi %s1824_s16, %s13_s16   ;;  %s1781_s15 = sphi %s1822_s15, %s2341_s15   ;;  %s1777_s14 = sphi %s1820_s14, %s2340_s14   ;;  %s1773_s13 = sphi %s1818_s13, %s2339_s13   ;;  %s1769_s12 = sphi %s1816_s12, %s2338_s12  }
   0x4   : > { %p23_p0 = scmp.ge.s32.totalorder %s22_s17, 2  ;;  %p1451_p1 = scmp.ge.s32.totalorder %s1785_s16, 1 }
   0x5   : > { %p151_p2 = scmp.lt.s32.totalorder %s1785_s16, 5 }
   0x6   : > { %s2343_s17 = smov (%p23_p0, %s22_s17), 0  ;;  %s2345_s18 = smov (!%p23_p0, %s25_s18), %s1781_s15 }
   0x7   : > { %p152_p3 = pnand %p1451_p1, %p151_p2  ;;  %p27_p4 = scmp.ge.s32.totalorder %s2345_s18, 2 }
   0x8   : > { %p180_p5 = scmp.lt.s32.totalorder (!%p152_p3), %s1773_s13, 1  ;;  %s1590_s19 = smul.u32 (!%p152_p3), 96, %s1769_s12  ;;  %vm458_vm0 = vcmask (!%p152_p3), 1046528   ;;  %vm345_vm1 = vsmask.f32 (!%p152_p3), 7424  ;;  %vm1146_vm2 = vcmask (!%p152_p3), 1045504  }
   0x9   : > { %s2347_s18 = smov (%p27_p4, %s2345_s18), 0  ;;  %155 = sbr.rel (%p152_p3) target bundleno = 485 (0x1e5), region = 32 }
   0xa   : > { %s1787_s25 = smov (!%p152_p3), 15   ;;  %s1788_s26 = smov (!%p152_p3), 10   ;;  %vm963_vm3 = vcmask (!%p152_p3), 39936   ;;  %vm980_vm4 = vcmask (!%p152_p3), 80896   ;;  %vm997_vm5 = vcmask (!%p152_p3), 121856   ;;  %vm1014_vm6 = vcmask (!%p152_p3), 162816  }
   0xb   : > { %s1789_s27 = smov (!%p152_p3), 5   ;;  %s1790_s28 = smov (!%p152_p3), 20   ;;  %vm1031_vm7 = vcmask (!%p152_p3), 203776   ;;  %vm1048_vm8 = vcmask (!%p152_p3), 244736   ;;  %vm1065_vm9 = vcmask (!%p152_p3), 285696   ;;  %vm1082_vm10 = vcmask (!%p152_p3), 326656  }
   0xc   : > { %s1791_s29 = smov (!%p152_p3), 25   ;;  %s1792_s30 = smov (!%p152_p3), 30   ;;  %vm1129_vm11 = vcmask (!%p152_p3), 367616   ;;  %vm1330_vm12 = vcmask (!%p152_p3), 125952  }
   0xd   : > { %s1793_s4 = smov (!%p152_p3), 35   ;;  %s1794_s9 = smov (!%p152_p3), 40  }
  0x10   : > { %s2349_s13 = smov (!%p180_p5, %s1773_s13), 1 }
  0x11   : > { %s1646_s20 = smul.u32 216, %s2349_s13  ;;  %s1455_s21 = sshll.u32 %s2349_s13, 5 }
  0x13   : > { %s184_s23 = scalar_lea.vmem %s2334_s0, %s1646_s20 }
  0x14   : > { %s1855_s24 = scalar_lea.vmem %s184_s23, %s1590_s19  ;;  %s1453_s19 = sshll.u32 %s1769_s12, 3 }
  0x15   : > { %v1858_v0 = vld [vmem:[%s1855_s24 + $0x3c] sm:$0xff]   ;;  %v1861_v1 = vld [vmem:[%s1855_s24 + $0xc] sm:$0xff]   ;;  %v1699_v3 = vld [vmem:[%s1855_s24 + $0x38] ss:$0 sps:$4 sm:$0x11]   ;;  %p188_p6 = scmp.lt.s32.totalorder %s1453_s19, 15 }
  0x16   : > { %547 = vrot.lane.b32.xlu1 %v1858_v0, %s1787_s25  ;;  %539 = vrot.lane.b32.xlu0 %v1861_v1, %s1787_s25  ;;  %v1868_v2 = vld [vmem:[%s1855_s24 + $0x30] sm:$0xff]   ;;  %v1872_v4 = vld [vmem:[%s1855_s24] sm:$0xff]   ;;  %v628_v5 = vshrl.u32 %v1858_v0, 16  ;;  %v472_v7 = vrot.slane %v1699_v3, 1  ;;  %v402_v43 = vshll.u32 %v1699_v3, 16  ;;  %v630_v48 = vshll.u32 %v1858_v0, 16 }
  0x17   : > { %v471_v6 = vrot.slane %v1868_v2, 1  ;;  %v1701_v8 = vld [vmem:[%s1855_s24 + $0x8] ss:$0 sps:$4 sm:$0x11]   ;;  %v1878_v9 = vld [vmem:[%s1855_s24 + $0x3c] sm:$0xff]   ;;  %v459_v10 = vrot.slane %v1872_v4, 1 }
  0x18   : > { %v1882_v11 = vld [vmem:[%s1855_s24 + $0xc] sm:$0xff]   ;;  %v460_v13 = vrot.slane %v1701_v8, 1  ;;  %v1703_v14 = vld [vmem:[%s1855_s24 + $0x44] ss:$0 sps:$4 sm:$0x11]   ;;  %v474_v15 = vrot.slane %v1878_v9, 1 }
  0x19   : > { %v473_v12 = vsel %vm458_vm0, %v471_v6, %v472_v7  ;;  %v462_v16 = vrot.slane %v1882_v11, 1  ;;  %v475_v18 = vrot.slane %v1703_v14, 1  ;;  %v1705_v19 = vld [vmem:[%s1855_s24 + $0x14] ss:$0 sps:$4 sm:$0x11]   ;;  %v359_v20 = vshrl.u32 %v1882_v11, 16 }
  0x1a   : > { %491 = vrot.lane.b32.xlu1 %v473_v12, %s1788_s26  ;;  %v461_v17 = vsel %vm458_vm0, %v459_v10, %v460_v13  ;;  %v361_v21 = vshll.u32 %v1882_v11, 16  ;;  %v347_v22 = vshrl.u32 %v1872_v4, 16  ;;  %v349_v23 = vshll.u32 %v1872_v4, 16  ;;  %v1902_v36 = vld [vmem:[%s1855_s24 + $0x48] sm:$0xff]   ;;  %v1914_v52 = vld [vmem:[%s1855_s24 + $0x18] sm:$0xff]   ;;  %s2351_s19 = smov (!%p188_p6, %s1453_s19), 15 }
  0x1b   : > { %483 = vrot.lane.b32.xlu0 %v461_v17, %s1788_s26  ;;  %v476_v24 = vsel %vm458_vm0, %v474_v15, %v475_v18  ;;  %v463_v25 = vrot.slane %v1705_v19, 1  ;;  %v366_v26 = vshll.u32 %v1705_v19, 16  ;;  %v354_v27 = vshll.u32 %v1701_v8, 16  ;;  %v1708_v44 = vld [vmem:[%s1855_s24 + $0x44] ss:$0 sps:$4 sm:$0x11]  }
  0x1c   : > { %v363_v28 = vrot.slane %v361_v21, 1  ;;  %v351_v29 = vrot.slane %v349_v23, 1  ;;  %v407_v30 = vshrl.u32 %v1878_v9, 16  ;;  %v409_v31 = vshll.u32 %v1878_v9, 16  ;;  %s1454_s20 = sshll.u32 %s2351_s19, 1 }
  0x1d   : > { %v464_v32 = vsel %vm458_vm0, %v462_v16, %v463_v25  ;;  %v368_v33 = vrot.slane %v366_v26, 1  ;;  %v356_v34 = vrot.slane %v354_v27, 1  ;;  %v414_v35 = vshll.u32 %v1703_v14, 16  ;;  %v1709_v49 = vld [vmem:[%s1855_s24 + $0x14] ss:$0 sps:$4 sm:$0x11]   ;;  %s192_s22 = sadd.s32 %s1455_s21, %s1454_s20 }
  0x1e   : > { %493 = vrot.lane.b32.xlu1 %v476_v24, %s1788_s26  ;;  %v364_v37 = vor.u32 %v363_v28, %v359_v20  ;;  %v352_v38 = vor.u32 %v351_v29, %v347_v22  ;;  %v411_v39 = vrot.slane %v409_v31, 1  ;;  %v395_v40 = vshrl.u32 %v1868_v2, 16  ;;  %v1710_v58 = vld [vmem:[%s1855_s24 + $0x50] ss:$0 sps:$4 sm:$0x11]  }
  0x1f   : > { %485 = vrot.lane.b32.xlu0 %v464_v32, %s1788_s26  ;;  %v416_v41 = vrot.slane %v414_v35, 1  ;;  %v397_v42 = vshll.u32 %v1868_v2, 16  ;;  %v404_v51 = vrot.slane %v402_v43, 1  ;;  %v635_v53 = vshll.u32 %v1708_v44, 16 }
  0x20   : > { %v369_v45 = vsel %vm345_vm1, %v364_v37, %v368_v33  ;;  %v357_v46 = vsel %vm345_vm1, %v352_v38, %v356_v34  ;;  %v412_v47 = vor.u32 %v411_v39, %v407_v30  ;;  %v632_v55 = vrot.slane %v630_v48, 1  ;;  %v1711_v62 = vld [vmem:[%s1855_s24 + $0x20] ss:$0 sps:$4 sm:$0x11]   ;;  %v1944_v30 = vld [vmem:[%s1855_s24 + $0x48] sm:$0xff]   ;;  %v1959_v38 = vld [vmem:[%s1855_s24 + $0x54] sm:$0xff]  }
  0x21   : > { %v399_v50 = vrot.slane %v397_v42, 1  ;;  %v582_v56 = vshll.u32 %v1861_v1, 16  ;;  %v587_v57 = vshll.u32 %v1709_v49, 16  ;;  %v580_v60 = vshrl.u32 %v1861_v1, 16 }
  0x22   : > { %444 = vrot.lane.b32.xlu1 %v369_v45, %s1789_s27  ;;  %v417_v54 = vsel %vm345_vm1, %v412_v47, %v416_v41  ;;  %v642_v61 = vshll.u32 %v1902_v36, 16  ;;  %v637_v63 = vrot.slane %v635_v53, 1  ;;  %v640_v8 = vshrl.u32 %v1902_v36, 16  ;;  %v1956_v37 = vld [vmem:[%s1855_s24 + $0x50] ss:$0 sps:$4 sm:$0x11]  }
  0x23   : > { %442 = vrot.lane.b32.xlu0 %v357_v46, %s1789_s27  ;;  %v400_v59 = vor.u32 %v399_v50, %v395_v40  ;;  %v584_v3 = vrot.slane %v582_v56, 1  ;;  %v589_v7 = vrot.slane %v587_v57, 1  ;;  %v594_v10 = vshll.u32 %v1914_v52, 16  ;;  %v1964_v40 = vld [vmem:[%s1855_s24 + $0x24] sm:$0xff]  }
  0x24   : > { %v633_v12 = vor.u32 %v632_v55, %v628_v5  ;;  %v644_v13 = vrot.slane %v642_v61, 1  ;;  %v647_v14 = vshll.u32 %v1710_v58, 16  ;;  %v592_v16 = vshrl.u32 %v1914_v52, 16  ;;  %v1978_v48 = vld [vmem:[%s1855_s24 + $0x5c] ss:$0 sps:$4 sm:$0x11]  }
  0x25   : > { %v405_v6 = vsel %vm345_vm1, %v400_v59, %v404_v51  ;;  %v585_v15 = vor.u32 %v584_v3, %v580_v60  ;;  %v596_v17 = vrot.slane %v594_v10, 1  ;;  %v599_v18 = vshll.u32 %v1711_v62, 16  ;;  %v1985_v53 = vld [vmem:[%s1855_s24 + $0x2c] ss:$0 sps:$4 sm:$0x11]   ;;  %v1995_v59 = vld [vmem:[%s1855_s24 + $0x18] sm:$0xff]  }
  0x26   : > { %452 = vrot.lane.b32.xlu1 %v417_v54, %s1789_s27  ;;  %v638_v19 = vsel %vm345_vm1, %v633_v12, %v637_v63  ;;  %v645_v20 = vor.u32 %v644_v13, %v640_v8  ;;  %v649_v21 = vrot.slane %v647_v14, 1  ;;  %v703_v25 = vrot.slane %v1858_v0, 1  ;;  %v1988_v54 = vld [vmem:[%s1855_s24 + $0x48] sm:$0xff]  }
  0x27   : > { %450 = vrot.lane.b32.xlu0 %v405_v6, %s1789_s27  ;;  %v590_v5 = vsel %vm345_vm1, %v585_v15, %v589_v7  ;;  %v597_v22 = vor.u32 %v596_v17, %v592_v16  ;;  %v601_v23 = vrot.slane %v599_v18, 1  ;;  %v704_v26 = vrot.slane %v1708_v44, 1  ;;  %v2002_v7 = vld [vmem:[%s1855_s24 + $0x50] ss:$0 sps:$4 sm:$0x11]  }
  0x28   : > { %v650_v24 = vsel %vm345_vm1, %v645_v20, %v649_v21  ;;  %v691_v28 = vrot.slane %v1861_v1, 1  ;;  %v692_v29 = vrot.slane %v1709_v49, 1  ;;  %v706_v32 = vrot.slane %v1902_v36, 1  ;;  %v1953_v1 = vld [vmem:[%s1855_s24 + $0x18] sm:$0xff]  }
  0x29   : > { %v602_v27 = vsel %vm345_vm1, %v597_v22, %v601_v23  ;;  %v705_v31 = vsel %vm458_vm0, %v703_v25, %v704_v26  ;;  %v707_v0 = vrot.slane %v1710_v58, 1  ;;  %v694_v34 = vrot.slane %v1914_v52, 1  ;;  %v2012_v17 = vld [vmem:[%s1855_s24 + $0x20] ss:$0 sps:$4 sm:$0x11]   ;;  %v2021_v22 = vld [vmem:[%s1855_s24 + $0x54] sm:$0xff]  }
  0x2a   : > { %549 = vrot.lane.b32.xlu1 %v1902_v36, %s1787_s25  ;;  %v693_v33 = vsel %vm458_vm0, %v691_v28, %v692_v29  ;;  %v695_v35 = vrot.slane %v1711_v62, 1  ;;  %v862_v39 = vshll.u32 %v1944_v30, 16  ;;  %v1967_v36 = vld [vmem:[%s1855_s24 + $0x20] ss:$0 sps:$4 sm:$0x11]   ;;  %v814_v43 = vshll.u32 %v1953_v1, 16 }
  0x2b   : > { %541 = vrot.lane.b32.xlu0 %v1914_v52, %s1787_s25  ;;  %v708_v41 = vsel %vm458_vm0, %v706_v32, %v707_v0  ;;  %v860_v44 = vshrl.u32 %v1944_v30, 16  ;;  %v867_v46 = vshll.u32 %v1956_v37, 16  ;;  %v819_v47 = vshll.u32 %v1967_v36, 16  ;;  %v2034_v32 = vld [vmem:[%s1855_s24 + $0x5c] ss:$0 sps:$4 sm:$0x11]  }
  0x2c   : > { %v696_v42 = vsel %vm458_vm0, %v694_v34, %v695_v35  ;;  %v864_v45 = vrot.slane %v862_v39, 1  ;;  %v874_v49 = vshll.u32 %v1959_v38, 16  ;;  %v826_v50 = vshll.u32 %v1964_v40, 16 }
  0x2d   : > { %v812_v51 = vshrl.u32 %v1953_v1, 16  ;;  %v816_v52 = vrot.slane %v814_v43, 1  ;;  %v869_v56 = vrot.slane %v867_v46, 1  ;;  %v872_v57 = vshrl.u32 %v1959_v38, 16  ;;  %v1745_v43 = vld [vmem:[%s2335_s1 + $0x8] sm:$0xff]  }
  0x2e   : > { %683 = vrot.lane.b32.xlu1 %v638_v19, %s1790_s28  ;;  %v865_v55 = vor.u32 %v864_v45, %v860_v44  ;;  %v824_v58 = vshrl.u32 %v1964_v40, 16  ;;  %v821_v60 = vrot.slane %v819_v47, 1  ;;  %v876_v61 = vrot.slane %v874_v49, 1 }
  0x2f   : > { %675 = vrot.lane.b32.xlu0 %v590_v5, %s1790_s28  ;;  %v879_v62 = vshll.u32 %v1978_v48, 16  ;;  %v828_v63 = vrot.slane %v826_v50, 1  ;;  %v817_v3 = vor.u32 %v816_v52, %v812_v51  ;;  %v831_v6 = vshll.u32 %v1985_v53, 16 }
  0x30   : > { %v870_v8 = vsel %vm345_vm1, %v865_v55, %v869_v56  ;;  %v877_v10 = vor.u32 %v876_v61, %v872_v57  ;;  %v421_v13 = vshll.u32 %v1988_v54, 16  ;;  %v373_v18 = vshll.u32 %v1995_v59, 16 }
  0x31   : > { %v881_v12 = vrot.slane %v879_v62, 1  ;;  %v822_v14 = vsel %vm345_vm1, %v817_v3, %v821_v60  ;;  %v829_v15 = vor.u32 %v828_v63, %v824_v58  ;;  %v833_v16 = vrot.slane %v831_v6, 1 }
  0x32   : > { %685 = vrot.lane.b32.xlu1 %v650_v24, %s1790_s28  ;;  %v935_v19 = vrot.slane %v1944_v30, 1  ;;  %v936_v20 = vrot.slane %v1956_v37, 1  ;;  %v923_v21 = vrot.slane %v1953_v1, 1  ;;  %v426_v5 = vshll.u32 %v2002_v7, 16  ;;  %v1744_v37 = vld [vmem:[%s2335_s1] sm:$0xff]  }
  0x33   : > { %677 = vrot.lane.b32.xlu0 %v602_v27, %s1790_s28  ;;  %v882_v23 = vsel %vm345_vm1, %v877_v10, %v881_v12  ;;  %v924_v24 = vrot.slane %v1967_v36, 1  ;;  %v419_v25 = vshrl.u32 %v1988_v54, 16  ;;  %v423_v26 = vrot.slane %v421_v13, 1  ;;  %1618 = vmatprep.subr.bf16.mxu0 %v1744_v37 }
  0x34   : > { %v834_v27 = vsel %vm345_vm1, %v829_v15, %v833_v16  ;;  %v371_v28 = vshrl.u32 %v1995_v59, 16  ;;  %v375_v29 = vrot.slane %v373_v18, 1  ;;  %v428_v0 = vrot.slane %v426_v5, 1  ;;  %1640 = vmatprep.subr.bf16.mxu1 %v1744_v37  ;;  %1619 = vmatpush3.bf16.msra.mxu0 %v1744_v37  ;;  %v2082_v15 = vld [vmem:[%s1855_s24 + $0x54] sm:$0xff]  }
  0x35   : > { %v937_v34 = vsel %vm458_vm0, %v935_v19, %v936_v20  ;;  %v424_v35 = vor.u32 %v423_v26, %v419_v25  ;;  %v925_v39 = vsel %vm458_vm0, %v923_v21, %v924_v24  ;;  %v938_v44 = vrot.slane %v1959_v38, 1  ;;  %1643 = vmatpush3.bf16.msra.mxu1 %v1744_v37  ;;  %1620 = vmatprep.subr.bf16.mxu0 %v1745_v43  ;;  %v1746_v16 = vld [vmem:[%s2335_s1 + $0x10] sm:$0x7f]   ;;  %v2090_v19 = vld [vmem:[%s1855_s24 + $0x24] sm:$0xff]  }
  0x36   : > { %723 = vrot.lane.b32.xlu1 %v705_v31, %s1791_s29  ;;  %v2031_v31 = vld [vmem:[%s1855_s24 + $0x24] sm:$0xff]   ;;  %v376_v36 = vor.u32 %v375_v29, %v371_v28  ;;  %v939_v45 = vrot.slane %v1978_v48, 1  ;;  %v926_v46 = vrot.slane %v1964_v40, 1  ;;  %v927_v47 = vrot.slane %v1985_v53, 1  ;;  %1641 = vmatprep.subr.bf16.mxu1 %v1745_v43  ;;  %v2103_v29 = vld [vmem:[%s1855_s24 + $0x30] sm:$0xff]  }
  0x37   : > { %715 = vrot.lane.b32.xlu0 %v693_v33, %s1791_s29  ;;  %v433_v33 = vshll.u32 %v2021_v22, 16  ;;  %v429_v49 = vsel %vm345_vm1, %v424_v35, %v428_v0  ;;  %v431_v50 = vshrl.u32 %v2021_v22, 16  ;;  %v438_v52 = vshll.u32 %v2034_v32, 16  ;;  %v2097_v24 = vld [vmem:[%s1855_s24 + $0x60] sm:$0xff]  }
  0x38   : > { %1621 = vmatpush3.bf16.msra.mxu0 %v1745_v43  ;;  %v940_v53 = vsel %vm458_vm0, %v938_v44, %v939_v45  ;;  %v928_v58 = vsel %vm458_vm0, %v926_v46, %v927_v47  ;;  %v477_v63 = vrot.slane %v1988_v54, 1  ;;  %v478_v3 = vrot.slane %v2002_v7, 1  ;;  %v1732_v25 = vld [vmem:[%s1855_s24 + $0x5c] ss:$0 sps:$4 sm:$0x11]  }
  0x39   : > { %v435_v51 = vrot.slane %v433_v33, 1  ;;  %v440_v57 = vrot.slane %v438_v52, 1  ;;  %1644 = vmatpush3.bf16.msra.mxu1 %v1745_v43  ;;  %v466_v10 = vrot.slane %v2012_v17, 1  ;;  %v480_v13 = vrot.slane %v2021_v22, 1 }
  0x3a   : > { %725 = vrot.lane.b32.xlu1 %v708_v41, %s1791_s29  ;;  %v479_v12 = vsel %vm458_vm0, %v477_v63, %v478_v3  ;;  %v468_v7 = vrot.slane %v2031_v31, 1  ;;  %v1795_v20 = vmov 65535   ;;  %v654_v26 = vshll.u32 %v2082_v15, 16 }
  0x3b   : > { %717 = vrot.lane.b32.xlu0 %v696_v42, %s1791_s29  ;;  %v385_v42 = vshll.u32 %v2031_v31, 16  ;;  %v436_v56 = vor.u32 %v435_v51, %v431_v50  ;;  %v1148_v21 = vsel %vm1146_vm2, 4294967295, %v1795_v20  ;;  %v652_v0 = vshrl.u32 %v2082_v15, 16 }
  0x3c   : > { %v1149_v5 = vsel %vm458_vm0, %v1148_v21, 0  ;;  %v604_v33 = vshrl.u32 %v2090_v19, 16  ;;  %v659_v35 = vshll.u32 %v1732_v25, 16  ;;  %v666_v37 = vshll.u32 %v2097_v24, 16  ;;  %v1739_v21 = vld [vmem:[%s1855_s24 + $0x3c] sm:$0xff]  }
  0x3d   : > { %v387_v48 = vrot.slane %v385_v42, 1  ;;  %v441_v62 = vsel %vm345_vm1, %v436_v56, %v440_v57  ;;  %v618_v42 = vshll.u32 %v2103_v29, 16  ;;  %v664_v43 = vshrl.u32 %v2097_v24, 16 }
  0x3e   : > { %779 = vrot.lane.b32.xlu1 %v1944_v30, %s1792_s30  ;;  %v378_v30 = vshll.u32 %v2012_v17, 16  ;;  %v616_v44 = vshrl.u32 %v2103_v29, 16  ;;  %v661_v46 = vrot.slane %v659_v35, 1  ;;  %v668_v47 = vrot.slane %v666_v37, 1 }
  0x3f   : > { %771 = vrot.lane.b32.xlu0 %v1953_v1, %s1792_s30  ;;  %v2041_v1 = vld [vmem:[%s1855_s24 + $0x2c] ss:$0 sps:$4 sm:$0x11]   ;;  %v620_v52 = vrot.slane %v618_v42, 1  ;;  %v697_v63 = vrot.slane %v2090_v19, 1  ;;  %v848_v35 = vshrl.u32 %v1739_v21, 16 }
  0x40   : > { %v380_v41 = vrot.slane %v378_v30, 1  ;;  %v469_v18 = vrot.slane %v2041_v1, 1  ;;  %v1733_v30 = vld [vmem:[%s1855_s24 + $0x2c] ss:$0 sps:$4 sm:$0x11]  }
  0x41   : > { %v621_v56 = vor.u32 %v620_v52, %v616_v44  ;;  %v698_v3 = vrot.slane %v1733_v30, 1 }
  0x42   : > { %781 = vrot.lane.b32.xlu1 %v1959_v38, %s1792_s30  ;;  %v381_v55 = vsel %vm345_vm1, %v376_v36, %v380_v41  ;;  %v383_v38 = vshrl.u32 %v2031_v31, 16  ;;  %v470_v28 = vsel %vm458_vm0, %v468_v7, %v469_v18  ;;  %v611_v36 = vshll.u32 %v1733_v30, 16  ;;  %v1735_v41 = vld [vmem:[%s1855_s24 + $0x38] ss:$0 sps:$4 sm:$0x11]  }
  0x43   : > { %773 = vrot.lane.b32.xlu0 %v1964_v40, %s1792_s30  ;;  %v390_v40 = vshll.u32 %v2041_v1, 16  ;;  %v1734_v1 = vld [vmem:[%s1855_s24 + $0x68] ss:$0 sps:$4 sm:$0x11]   ;;  %v701_v7 = vrot.slane %v1735_v41, 1 }
  0x44   : > { %v388_v60 = vor.u32 %v387_v48, %v383_v38  ;;  %v613_v51 = vrot.slane %v611_v36, 1  ;;  %v669_v48 = vor.u32 %v668_v47, %v664_v43  ;;  %v1740_v18 = vld [vmem:[%s1855_s24 + $0x68] ss:$0 sps:$4 sm:$0x11]  }
  0x45   : > { %v392_v61 = vrot.slane %v390_v40, 1 }
  0x46   : > { %915 = vrot.lane.b32.xlu1 %v870_v8, %s1793_s4  ;;  %v465_v8 = vrot.slane %v1995_v59, 1 }
  0x47   : > { %907 = vrot.lane.b32.xlu0 %v822_v14, %s1793_s4  ;;  %v393_v6 = vsel %vm345_vm1, %v388_v60, %v392_v61  ;;  %v481_v14 = vrot.slane %v2034_v32, 1  ;;  %v606_v32 = vshll.u32 %v2090_v19, 16  ;;  %v709_v60 = vrot.slane %v2082_v15, 1 }
  0x48   : > { %v467_v17 = vsel %vm458_vm0, %v465_v8, %v466_v10  ;;  %v710_v61 = vrot.slane %v1732_v25, 1  ;;  %v712_v8 = vrot.slane %v2097_v24, 1  ;;  %v713_v10 = vrot.slane %v1734_v1, 1 }
  0x4a   : > { %917 = vrot.lane.b32.xlu1 %v882_v23, %s1793_s4  ;;  %v482_v23 = vsel %vm458_vm0, %v480_v13, %v481_v14  ;;  %v699_v13 = vsel %vm458_vm0, %v697_v63, %v698_v3  ;;  %v700_v14 = vrot.slane %v2103_v29, 1  ;;  %v932_v3 = vrot.slane %v1739_v21, 1 }
  0x4b   : > { %909 = vrot.lane.b32.xlu0 %v834_v27, %s1793_s4  ;;  %v1151_v27 = vand.u32 %v1746_v16, %v1149_v5  ;;  %v714_v16 = vsel %vm458_vm0, %v712_v8, %v713_v10  ;;  %v1741_v5 = vld [vmem:[%s1855_s24 + $0x38] ss:$0 sps:$4 sm:$0x11]  }
  0x4c   : > { %v702_v20 = vsel %vm458_vm0, %v700_v14, %v701_v7 }
  0x4d   : > { %1622 = vmatprep.subr.bf16.mxu0 %v1151_v27  ;;  %1642 = vmatprep.subr.bf16.mxu1 %v1151_v27 }
  0x4e   : > { %955 = vrot.lane.b32.xlu1 %v937_v34, %s1794_s9  ;;  %1623 = vmatpush3.bf16.msra.mxu0 %v1151_v27  ;;  %v656_v34 = vrot.slane %v654_v26, 1 }
  0x4f   : > { %947 = vrot.lane.b32.xlu0 %v925_v39, %s1794_s9  ;;  %1645 = vmatpush3.bf16.msra.mxu1 %v1151_v27  ;;  %v608_v39 = vrot.slane %v606_v32, 1  ;;  %v891_v27 = vshll.u32 %v1740_v18, 16  ;;  %v843_v32 = vshll.u32 %v1741_v5, 16 }
  0x50   : > { %v657_v45 = vor.u32 %v656_v34, %v652_v0  ;;  %v1743_v0 = vld [vmem:[%s1855_s24 + $0x44] ss:$0 sps:$4 sm:$0x11]  }
  0x51   : > { %v609_v50 = vor.u32 %v608_v39, %v604_v33  ;;  %v850_v33 = vshll.u32 %v1739_v21, 16  ;;  %v893_v37 = vrot.slane %v891_v27, 1  ;;  %v845_v42 = vrot.slane %v843_v32, 1 }
  0x52   : > { %454 = vrot.lane.b32.xlu1 %v429_v49, %s1789_s27  ;;  %v671_v49 = vshll.u32 %v1734_v1, 16  ;;  %v662_v38 = vsel %vm345_vm1, %v657_v45, %v661_v46  ;;  %v855_v44 = vshll.u32 %v1743_v0, 16 }
  0x53   : > { %446 = vrot.lane.b32.xlu0 %v381_v55, %s1789_s27  ;;  %v623_v55 = vshll.u32 %v1735_v41, 16  ;;  %v852_v43 = vrot.slane %v850_v33, 1 }
  0x54   : > { %v673_v40 = vrot.slane %v671_v49, 1 }
  0x55   : > { %v625_v57 = vrot.slane %v623_v55, 1 }
  0x56   : > { %957 = vrot.lane.b32.xlu1 %v940_v53, %s1794_s9  ;;  %v614_v53 = vsel %vm345_vm1, %v609_v50, %v613_v51  ;;  %v853_v50 = vor.u32 %v852_v43, %v848_v35  ;;  %v857_v51 = vrot.slane %v855_v44, 1 }
  0x57   : > { %949 = vrot.lane.b32.xlu0 %v928_v58, %s1794_s9  ;;  %v674_v58 = vsel %vm345_vm1, %v669_v48, %v673_v40  ;;  %v942_v40 = vrot.slane %v1740_v18, 1 }
  0x5a   : > { %456 = vrot.lane.b32.xlu1 %v441_v62, %s1789_s27  ;;  %v626_v62 = vsel %vm345_vm1, %v621_v56, %v625_v57  ;;  %v930_v57 = vrot.slane %v1741_v5, 1 }
  0x5b   : > { %448 = vrot.lane.b32.xlu0 %v393_v6, %s1789_s27  ;;  %v711_v6 = vsel %vm458_vm0, %v709_v60, %v710_v61 }
  0x5e   : > { %495 = vrot.lane.b32.xlu1 %v479_v12, %s1788_s26  ;;  %v1736_v12 = vld [vmem:[%s1855_s24 + $0x60] sm:$0xff]  }
  0x5f   : > { %487 = vrot.lane.b32.xlu0 %v467_v17, %s1788_s26  ;;  %v2145_v17 = vld [vmem:[%s1855_s24 + $0x6c] sm:$0xff]   ;;  %v941_v48 = vrot.slane %v1736_v12, 1 }
  0x60   : > { %v896_v34 = vshrl.u32 %v2145_v17, 16  ;;  %v944_v61 = vrot.slane %v2145_v17, 1 }
  0x61   : > { %v943_v60 = vsel %vm458_vm0, %v941_v48, %v942_v40 }
  0x62   : > { %497 = vrot.lane.b32.xlu1 %v482_v23, %s1788_s26 }
  0x63   : > { %489 = vrot.lane.b32.xlu0 %v470_v28, %s1788_s26  ;;  %v1742_v28 = vld [vmem:[%s1855_s24 + $0x74] ss:$0 sps:$4 sm:$0x11]  }
  0x64   : > { %v903_v36 = vshll.u32 %v1742_v28, 16 }
  0x66   : > { %551 = vrot.lane.b32.xlu1 %v2082_v15, %s1787_s25  ;;  %v1737_v15 = vld [vmem:[%s1855_s24 + $0x30] sm:$0xff]   ;;  %v905_v47 = vrot.slane %v903_v36, 1 }
  0x67   : > { %543 = vrot.lane.b32.xlu0 %v2090_v19, %s1787_s25  ;;  %v886_v19 = vshll.u32 %v1736_v12, 16  ;;  %v838_v23 = vshll.u32 %v1737_v15, 16  ;;  %v836_v25 = vshrl.u32 %v1737_v15, 16  ;;  %v929_v56 = vrot.slane %v1737_v15, 1 }
  0x69   : > { %v888_v26 = vrot.slane %v886_v19, 1  ;;  %v840_v30 = vrot.slane %v838_v23, 1  ;;  %v931_v63 = vsel %vm458_vm0, %v929_v56, %v930_v57 }
  0x6a   : > { %553 = vrot.lane.b32.xlu1 %v2097_v24, %s1787_s25  ;;  %v884_v24 = vshrl.u32 %v1736_v12, 16 }
  0x6b   : > { %545 = vrot.lane.b32.xlu0 %v2103_v29, %s1787_s25  ;;  %v898_v29 = vshll.u32 %v2145_v17, 16  ;;  %v841_v41 = vor.u32 %v840_v30, %v836_v25  ;;  %s1456_s25 = sshll.u32 %s192_s22, 2 }
  0x6c   : > { %v889_v1 = vor.u32 %v888_v26, %v884_v24  ;;  %s2274_s26 = scalar_lea.vmem %s2337_s3, %s1456_s25 }
  0x6d   : > { %v900_v39 = vrot.slane %v898_v29, 1  ;;  %v846_v49 = vsel %vm345_vm1, %v841_v41, %v845_v42 }
  0x6e   : > { %687 = vrot.lane.b32.xlu1 %v662_v38, %s1790_s28  ;;  %v894_v45 = vsel %vm345_vm1, %v889_v1, %v893_v37 }
  0x6f   : > { %679 = vrot.lane.b32.xlu0 %v614_v53, %s1790_s28  ;;  %v901_v46 = vor.u32 %v900_v39, %v896_v34  ;;  %v858_v53 = vsel %vm345_vm1, %v853_v50, %v857_v51 }
  0x71   : > { %v906_v38 = vsel %vm345_vm1, %v901_v46, %v905_v47 }
  0x72   : > { %689 = vrot.lane.b32.xlu1 %v674_v58, %s1790_s28 }
  0x73   : > { %681 = vrot.lane.b32.xlu0 %v626_v62, %s1790_s28  ;;  %v945_v62 = vrot.slane %v1742_v28, 1 }
  0x76   : > { %727 = vrot.lane.b32.xlu1 %v711_v6, %s1791_s29  ;;  %v933_v6 = vrot.slane %v1743_v0, 1 }
  0x77   : > { %719 = vrot.lane.b32.xlu0 %v699_v13, %s1791_s29 }
  0x78   : > { %v934_v13 = vsel %vm458_vm0, %v932_v3, %v933_v6 }
  0x7a   : > { %729 = vrot.lane.b32.xlu1 %v714_v16, %s1791_s29 }
  0x7b   : > { %721 = vrot.lane.b32.xlu0 %v702_v20, %s1791_s29 }
  0x7e   : > { %783 = vrot.lane.b32.xlu1 %v1736_v12, %s1792_s30  ;;  %v946_v12 = vsel %vm458_vm0, %v944_v61, %v945_v62 }
  0x7f   : > { %775 = vrot.lane.b32.xlu0 %v1737_v15, %s1792_s30 }
  0x82   : > { %785 = vrot.lane.b32.xlu1 %v2145_v17, %s1792_s30 }
  0x83   : > { %777 = vrot.lane.b32.xlu0 %v1739_v21, %s1792_s30 }
  0x86   : > { %919 = vrot.lane.b32.xlu1 %v894_v45, %s1793_s4 }
  0x87   : > { %911 = vrot.lane.b32.xlu0 %v846_v49, %s1793_s4 }
  0x88   : > { %v548_v52 = vpop.permute.xlu1 %547  ;;  %v540_v55 = vpop.permute.xlu0 %539 }
  0x8a   : > { %921 = vrot.lane.b32.xlu1 %v906_v38, %s1793_s4 }
  0x8b   : > { %913 = vrot.lane.b32.xlu0 %v858_v53, %s1793_s4 }
  0x8c   : > { %v492_v58 = vpop.permute.xlu1 %491 }
  0x8d   : > { %v484_v8 = vpop.permute.xlu0 %483 }
  0x8e   : > { %959 = vrot.lane.b32.xlu1 %v943_v60, %s1794_s9 }
  0x8f   : > { %951 = vrot.lane.b32.xlu0 %v931_v63, %s1794_s9 }
  0x90   : > { %v494_v10 = vpop.permute.xlu1 %493 }
  0x91   : > { %v486_v14 = vpop.permute.xlu0 %485 }
  0x92   : > { %961 = vrot.lane.b32.xlu1 %v946_v12, %s1794_s9 }
  0x93   : > { %953 = vrot.lane.b32.xlu0 %v934_v13, %s1794_s9 }
  0x94   : > { %v445_v7 = vpop.permute.xlu1 %444 }
  0x95   : > { %v443_v15 = vpop.permute.xlu0 %442  ;;  %v967_v51 = vsel %vm963_vm3, %v1882_v11, %v445_v7 }
  0x96   : > { %v965_v33 = vsel %vm963_vm3, %v1872_v4, %v443_v15  ;;  %v984_v53 = vsel %vm980_vm4, %v967_v51, %v486_v14 }
  0x97   : > { %v982_v37 = vsel %vm980_vm4, %v965_v33, %v484_v8 }
  0x98   : > { %v453_v16 = vpop.permute.xlu1 %452 }
  0x99   : > { %v451_v17 = vpop.permute.xlu0 %450  ;;  %v975_v46 = vsel %vm963_vm3, %v1878_v9, %v453_v16 }
  0x9a   : > { %v973_v0 = vsel %vm963_vm3, %v1868_v2, %v451_v17  ;;  %v999_v2 = vsel %vm997_vm5, %v982_v37, %v540_v55  ;;  %v992_v40 = vsel %vm980_vm4, %v975_v46, %v494_v10 }
  0x9b   : > { %v990_v35 = vsel %vm980_vm4, %v973_v0, %v492_v58 }
  0x9c   : > { %v550_v18 = vpop.permute.xlu1 %549  ;;  %v1007_v39 = vsel %vm997_vm5, %v990_v35, %v548_v52 }
  0x9d   : > { %v542_v19 = vpop.permute.xlu0 %541  ;;  %v1009_v9 = vsel %vm997_vm5, %v992_v40, %v550_v18 }
  0x9e   : > { %v1001_v11 = vsel %vm997_vm5, %v984_v53, %v542_v19 }
  0xa0   : > { %v684_v20 = vpop.permute.xlu1 %683 }
  0xa1   : > { %v676_v21 = vpop.permute.xlu0 %675  ;;  %v1024_v41 = vsel %vm1014_vm6, %v1007_v39, %v684_v20 }
  0xa2   : > { %v1016_v4 = vsel %vm1014_vm6, %v999_v2, %v676_v21 }
  0xa4   : > { %v686_v5 = vpop.permute.xlu1 %685 }
  0xa5   : > { %v678_v23 = vpop.permute.xlu0 %677  ;;  %v1026_v57 = vsel %vm1014_vm6, %v1009_v9, %v686_v5 }
  0xa6   : > { %v1018_v60 = vsel %vm1014_vm6, %v1001_v11, %v678_v23 }
  0xa8   : > { %v724_v24 = vpop.permute.xlu1 %723 }
  0xa9   : > { %v716_v25 = vpop.permute.xlu0 %715  ;;  %v1041_v43 = vsel %vm1031_vm7, %v1024_v41, %v724_v24 }
  0xaa   : > { %v1033_v44 = vsel %vm1031_vm7, %v1016_v4, %v716_v25 }
  0xac   : > { %v726_v26 = vpop.permute.xlu1 %725 }
  0xad   : > { %v718_v27 = vpop.permute.xlu0 %717  ;;  %v1043_v61 = vsel %vm1031_vm7, %v1026_v57, %v726_v26 }
  0xae   : > { %v1035_v62 = vsel %vm1031_vm7, %v1018_v60, %v718_v27 }
  0xb0   : > { %v780_v28 = vpop.permute.xlu1 %779 }
  0xb1   : > { %v772_v29 = vpop.permute.xlu0 %771  ;;  %v1058_v45 = vsel %vm1048_vm8, %v1041_v43, %v780_v28 }
  0xb2   : > { %v1050_v47 = vsel %vm1048_vm8, %v1033_v44, %v772_v29 }
  0xb4   : > { %v782_v30 = vpop.permute.xlu1 %781 }
  0xb5   : > { %v774_v32 = vpop.permute.xlu0 %773  ;;  %v1060_v63 = vsel %vm1048_vm8, %v1043_v61, %v782_v30 }
  0xb6   : > { %v1052_v3 = vsel %vm1048_vm8, %v1035_v62, %v774_v32 }
  0xb8   : > { %v916_v34 = vpop.permute.xlu1 %915 }
  0xb9   : > { %v908_v1 = vpop.permute.xlu0 %907  ;;  %v1075_v49 = vsel %vm1065_vm9, %v1058_v45, %v916_v34 }
  0xba   : > { %v1067_v52 = vsel %vm1065_vm9, %v1050_v47, %v908_v1 }
  0xbc   : > { %v918_v36 = vpop.permute.xlu1 %917 }
  0xbd   : > { %v910_v42 = vpop.permute.xlu0 %909  ;;  %v1077_v6 = vsel %vm1065_vm9, %v1060_v63, %v918_v36 }
  0xbe   : > { %v1069_v10 = vsel %vm1065_vm9, %v1052_v3, %v910_v42 }
  0xc0   : > { %v956_v50 = vpop.permute.xlu1 %955 }
  0xc1   : > { %v948_v55 = vpop.permute.xlu0 %947  ;;  %v1092_v38 = vsel %vm1082_vm10, %v1075_v49, %v956_v50 }
  0xc2   : > { %v1084_v48 = vsel %vm1082_vm10, %v1067_v52, %v948_v55  ;;  %1632 = vmatprep.mubr.msk.bf16.mxu1 %vm1129_vm11, %v1092_v38 }
  0xc3   : > { %1624 = vmatprep.mubr.msk.bf16.mxu0 %vm1129_vm11, %v1084_v48 }
  0xc4   : > { %v455_v56 = vpop.permute.xlu1 %454 }
  0xc5   : > { %v447_v58 = vpop.permute.xlu0 %446  ;;  %v977_v16 = vsel %vm963_vm3, %v1988_v54, %v455_v56 }
  0xc6   : > { %v969_v18 = vsel %vm963_vm3, %v1995_v59, %v447_v58 }
  0xc8   : > { %v958_v8 = vpop.permute.xlu1 %957 }
  0xc9   : > { %v1094_v12 = vsel %vm1082_vm10, %v1077_v6, %v958_v8  ;;  %v950_v13 = vpop.permute.xlu0 %949 }
  0xca   : > { %v1086_v14 = vsel %vm1082_vm10, %v1069_v10, %v950_v13  ;;  %1633 = vmatmul.mubr.msk.bf16.vlgmr.msra.gmra.mrb[0].mxu1 %vm1129_vm11, %v1094_v12  ;;  %v2264_v13 = vld [vmem:[%s2336_s2] ss:$0 sm:$0xff] }
  0xcb   : > { %1625 = vmatmul.mubr.msk.bf16.vlgmr.msra.gmra.mrb[0].mxu0 %vm1129_vm11, %v1086_v14 }
  0xcc   : > { %v457_v7 = vpop.permute.xlu1 %456 }
  0xcd   : > { %v449_v15 = vpop.permute.xlu0 %448  ;;  %v979_v5 = vsel %vm963_vm3, %v2021_v22, %v457_v7 }
  0xce   : > { %v971_v24 = vsel %vm963_vm3, %v2031_v31, %v449_v15 }
  0xd0   : > { %v496_v17 = vpop.permute.xlu1 %495 }
  0xd1   : > { %v994_v19 = vsel %vm980_vm4, %v977_v16, %v496_v17  ;;  %v488_v20 = vpop.permute.xlu0 %487 }
  0xd2   : > { %v986_v21 = vsel %vm980_vm4, %v969_v18, %v488_v20 }
  0xd4   : > { %v498_v23 = vpop.permute.xlu1 %497 }
  0xd5   : > { %v996_v25 = vsel %vm980_vm4, %v979_v5, %v498_v23  ;;  %v490_v26 = vpop.permute.xlu0 %489 }
  0xd6   : > { %v988_v54 = vsel %vm980_vm4, %v971_v24, %v490_v26 }
  0xd8   : > { %v552_v27 = vpop.permute.xlu1 %551 }
  0xd9   : > { %v544_v28 = vpop.permute.xlu0 %543  ;;  %v1011_v42 = vsel %vm997_vm5, %v994_v19, %v552_v27 }
  0xda   : > { %v1003_v43 = vsel %vm997_vm5, %v986_v21, %v544_v28 }
  0xdc   : > { %v554_v59 = vpop.permute.xlu1 %553 }
  0xdd   : > { %v546_v29 = vpop.permute.xlu0 %545  ;;  %v1013_v51 = vsel %vm997_vm5, %v996_v25, %v554_v59 }
  0xde   : > { %v1005_v48 = vsel %vm997_vm5, %v988_v54, %v546_v29 }
  0xe0   : > { %v688_v30 = vpop.permute.xlu1 %687 }
  0xe1   : > { %v680_v32 = vpop.permute.xlu0 %679  ;;  %v1028_v44 = vsel %vm1014_vm6, %v1011_v42, %v688_v30 }
  0xe2   : > { %v1020_v46 = vsel %vm1014_vm6, %v1003_v43, %v680_v32 }
  0xe4   : > { %v690_v0 = vpop.permute.xlu1 %689 }
  0xe5   : > { %v682_v33 = vpop.permute.xlu0 %681  ;;  %v1030_v40 = vsel %vm1014_vm6, %v1013_v51, %v690_v0 }
  0xe6   : > { %v1022_v11 = vsel %vm1014_vm6, %v1005_v48, %v682_v33 }
  0xe8   : > { %v728_v34 = vpop.permute.xlu1 %727 }
  0xe9   : > { %v720_v35 = vpop.permute.xlu0 %719  ;;  %v1045_v47 = vsel %vm1031_vm7, %v1028_v44, %v728_v34 }
  0xea   : > { %v1037_v49 = vsel %vm1031_vm7, %v1020_v46, %v720_v35 }
  0xec   : > { %v730_v22 = vpop.permute.xlu1 %729 }
  0xed   : > { %v722_v1 = vpop.permute.xlu0 %721  ;;  %v1047_v57 = vsel %vm1031_vm7, %v1030_v40, %v730_v22 }
  0xee   : > { %v1039_v60 = vsel %vm1031_vm7, %v1022_v11, %v722_v1 }
  0xf0   : > { %v784_v37 = vpop.permute.xlu1 %783 }
  0xf1   : > { %v776_v39 = vpop.permute.xlu0 %775  ;;  %v1062_v50 = vsel %vm1048_vm8, %v1045_v47, %v784_v37 }
  0xf2   : > { %v1054_v52 = vsel %vm1048_vm8, %v1037_v49, %v776_v39 }
  0xf4   : > { %v786_v31 = vpop.permute.xlu1 %785 }
  0xf5   : > { %v778_v36 = vpop.permute.xlu0 %777  ;;  %v1064_v61 = vsel %vm1048_vm8, %v1047_v57, %v786_v31 }
  0xf6   : > { %v1056_v62 = vsel %vm1048_vm8, %v1039_v60, %v778_v36 }
  0xf8   : > { %v920_v41 = vpop.permute.xlu1 %919 }
  0xf9   : > { %v912_v2 = vpop.permute.xlu0 %911  ;;  %v1079_v55 = vsel %vm1065_vm9, %v1062_v50, %v920_v41 }
  0xfa   : > { %v1071_v9 = vsel %vm1065_vm9, %v1054_v52, %v912_v2 }
  0xfc   : > { %v922_v4 = vpop.permute.xlu1 %921 }
  0xfd   : > { %v914_v45 = vpop.permute.xlu0 %913  ;;  %v1081_v63 = vsel %vm1065_vm9, %v1064_v61, %v922_v4 }
  0xfe   : > { %v1073_v6 = vsel %vm1065_vm9, %v1056_v62, %v914_v45 }
 0x100   : > { %v960_v38 = vpop.permute.xlu1 %959 }
 0x101   : > { %v1096_v53 = vsel %vm1082_vm10, %v1079_v55, %v960_v38  ;;  %v952_v56 = vpop.permute.xlu0 %951 }
 0x102   : > { %v1088_v58 = vsel %vm1082_vm10, %v1071_v9, %v952_v56  ;;  %1636 = vmatprep.mubr.msk.bf16.mxu1 %vm1129_vm11, %v1096_v53 }
 0x103   : > { %1628 = vmatprep.mubr.msk.bf16.mxu0 %vm1129_vm11, %v1088_v58 }
 0x104   : > { %v962_v3 = vpop.permute.xlu1 %961 }
 0x105   : > { %v1098_v8 = vsel %vm1082_vm10, %v1081_v63, %v962_v3  ;;  %v954_v10 = vpop.permute.xlu0 %953 }
 0x106   : > { %v1090_v12 = vsel %vm1082_vm10, %v1073_v6, %v954_v10  ;;  %1637 = vmatmul.mubr.msk.bf16.gmra.mrb[4].mxu1 %vm1129_vm11, %v1098_v8 }
 0x107   : > { %1629 = vmatmul.mubr.msk.bf16.gmra.mrb[4].mxu0 %vm1129_vm11, %v1090_v12 }
 0x19d   : > { %v1634_v14 = vpop.f32.mrb[0].mxu1 }
 0x19e   : > { %v1626_v7 = vpop.f32.mrb[0].mxu0  ;;  %v1228_v15 = vadd.f32 %v1634_v14, %v2264_v13  ;;  %v1219_v16 = vpop.f32.mrb[1].mxu1 }
 0x19f   : > { %v1196_v17 = vadd.f32 %v1626_v7, %v2264_v13  ;;  %v1187_v18 = vpop.f32.mrb[1].mxu0  ;;  %v1220_v19 = vadd.f32 %v2264_v13, %v1219_v16  ;;  %v1635_v20 = vpop.f32.mrb[2].mxu1 }
 0x1a0   : > { %v1260_v21 = vmax.f32 %v1228_v15, 0.0  ;;  %v1188_v5 = vadd.f32 %v2264_v13, %v1187_v18  ;;  %v1627_v23 = vpop.f32.mrb[2].mxu0  ;;  %v1231_v24 = vadd.f32 %v1635_v20, %v2264_v13  ;;  %v1222_v25 = vpop.f32.mrb[3].mxu1 }
 0x1a1   : > { %v1252_v26 = vmax.f32 %v1196_v17, 0.0  ;;  %v1258_v54 = vmax.f32 %v1220_v19, 0.0  ;;  %v1199_v27 = vadd.f32 %v1627_v23, %v2264_v13  ;;  %v1190_v28 = vpop.f32.mrb[3].mxu0  ;;  %v1223_v59 = vadd.f32 %v2264_v13, %v1222_v25 }
 0x1a2   : > { %v1601_v29 = vpack.c.bf16 %v1260_v21, %v1260_v21  ;;  %v1250_v30 = vmax.f32 %v1188_v5, 0.0  ;;  %v1261_v32 = vmax.f32 %v1231_v24, 0.0  ;;  %v1191_v0 = vadd.f32 %v2264_v13, %v1190_v28 }
 0x1a3   : > { %v1593_v33 = vpack.c.bf16 %v1252_v26, %v1252_v26  ;;  %v1599_v34 = vpack.c.bf16 %v1258_v54, %v1258_v54  ;;  %v1253_v35 = vmax.f32 %v1199_v27, 0.0  ;;  %v1259_v22 = vmax.f32 %v1223_v59, 0.0 }
 0x1a4   : > { %1341 = vst.msk [vmem:[%s2274_s26 + $0x28] sm:$0xf] %vm1330_vm12, %v1601_v29  ;;  %v1591_v1 = vpack.c.bf16 %v1250_v30, %v1250_v30  ;;  %v1602_v37 = vpack.c.bf16 %v1261_v32, %v1261_v32  ;;  %v1251_v39 = vmax.f32 %v1191_v0, 0.0 }
 0x1a5   : > { %1333 = vst.msk [vmem:[%s2274_s26 + $0x8] sm:$0xf] %vm1330_vm12, %v1593_v33  ;;  %1339 = vst.msk [vmem:[%s2274_s26 + $0x20] sm:$0xf] %vm1330_vm12, %v1599_v34  ;;  %v1594_v31 = vpack.c.bf16 %v1253_v35, %v1253_v35  ;;  %v1600_v36 = vpack.c.bf16 %v1259_v22, %v1259_v22 }
 0x1a6   : > { %1331 = vst.msk [vmem:[%s2274_s26] sm:$0xf] %vm1330_vm12, %v1591_v1  ;;  %1342 = vst.msk [vmem:[%s2274_s26 + $0x2c] sm:$0xf] %vm1330_vm12, %v1602_v37  ;;  %v1592_v41 = vpack.c.bf16 %v1251_v39, %v1251_v39 }
 0x1a7   : > { %1334 = vst.msk [vmem:[%s2274_s26 + $0xc] sm:$0xf] %vm1330_vm12, %v1594_v31  ;;  %1340 = vst.msk [vmem:[%s2274_s26 + $0x24] sm:$0xf] %vm1330_vm12, %v1600_v36 }
 0x1a8   : > { %1332 = vst.msk [vmem:[%s2274_s26 + $0x4] sm:$0xf] %vm1330_vm12, %v1592_v41 }
 0x1d9   : > { %v1638_v2 = vpop.f32.mrb[4].mxu1 }
 0x1da   : > { %v1630_v42 = vpop.f32.mrb[4].mxu0  ;;  %v1244_v4 = vadd.f32 %v1638_v2, %v2264_v13  ;;  %v1235_v43 = vpop.f32.mrb[5].mxu1 }
 0x1db   : > { %v1212_v44 = vadd.f32 %v1630_v42, %v2264_v13  ;;  %v1203_v45 = vpop.f32.mrb[5].mxu0  ;;  %v1236_v46 = vadd.f32 %v2264_v13, %v1235_v43  ;;  %v1639_v47 = vpop.f32.mrb[6].mxu1 }
 0x1dc   : > { %v1264_v49 = vmax.f32 %v1244_v4, 0.0  ;;  %v1204_v50 = vadd.f32 %v2264_v13, %v1203_v45  ;;  %v1631_v51 = vpop.f32.mrb[6].mxu0  ;;  %v1247_v52 = vadd.f32 %v1639_v47, %v2264_v13  ;;  %v1238_v55 = vpop.f32.mrb[7].mxu1 }
 0x1dd   : > { %v1256_v38 = vmax.f32 %v1212_v44, 0.0  ;;  %v1262_v48 = vmax.f32 %v1236_v46, 0.0  ;;  %v1215_v40 = vadd.f32 %v1631_v51, %v2264_v13  ;;  %v1206_v9 = vpop.f32.mrb[7].mxu0  ;;  %v1239_v53 = vadd.f32 %v2264_v13, %v1238_v55 }
 0x1de   : > { %v1605_v56 = vpack.c.bf16 %v1264_v49, %v1264_v49  ;;  %v1254_v11 = vmax.f32 %v1204_v50, 0.0  ;;  %v1265_v57 = vmax.f32 %v1247_v52, 0.0  ;;  %v1207_v58 = vadd.f32 %v2264_v13, %v1206_v9 }
 0x1df   : > { %v1597_v60 = vpack.c.bf16 %v1256_v38, %v1256_v38  ;;  %v1603_v61 = vpack.c.bf16 %v1262_v48, %v1262_v48  ;;  %v1257_v62 = vmax.f32 %v1215_v40, 0.0  ;;  %v1263_v63 = vmax.f32 %v1239_v53, 0.0 }
 0x1e0   : > { %1345 = vst.msk [vmem:[%s2274_s26 + $0x38] sm:$0xf] %vm1330_vm12, %v1605_v56  ;;  %v1595_v3 = vpack.c.bf16 %v1254_v11, %v1254_v11  ;;  %v1606_v6 = vpack.c.bf16 %v1265_v57, %v1265_v57  ;;  %v1255_v8 = vmax.f32 %v1207_v58, 0.0 }
 0x1e1   : > { %1337 = vst.msk [vmem:[%s2274_s26 + $0x18] sm:$0xf] %vm1330_vm12, %v1597_v60  ;;  %1343 = vst.msk [vmem:[%s2274_s26 + $0x30] sm:$0xf] %vm1330_vm12, %v1603_v61  ;;  %v1598_v10 = vpack.c.bf16 %v1257_v62, %v1257_v62  ;;  %v1604_v12 = vpack.c.bf16 %v1263_v63, %v1263_v63 }
 0x1e2   : > { %1335 = vst.msk [vmem:[%s2274_s26 + $0x10] sm:$0xf] %vm1330_vm12, %v1595_v3  ;;  %1346 = vst.msk [vmem:[%s2274_s26 + $0x3c] sm:$0xf] %vm1330_vm12, %v1606_v6  ;;  %v1596_v13 = vpack.c.bf16 %v1255_v8, %v1255_v8 }
 0x1e3   : > { %1338 = vst.msk [vmem:[%s2274_s26 + $0x1c] sm:$0xf] %vm1330_vm12, %v1598_v10  ;;  %1344 = vst.msk [vmem:[%s2274_s26 + $0x34] sm:$0xf] %vm1330_vm12, %v1604_v12 }
 0x1e4   : > { %1336 = vst.msk [vmem:[%s2274_s26 + $0x14] sm:$0xf] %vm1330_vm12, %v1596_v13 }
 0x1e5 PF: > { %s13_s16 = sadd.s32 1, %s1785_s16   ;;  %s2338_s12 = smov %s1777_s14 }
 0x1e6   : > { %p10_p7 = scmp.ge.s32.totalorder %s13_s16, 6   ;;  %s2339_s13 = smov %s1781_s15 }
 0x1e7   : > { %s2340_s14 = smov %s2343_s17  ;;  %s2341_s15 = smov %s2347_s18 }
 0x1e8   :  { %12 = sbr.rel (!%p10_p7) target bundleno = 3 (0x3), region = 65 }

// kernel: _lambda_.4
= control target key start
LH: loop header
LB: loop body
LE: loop exit
PB: predicated region body
PF: predicated region fallthrough
CT: control target
= control target key end

     0   :  { %s1849_s12 = smov 0   ;;  %s1851_s13 = smov 0   ;;  %s2335_s0 = inlined_call_operand.vmem [shape: bf16[2,10,10,64], index: 0, kind: input, shape index: {}]   ;;  %s2336_s1 = inlined_call_operand.vmem [shape: bf16[576,32], index: 1, kind: input, shape index: {}]   ;;  %s2337_s2 = inlined_call_operand.vmem [shape: f32[1,32], index: 2, kind: input, shape index: {}]   ;;  %s2338_s3 = inlined_call_operand.vmem [shape: bf16[2,8,8,32], index: 3, kind: output, shape index: {}]  }
   0x1   :  { %s1853_s14 = smov 0  }
   0x2 LB: > { %s25_s15 = sadd.s32 1, %s1822_s13  ;;  %p1466_p0 = scmp.ge.s32.totalorder %s1826_s14, 1  ;;  %s1826_s14 = sphi %s1853_s14, %s13_s14   ;;  %s1822_s13 = sphi %s1851_s13, %s2340_s13   ;;  %s1818_s12 = sphi %s1849_s12, %s2339_s12  }
   0x3   : > { %p27_p1 = scmp.ge.s32.totalorder %s25_s15, 2  ;;  %p151_p2 = scmp.lt.s32.totalorder %s1826_s14, 3 }
   0x5   : > { %s2342_s15 = smov (%p27_p1, %s25_s15), 0  ;;  %p152_p3 = pnand %p1466_p0, %p151_p2 }
   0x6   : > { %p179_p4 = scmp.lt.s32.totalorder (!%p152_p3), %s1818_s12, 1  ;;  %v1768_v0 = vld [vmem:[%s2336_s1 + $0xc0] sm:$0xff] (!%p152_p3)   ;;  %v1772_v4 = vld [vmem:[%s2336_s1 + $0xc8] sm:$0xff] (!%p152_p3)   ;;  %s1828_s5 = smov (!%p152_p3), 64   ;;  %v1776_v38 = vld [vmem:[%s2336_s1 + $0xd0] sm:$0xff] (!%p152_p3)   ;;  %vm639_vm0 = vcmask (!%p152_p3), 523264  }
   0x7   : > { %155 = sbr.rel (%p152_p3) target bundleno = 429 (0x1ad), region = 32  ;;  %v1769_v1 = vld [vmem:[%s2336_s1 + $0x80] sm:$0xff] (!%p152_p3)   ;;  %1638 = vmatprep.subr.bf16.mxu1 (!%p152_p3), %v1768_v0  ;;  %v1773_v5 = vld [vmem:[%s2336_s1 + $0x88] sm:$0xff] (!%p152_p3)   ;;  %v1777_v48 = vld [vmem:[%s2336_s1 + $0x90] sm:$0xff] (!%p152_p3)   ;;  %vm1362_vm1 = vcmask (!%p152_p3), 257024  }
   0x8   : > { %v1770_v2 = vld [vmem:[%s2336_s1 + $0x40] sm:$0xff] (!%p152_p3)   ;;  %1639 = vmatpush3.bf16.msra.mxu1 (!%p152_p3), %v1769_v1  ;;  %v1774_v22 = vld [vmem:[%s2336_s1 + $0x48] sm:$0xff] (!%p152_p3)  }
   0x9   : > { %v1771_v3 = vld [vmem:[%s2336_s1] sm:$0xff] (!%p152_p3)   ;;  %1598 = vmatprep.subr.bf16.mxu0 (!%p152_p3), %v1770_v2  ;;  %1640 = vmatprep.subr.bf16.mxu1 (!%p152_p3), %v1772_v4  ;;  %v1775_v27 = vld [vmem:[%s2336_s1 + $0x8] sm:$0xff] (!%p152_p3)   ;;  %v1778_v2 = vld [vmem:[%s2336_s1 + $0x50] sm:$0xff] (!%p152_p3)  }
   0xa   : > { %1599 = vmatpush3.bf16.msra.mxu0 (!%p152_p3), %v1771_v3 }
   0xb   : > { %1600 = vmatprep.subr.bf16.mxu0 (!%p152_p3), %v1774_v22 }
   0xc   : > { %1641 = vmatpush3.bf16.msra.mxu1 (!%p152_p3), %v1773_v5 }
   0xd   : > { %1642 = vmatprep.subr.bf16.mxu1 (!%p152_p3), %v1776_v38 }
   0xe   : > { %s2344_s12 = smov (!%p179_p4, %s1818_s12), 1  ;;  %1601 = vmatpush3.bf16.msra.mxu0 %v1775_v27 }
   0xf   : > { %s1710_s22 = smul.u32 80, %s2344_s12  ;;  %1602 = vmatprep.subr.bf16.mxu0 %v1778_v2  ;;  %s1597_s28 = sshll.u32 %s2344_s12, 5 }
  0x10   : > { %1643 = vmatpush3.bf16.msra.mxu1 %v1777_v48  ;;  %s2308_s6 = scalar_lea.vmem %s2338_s3, %s1597_s28 }
  0x11   : > { %s1888_s29 = scalar_lea.vmem %s2335_s0, %s1710_s22 }
  0x12   : > { %v1894_v6 = vld [vmem:[%s1888_s29 + $0x20] sm:$0xf]  ;;  %v1470_v7 = vld [vmem:[%s1888_s29 + $0x8] sm:$0xf]  ;;  %v1472_v10 = vld [vmem:[%s1888_s29 + $0x10] sm:$0xf] }
  0x13   : > { %v1513_v8 = vcombine.low %v1894_v6, %v1894_v6  ;;  %v1510_v9 = vcombine.low %v1470_v7, %v1470_v7  ;;  %v1473_v11 = vld [vmem:[%s1888_s29 + $0x14] sm:$0x1]  ;;  %v1471_v12 = vld [vmem:[%s1888_s29 + $0xc] sm:$0x1]  ;;  %v1905_v14 = vld [vmem:[%s1888_s29 + $0x10] sm:$0xf]  ;;  %v1511_v16 = vcombine.low %v1472_v10, %v1472_v10 }
  0x14   : > { %v1902_v13 = vcombine.low %v1472_v10, %v1473_v11  ;;  %v1487_v15 = vld [vmem:[%s1888_s29 + $0x14] sm:$0x1]  ;;  %v1914_v18 = vld [vmem:[%s1888_s29 + $0x18] sm:$0xf]  ;;  %v1489_v21 = vld [vmem:[%s1888_s29 + $0x1c] sm:$0x1]  ;;  %v1935_v28 = vcombine.low %v1470_v7, %v1471_v12 }
  0x15   : > { %405 = vrot.lane.b32.xlu1 %v1513_v8, %s1828_s5  ;;  %399 = vrot.lane.b32.xlu0 %v1510_v9, %s1828_s5  ;;  %v1911_v17 = vcombine.low %v1905_v14, %v1487_v15  ;;  %v1917_v19 = vld [vmem:[%s1888_s29 + $0x18] sm:$0xf]  ;;  %v1930_v26 = vld [vmem:[%s1888_s29 + $0x8] sm:$0xf]  ;;  %v1512_v29 = vcombine.low %v1914_v18, %v1914_v18 }
  0x16   : > { %v496_v20 = vrot.slane %v1902_v13, 1  ;;  %v1927_v25 = vcombine.low %v1917_v19, %v1489_v21  ;;  %v202_v30 = vld [vmem:[%s1888_s29 + $0xc] sm:$0x1]  ;;  %v1941_v31 = vld [vmem:[%s1888_s29] sm:$0xf]  ;;  %v495_v55 = vrot.slane %v1935_v28, 1 }
  0x17   : > { %v560_v23 = vshrl.u32 %v1911_v17, 16  ;;  %v562_v24 = vshll.u32 %v1911_v17, 16  ;;  %v200_v32 = vld [vmem:[%s1888_s29 + $0x4] sm:$0x1]  ;;  %v1949_v36 = vcombine.low %v1930_v26, %v202_v30  ;;  %v1952_v37 = vld [vmem:[%s1888_s29 + $0x28] sm:$0xf] }
  0x18   : > { %v567_v34 = vshrl.u32 %v1927_v25, 16  ;;  %v569_v35 = vshll.u32 %v1927_v25, 16  ;;  %v1958_v39 = vcombine.low %v1941_v31, %v200_v32  ;;  %v1493_v40 = vld [vmem:[%s1888_s29 + $0x2c] sm:$0x1]  ;;  %v1962_v41 = vld [vmem:[%s1888_s29 + $0x20] sm:$0xf] }
  0x19   : > { %505 = vrot.lane.b32.xlu1 %v496_v20, %s1828_s5  ;;  %401 = vrot.lane.b32.xlu0 %v1511_v16, %s1828_s5  ;;  %v564_v33 = vrot.slane %v562_v24, 1  ;;  %v1491_v42 = vld [vmem:[%s1888_s29 + $0x24] sm:$0x1]  ;;  %v303_v45 = vshrl.u32 %v1949_v36, 16  ;;  %v305_v46 = vshll.u32 %v1949_v36, 16  ;;  %v1529_v51 = vcombine.low %v1952_v37, %v1493_v40  ;;  %v1779_v8 = vld [vmem:[%s2336_s1 + $0x10] sm:$0xff]  }
  0x1a   : > { %v571_v44 = vrot.slane %v569_v35, 1  ;;  %v1968_v47 = vld [vmem:[%s1888_s29 + $0x18] sm:$0xf]  ;;  %v296_v49 = vshrl.u32 %v1958_v39, 16  ;;  %v298_v50 = vshll.u32 %v1958_v39, 16  ;;  %v1528_v52 = vcombine.low %v1962_v41, %v1491_v42  ;;  %1603 = vmatpush3.bf16.msra.mxu0 %v1779_v8 }
  0x1b   : > { %v565_v43 = vor.u32 %v564_v33, %v560_v23  ;;  %v206_v53 = vld [vmem:[%s1888_s29 + $0x1c] sm:$0x1]  ;;  %v307_v56 = vrot.slane %v305_v46, 1  ;;  %v1985_v58 = vld [vmem:[%s1888_s29 + $0x10] sm:$0xf]  ;;  %v583_v60 = vshll.u32 %v1529_v51, 16 }
  0x1c   : > { %v572_v54 = vor.u32 %v571_v44, %v567_v34  ;;  %v1982_v57 = vcombine.low %v1968_v47, %v206_v53  ;;  %v300_v59 = vrot.slane %v298_v50, 1  ;;  %v634_v61 = vrot.slane %v1529_v51, 1  ;;  %v204_v62 = vld [vmem:[%s1888_s29 + $0x14] sm:$0x1]  ;;  %v1780_v15 = vld [vmem:[%s2336_s1 + $0xd8] sm:$0xff]  }
  0x1d   : > { %615 = vrot.lane.b32.xlu1 %v565_v43, %s1828_s5  ;;  %403 = vrot.lane.b32.xlu0 %v1512_v29, %s1828_s5  ;;  %v581_v63 = vshrl.u32 %v1529_v51, 16  ;;  %v576_v0 = vshll.u32 %v1528_v52, 16  ;;  %v633_v1 = vrot.slane %v1528_v52, 1  ;;  %v308_v3 = vor.u32 %v307_v56, %v303_v45  ;;  %v1477_v16 = vld [vmem:[%s1888_s29 + $0x24] sm:$0x1]  ;;  %v1781_v40 = vld [vmem:[%s2336_s1 + $0x98] sm:$0xff]  }
  0x1e   : > { %v301_v4 = vor.u32 %v300_v59, %v296_v49  ;;  %v585_v5 = vrot.slane %v583_v60, 1  ;;  %v574_v7 = vshrl.u32 %v1528_v52, 16  ;;  %v319_v11 = vshll.u32 %v1982_v57, 16  ;;  %v1475_v21 = vld [vmem:[%s1888_s29 + $0x1c] sm:$0x1]  ;;  %1644 = vmatprep.subr.bf16.mxu1 %v1780_v15 }
  0x1f   : > { %v578_v9 = vrot.slane %v576_v0, 1  ;;  %v1996_v10 = vcombine.low %v633_v1, %v634_v61  ;;  %v2000_v12 = vcombine.low %v1985_v58, %v204_v62  ;;  %v317_v23 = vshrl.u32 %v1982_v57, 16  ;;  %v2010_v24 = vld [vmem:[%s1888_s29 + $0x38] sm:$0xf]  ;;  %v1497_v33 = vld [vmem:[%s1888_s29 + $0x3c] sm:$0x1]  ;;  %1645 = vmatpush3.bf16.msra.mxu1 %v1781_v40 }
  0x20   : > { %v586_v22 = vor.u32 %v585_v5, %v581_v63  ;;  %v321_v29 = vrot.slane %v319_v11, 1  ;;  %v2017_v34 = vld [vmem:[%s1888_s29 + $0x30] sm:$0xf]  ;;  %v1495_v35 = vld [vmem:[%s1888_s29 + $0x34] sm:$0x1]  ;;  %v2027_v42 = vcombine.low %v1894_v6, %v1477_v16  ;;  %v2030_v43 = vcombine.low %v1914_v18, %v1475_v21 }
  0x21   : > { %617 = vrot.lane.b32.xlu1 %v572_v54, %s1828_s5  ;;  %503 = vrot.lane.b32.xlu0 %v495_v55, %s1828_s5  ;;  %v312_v20 = vshll.u32 %v2000_v12, 16  ;;  %v579_v27 = vor.u32 %v578_v9, %v574_v7  ;;  %v310_v30 = vshrl.u32 %v2000_v12, 16  ;;  %v2021_v38 = vld [vmem:[%s1888_s29 + $0x28] sm:$0xf]  ;;  %v2033_v44 = vcombine.low %v2010_v24, %v1497_v33  ;;  %v210_v45 = vld [vmem:[%s1888_s29 + $0x2c] sm:$0x1] }
  0x22   : > { %v2037_v46 = vld [vmem:[%s1888_s29 + $0x48] sm:$0xf]  ;;  %v1501_v48 = vld [vmem:[%s1888_s29 + $0x4c] sm:$0x1]  ;;  %v322_v49 = vor.u32 %v321_v29, %v317_v23  ;;  %v2043_v6 = vcombine.low %v2017_v34, %v1495_v35  ;;  %v2046_v51 = vld [vmem:[%s1888_s29 + $0x40] sm:$0xf]  ;;  %v2063_v61 = vcombine.low %v2021_v38, %v210_v45 }
  0x23   : > { %v314_v32 = vrot.slane %v312_v20, 1  ;;  %v1499_v18 = vld [vmem:[%s1888_s29 + $0x44] sm:$0x1]  ;;  %v2050_v52 = vld [vmem:[%s1888_s29 + $0x20] sm:$0xf]  ;;  %v1782_v54 = vld [vmem:[%s2336_s1 + $0x58] sm:$0xff]   ;;  %v2057_v55 = vcombine.low %v2037_v46, %v1501_v48 }
  0x24   : > { %v208_v53 = vld [vmem:[%s1888_s29 + $0x24] sm:$0x1]  ;;  %v498_v56 = vrot.slane %v2027_v42, 1  ;;  %v1480_v59 = vld [vmem:[%s1888_s29 + $0x30] sm:$0xf]  ;;  %v597_v60 = vshll.u32 %v2033_v44, 16  ;;  %v2066_v62 = vcombine.low %v2046_v51, %v1499_v18  ;;  %1604 = vmatprep.subr.bf16.mxu0 %v1782_v54 }
  0x25   : > { %353 = vrot.lane.b32.xlu1 %v308_v3, %s1828_s5  ;;  %351 = vrot.lane.b32.xlu0 %v301_v4, %s1828_s5  ;;  %v315_v50 = vor.u32 %v314_v32, %v310_v30  ;;  %v497_v63 = vrot.slane %v2030_v43, 1  ;;  %v590_v0 = vshll.u32 %v2043_v6, 16  ;;  %v2073_v1 = vcombine.low %v2050_v52, %v208_v53  ;;  %v1478_v3 = vld [vmem:[%s1888_s29 + $0x28] sm:$0xf]  ;;  %v1481_v23 = vld [vmem:[%s1888_s29 + $0x34] sm:$0x1] }
  0x26   : > { %v638_v2 = vrot.slane %v2057_v55, 1  ;;  %v637_v4 = vrot.slane %v2066_v62, 1  ;;  %v595_v5 = vshrl.u32 %v2033_v44, 16  ;;  %v588_v7 = vshrl.u32 %v2043_v6, 16  ;;  %v1783_v30 = vld [vmem:[%s2336_s1 + $0x18] sm:$0xff]   ;;  %v1785_v18 = vld [vmem:[%s2336_s1 + $0xa0] sm:$0xff]  }
  0x27   : > { %v331_v8 = vshrl.u32 %v2063_v61, 16  ;;  %v599_v9 = vrot.slane %v597_v60, 1  ;;  %v333_v11 = vshll.u32 %v2063_v61, 16  ;;  %v1515_v16 = vcombine.low %v1480_v59, %v1480_v59  ;;  %v2096_v45 = vld [vmem:[%s1888_s29 + $0x38] sm:$0xf]  ;;  %1605 = vmatpush3.bf16.msra.mxu0 %v1783_v30  ;;  %v1793_v30 = vld [vmem:[%s2336_s1 + $0xb0] sm:$0xff]  }
  0x28   : > { %v2082_v15 = vcombine.low %v637_v4, %v638_v2  ;;  %v1514_v20 = vcombine.low %v1478_v3, %v1478_v3  ;;  %v592_v21 = vrot.slane %v590_v0, 1  ;;  %v324_v29 = vshrl.u32 %v2073_v1, 16  ;;  %v214_v48 = vld [vmem:[%s1888_s29 + $0x3c] sm:$0x1]  ;;  %v2108_v53 = vld [vmem:[%s1888_s29 + $0x30] sm:$0xf] }
  0x29   : > { %621 = vrot.lane.b32.xlu1 %v586_v22, %s1828_s5  ;;  %619 = vrot.lane.b32.xlu0 %v579_v27, %s1828_s5  ;;  %v326_v22 = vshll.u32 %v2073_v1, 16  ;;  %v1479_v27 = vld [vmem:[%s1888_s29 + $0x2c] sm:$0x1]  ;;  %v600_v32 = vor.u32 %v599_v9, %v595_v5  ;;  %v335_v35 = vrot.slane %v333_v11, 1  ;;  %v212_v54 = vld [vmem:[%s1888_s29 + $0x34] sm:$0x1] }
  0x2a   : > { %v593_v33 = vor.u32 %v592_v21, %v588_v7  ;;  %v2114_v60 = vcombine.low %v1478_v3, %v1479_v27  ;;  %v1787_v0 = vld [vmem:[%s2336_s1 + $0x20] sm:$0xff]   ;;  %v1788_v2 = vld [vmem:[%s2336_s1 + $0xe8] sm:$0xff]   ;;  %v2126_v3 = vcombine.low %v2096_v45, %v214_v48  ;;  %v611_v9 = vshll.u32 %v2057_v55, 16 }
  0x2b   : > { %v328_v40 = vrot.slane %v326_v22, 1  ;;  %v1789_v5 = vld [vmem:[%s2336_s1 + $0xa8] sm:$0xff]   ;;  %v1484_v7 = vld [vmem:[%s1888_s29 + $0x40] sm:$0xf]  ;;  %v604_v21 = vshll.u32 %v2066_v62, 16  ;;  %v2143_v22 = vcombine.low %v2108_v53, %v212_v54  ;;  %v602_v27 = vshrl.u32 %v2066_v62, 16 }
  0x2c   : > { %v1790_v11 = vld [vmem:[%s2336_s1 + $0x68] sm:$0xff]   ;;  %v1794_v62 = vld [vmem:[%s2336_s1 + $0x70] sm:$0xff]   ;;  %v345_v54 = vshrl.u32 %v2126_v3, 16 }
  0x2d   : > { %357 = vrot.lane.b32.xlu1 %v322_v49, %s1828_s5  ;;  %355 = vrot.lane.b32.xlu0 %v315_v50, %s1828_s5  ;;  %v1784_v49 = vld [vmem:[%s2336_s1 + $0xe0] sm:$0xff]   ;;  %v2102_v50 = vcombine.low %v1480_v59, %v1481_v23  ;;  %v336_v59 = vor.u32 %v335_v35, %v331_v8  ;;  %v1482_v8 = vld [vmem:[%s1888_s29 + $0x38] sm:$0xf]  ;;  %v340_v48 = vshll.u32 %v2143_v22, 16 }
  0x2e   : > { %1646 = vmatprep.subr.bf16.mxu1 %v1784_v49  ;;  %v1791_v23 = vld [vmem:[%s2336_s1 + $0x28] sm:$0xff]   ;;  %v1516_v35 = vcombine.low %v1482_v8, %v1482_v8  ;;  %v1795_v49 = vld [vmem:[%s2336_s1 + $0x30] sm:$0xff]  }
  0x2f   : > { %1647 = vmatpush3.bf16.msra.mxu1 %v1785_v18  ;;  %v500_v4 = vrot.slane %v2102_v50, 1  ;;  %v1485_v18 = vld [vmem:[%s1888_s29 + $0x44] sm:$0x1] }
  0x30   : > { %1648 = vmatprep.subr.bf16.mxu1 %v1788_v2 }
  0x31   : > { %509 = vrot.lane.b32.xlu1 %v498_v56, %s1828_s5  ;;  %507 = vrot.lane.b32.xlu0 %v497_v63, %s1828_s5  ;;  %v1786_v56 = vld [vmem:[%s2336_s1 + $0x60] sm:$0xff]   ;;  %v329_v63 = vor.u32 %v328_v40, %v324_v29  ;;  %v1792_v29 = vld [vmem:[%s2336_s1 + $0xf0] sm:$0xff]   ;;  %v606_v40 = vrot.slane %v604_v21, 1  ;;  %v631_v21 = vrot.slane %v1911_v17, 1 }
  0x32   : > { %1606 = vmatprep.subr.bf16.mxu0 %v1786_v56  ;;  %v1796_v56 = vld [vmem:[%s2336_s1 + $0xf8] sm:$0xff]  }
  0x33   : > { %1607 = vmatpush3.bf16.msra.mxu0 %v1787_v0  ;;  %1649 = vmatpush3.bf16.msra.mxu1 %v1789_v5  ;;  %v1797_v0 = vld [vmem:[%s2336_s1 + $0xb8] sm:$0xff]  }
  0x34   : > { %1608 = vmatprep.subr.bf16.mxu0 %v1790_v11  ;;  %1650 = vmatprep.subr.bf16.mxu1 %v1792_v29  ;;  %v1798_v11 = vld [vmem:[%s2336_s1 + $0x78] sm:$0xff]  }
  0x35   : > { %409 = vrot.lane.b32.xlu1 %v1515_v16, %s1828_s5  ;;  %407 = vrot.lane.b32.xlu0 %v1514_v20, %s1828_s5  ;;  %v499_v16 = vrot.slane %v2114_v60, 1  ;;  %v609_v20 = vshrl.u32 %v2057_v55, 16  ;;  %v347_v55 = vshll.u32 %v2126_v3, 16 }
  0x37   : > { %1609 = vmatpush3.bf16.msra.mxu0 %v1791_v23  ;;  %1651 = vmatpush3.bf16.msra.mxu1 %v1793_v30  ;;  %v349_v5 = vrot.slane %v347_v55, 1  ;;  %v2189_v23 = vcombine.low %v1484_v7, %v1485_v18  ;;  %v370_v18 = vrot.slane %v1982_v57, 1 }
  0x38   : > { %1610 = vmatprep.subr.bf16.mxu0 %v1794_v62  ;;  %1652 = vmatprep.subr.bf16.mxu1 %v1796_v56  ;;  %v447_v56 = vshrl.u32 %v1902_v13, 16 }
  0x39   : > { %625 = vrot.lane.b32.xlu1 %v600_v32, %s1828_s5  ;;  %623 = vrot.lane.b32.xlu0 %v593_v33, %s1828_s5  ;;  %v613_v32 = vrot.slane %v611_v9, 1  ;;  %v1517_v33 = vcombine.low %v1484_v7, %v1484_v7  ;;  %v342_v9 = vrot.slane %v340_v48, 1  ;;  %v350_v55 = vor.u32 %v349_v5, %v345_v54 }
  0x3a   : > { %v635_v7 = vrot.slane %v2043_v6, 1  ;;  %v442_v6 = vshll.u32 %v1935_v28, 16  ;;  %v368_v48 = vrot.slane %v1949_v36, 1 }
  0x3b   : > { %1611 = vmatpush3.bf16.msra.mxu0 %v1795_v49  ;;  %v614_v2 = vor.u32 %v613_v32, %v609_v20  ;;  %1653 = vmatpush3.bf16.msra.mxu1 %v1797_v0  ;;  %v2187_v20 = vld [vmem:[%s2336_s1 + $0x100] sm:$0xff]   ;;  %v636_v32 = vrot.slane %v2033_v44, 1  ;;  %v449_v44 = vshll.u32 %v1902_v13, 16  ;;  %v440_v49 = vshrl.u32 %v1935_v28, 16 }
  0x3c   : > { %1612 = vmatprep.subr.bf16.mxu0 %v1798_v11  ;;  %1702 = vmatprep.subr.bf16.mxu1 %v2187_v20  ;;  %v444_v5 = vrot.slane %v442_v6, 1 }
  0x3d   : > { %361 = vrot.lane.b32.xlu1 %v336_v59, %s1828_s5  ;;  %359 = vrot.lane.b32.xlu0 %v329_v63, %s1828_s5  ;;  %v1483_v59 = vld [vmem:[%s1888_s29 + $0x3c] sm:$0x1]  ;;  %v338_v63 = vshrl.u32 %v2143_v22, 16  ;;  %v2206_v62 = vcombine.low %v635_v7, %v636_v32  ;;  %v451_v0 = vrot.slane %v449_v44, 1 }
  0x3e   : > { %v2192_v29 = vcombine.low %v1482_v8, %v1483_v59 }
  0x3f   : > { %v343_v17 = vor.u32 %v342_v9, %v338_v63  ;;  %v369_v63 = vrot.slane %v2000_v12, 1  ;;  %v452_v11 = vor.u32 %v451_v0, %v447_v56  ;;  %v454_v56 = vshrl.u32 %v2030_v43, 16 }
  0x40   : > { %v501_v8 = vrot.slane %v2192_v29, 1 }
  0x41   : > { %513 = vrot.lane.b32.xlu1 %v500_v4, %s1828_s5  ;;  %511 = vrot.lane.b32.xlu0 %v499_v16, %s1828_s5  ;;  %v607_v4 = vor.u32 %v606_v40, %v602_v27  ;;  %v1799_v16 = vld [vmem:[%s2336_s1 + $0x38] sm:$0xff]   ;;  %v632_v27 = vrot.slane %v1927_v25, 1  ;;  %v502_v25 = vrot.slane %v2189_v23, 1  ;;  %v367_v40 = vrot.slane %v1958_v39, 1 }
  0x42   : > { %1613 = vmatpush3.bf16.msra.mxu0 %v1799_v16  ;;  %v445_v16 = vor.u32 %v444_v5, %v440_v49 }
  0x43   : > { %1686 = vmatprep.subr.bf16.mxu0 %v2187_v20  ;;  %v2198_v30 = vcombine.low %v631_v21, %v632_v27 }
  0x45   : > { %413 = vrot.lane.b32.xlu1 %v1517_v33, %s1828_s5  ;;  %411 = vrot.lane.b32.xlu0 %v1516_v35, %s1828_s5 }
  0x49   : > { %629 = vrot.lane.b32.xlu1 %v614_v2, %s1828_s5  ;;  %627 = vrot.lane.b32.xlu0 %v607_v4, %s1828_s5 }
  0x4d   : > { %365 = vrot.lane.b32.xlu1 %v350_v55, %s1828_s5  ;;  %363 = vrot.lane.b32.xlu0 %v343_v17, %s1828_s5 }
  0x51   : > { %517 = vrot.lane.b32.xlu1 %v502_v25, %s1828_s5  ;;  %515 = vrot.lane.b32.xlu0 %v501_v8, %s1828_s5  ;;  %v463_v8 = vshll.u32 %v2027_v42, 16 }
  0x87   : > { %v406_v33 = vpop.permute.xlu1 %405  ;;  %v400_v35 = vpop.permute.xlu0 %399 }
  0x88   : > { %v666_v2 = vsel %vm639_vm0, %v367_v40, %v400_v35  ;;  %v675_v28 = vsel %vm639_vm0, %v370_v18, %v406_v33  ;;  %v456_v40 = vshll.u32 %v2030_v43, 16 }
  0x8b   : > { %v506_v54 = vpop.permute.xlu1 %505  ;;  %v402_v59 = vpop.permute.xlu0 %401 }
  0x8c   : > { %v669_v4 = vsel %vm639_vm0, %v368_v48, %v402_v59  ;;  %v693_v12 = vsel %vm639_vm0, %v452_v11, %v506_v54  ;;  %v461_v48 = vshrl.u32 %v2027_v42, 16  ;;  %v458_v59 = vrot.slane %v456_v40, 1  ;;  %v1802_v42 = vld [vmem:[%s2336_s1 + $0x110] sm:$0xff]  }
  0x8d   : > { %v1536_v39 = vcombine.low %v666_v2, %v669_v4 }
  0x8e   : > { %v459_v4 = vor.u32 %v458_v59, %v454_v56  ;;  %v491_v59 = vshll.u32 %v2189_v23, 16 }
  0x8f   : > { %v616_v9 = vpop.permute.xlu1 %615  ;;  %v404_v36 = vpop.permute.xlu0 %403  ;;  %1183 = vmatprep.mubr.bf16.mxu0 %v1536_v39 }
  0x90   : > { %v672_v57 = vsel %vm639_vm0, %v369_v63, %v404_v36  ;;  %v714_v17 = vsel %vm639_vm0, %v1905_v14, %v616_v9  ;;  %v1801_v14 = vld [vmem:[%s2336_s1 + $0x108] sm:$0xff]  }
  0x91   : > { %v1541_v13 = vcombine.low %v672_v57, %v675_v28  ;;  %v371_v28 = vrot.slane %v2073_v1, 1 }
  0x93   : > { %v618_v21 = vpop.permute.xlu1 %617  ;;  %v504_v27 = vpop.permute.xlu0 %503 }
  0x94   : > { %v690_v55 = vsel %vm639_vm0, %v445_v16, %v504_v27  ;;  %v717_v7 = vsel %vm639_vm0, %v1917_v19, %v618_v21  ;;  %v477_v27 = vshll.u32 %v2102_v50, 16 }
  0x95   : > { %v1537_v32 = vcombine.low %v690_v55, %v693_v12  ;;  %v1538_v25 = vcombine.low %v714_v17, %v717_v7  ;;  %v470_v12 = vshll.u32 %v2114_v60, 16  ;;  %v475_v17 = vshrl.u32 %v2102_v50, 16 }
  0x96   : > { %v468_v7 = vshrl.u32 %v2114_v60, 16 }
  0x97   : > { %1248 = vmatprep.mubr.bf16.mxu1 %v1538_v25  ;;  %v354_v33 = vpop.permute.xlu1 %353  ;;  %v352_v35 = vpop.permute.xlu0 %351 }
  0x98   : > { %v645_v6 = vsel %vm639_vm0, %v1930_v26, %v354_v33  ;;  %v642_v44 = vsel %vm639_vm0, %v1941_v31, %v352_v35  ;;  %1249 = vmatmul.mubr.bf16.vlgmr.msra.gmra.mrb[0].mxu1 %v1537_v32  ;;  %v465_v26 = vrot.slane %v463_v8, 1  ;;  %v479_v8 = vrot.slane %v477_v27, 1 }
  0x99   : > { %v1535_v19 = vcombine.low %v642_v44, %v645_v6  ;;  %1706 = vmatpush3.bf16.msra.mxu1 %v2187_v20  ;;  %v472_v33 = vrot.slane %v470_v12, 1 }
  0x9a   : > { %1703 = vmatprep.subr.bf16.mxu1 %v1801_v14  ;;  %v466_v2 = vor.u32 %v465_v26, %v461_v48  ;;  %v373_v26 = vrot.slane %v2143_v22, 1  ;;  %v482_v22 = vshrl.u32 %v2192_v29, 16 }
  0x9b   : > { %v622_v49 = vpop.permute.xlu1 %621  ;;  %1184 = vmatmul.mubr.bf16.vlgmr.msra.gmra.mrb[0].mxu0 %v1535_v19  ;;  %v620_v18 = vpop.permute.xlu0 %619  ;;  %v473_v60 = vor.u32 %v472_v33, %v468_v7 }
  0x9c   : > { %v723_v31 = vsel %vm639_vm0, %v1952_v37, %v622_v49  ;;  %v720_v54 = vsel %vm639_vm0, %v1962_v41, %v620_v18  ;;  %1191 = vmatprep.mubr.bf16.mxu0 %v1541_v13  ;;  %1687 = vmatpush3.bf16.msra.mxu0 %v2187_v20  ;;  %v1803_v20 = vld [vmem:[%s2336_s1 + $0x118] sm:$0xff]   ;;  %v374_v18 = vrot.slane %v2126_v3, 1  ;;  %v489_v3 = vshrl.u32 %v2189_v23, 16 }
  0x9d   : > { %v1543_v63 = vcombine.low %v720_v54, %v723_v31  ;;  %1688 = vmatprep.subr.bf16.mxu0 %v1801_v14  ;;  %1707 = vmatpush3.bf16.msra.mxu1 %v1801_v14 }
  0x9e   : > { %1704 = vmatprep.subr.bf16.mxu1 %v1802_v42 }
  0x9f   : > { %v358_v0 = vpop.permute.xlu1 %357  ;;  %1256 = vmatprep.mubr.bf16.mxu1 %v1543_v63  ;;  %v356_v37 = vpop.permute.xlu0 %355 }
  0xa0   : > { %v651_v41 = vsel %vm639_vm0, %v1968_v47, %v358_v0  ;;  %v648_v43 = vsel %vm639_vm0, %v1985_v58, %v356_v37  ;;  %1689 = vmatpush3.bf16.msra.mxu0 %v1801_v14  ;;  %v372_v58 = vrot.slane %v2063_v61, 1  ;;  %v480_v14 = vor.u32 %v479_v8, %v475_v17 }
  0xa1   : > { %v1540_v5 = vcombine.low %v648_v43, %v651_v41  ;;  %1690 = vmatprep.subr.bf16.mxu0 %v1802_v42  ;;  %1708 = vmatpush3.bf16.msra.mxu1 %v1802_v42 }
  0xa2   : > { %1705 = vmatprep.subr.bf16.mxu1 %v1803_v20 }
  0xa3   : > { %v510_v39 = vpop.permute.xlu1 %509  ;;  %1192 = vmatmul.mubr.bf16.gmra.mrb[4].mxu0 %v1540_v5  ;;  %v508_v9 = vpop.permute.xlu0 %507 }
  0xa4   : > { %v699_v36 = vsel %vm639_vm0, %v466_v2, %v510_v39  ;;  %v696_v47 = vsel %vm639_vm0, %v459_v4, %v508_v9  ;;  %1691 = vmatpush3.bf16.msra.mxu0 %v1802_v42  ;;  %v484_v42 = vshll.u32 %v2192_v29, 16  ;;  %v493_v2 = vrot.slane %v491_v59, 1 }
  0xa5   : > { %v1542_v11 = vcombine.low %v696_v47, %v699_v36  ;;  %1692 = vmatprep.subr.bf16.mxu0 %v1803_v20  ;;  %1709 = vmatpush3.bf16.msra.mxu1 %v1803_v20 }
  0xa6   : > { %v486_v4 = vrot.slane %v484_v42, 1  ;;  %v494_v36 = vor.u32 %v493_v2, %v489_v3 }
  0xa7   : > { %v410_v57 = vpop.permute.xlu1 %409  ;;  %1257 = vmatmul.mubr.bf16.gmra.mrb[4].mxu1 %v1542_v11  ;;  %v408_v16 = vpop.permute.xlu0 %407 }
  0xa8   : > { %v681_v13 = vsel %vm639_vm0, %v372_v58, %v410_v57  ;;  %v678_v21 = vsel %vm639_vm0, %v371_v28, %v408_v16  ;;  %1693 = vmatpush3.bf16.msra.mxu0 %v1803_v20  ;;  %v487_v29 = vor.u32 %v486_v4, %v482_v22 }
  0xa9   : > { %v1546_v55 = vcombine.low %v678_v21, %v681_v13 }
  0xab   : > { %v626_v61 = vpop.permute.xlu1 %625  ;;  %1199 = vmatprep.mubr.bf16.mxu0 %v1546_v55  ;;  %v624_v1 = vpop.permute.xlu0 %623 }
  0xac   : > { %v729_v32 = vsel %vm639_vm0, %v2010_v24, %v626_v61  ;;  %v726_v25 = vsel %vm639_vm0, %v2017_v34, %v624_v1 }
  0xad   : > { %v1548_v35 = vcombine.low %v726_v25, %v729_v32 }
  0xaf   : > { %v362_v6 = vpop.permute.xlu1 %361  ;;  %1264 = vmatprep.mubr.bf16.mxu1 %v1548_v35  ;;  %v360_v44 = vpop.permute.xlu0 %359 }
  0xb0   : > { %v657_v40 = vsel %vm639_vm0, %v2021_v38, %v362_v6  ;;  %v654_v50 = vsel %vm639_vm0, %v2050_v52, %v360_v44 }
  0xb1   : > { %v1545_v19 = vcombine.low %v654_v50, %v657_v40 }
  0xb3   : > { %v514_v48 = vpop.permute.xlu1 %513  ;;  %1200 = vmatmul.mubr.bf16.gmra.mrb[8].mxu0 %v1545_v19  ;;  %v512_v24 = vpop.permute.xlu0 %511 }
  0xb4   : > { %v705_v34 = vsel %vm639_vm0, %v480_v14, %v514_v48  ;;  %v702_v49 = vsel %vm639_vm0, %v473_v60, %v512_v24 }
  0xb5   : > { %v1547_v31 = vcombine.low %v702_v49, %v705_v34 }
  0xb7   : > { %v414_v54 = vpop.permute.xlu1 %413  ;;  %1265 = vmatmul.mubr.bf16.gmra.mrb[8].mxu1 %v1547_v31  ;;  %v412_v38 = vpop.permute.xlu0 %411 }
  0xb8   : > { %v687_v52 = vsel %vm639_vm0, %v374_v18, %v414_v54  ;;  %v684_v56 = vsel %vm639_vm0, %v373_v26, %v412_v38 }
  0xb9   : > { %v1551_v63 = vcombine.low %v684_v56, %v687_v52 }
  0xbb   : > { %v630_v0 = vpop.permute.xlu1 %629  ;;  %1207 = vmatprep.mubr.bf16.mxu0 %v1551_v63  ;;  %v628_v37 = vpop.permute.xlu0 %627 }
  0xbc   : > { %v735_v41 = vsel %vm639_vm0, %v2037_v46, %v630_v0  ;;  %v732_v43 = vsel %vm639_vm0, %v2046_v51, %v628_v37 }
  0xbd   : > { %v1553_v20 = vcombine.low %v732_v43, %v735_v41 }
  0xbf   : > { %v366_v5 = vpop.permute.xlu1 %365  ;;  %1272 = vmatprep.mubr.bf16.mxu1 %v1553_v20  ;;  %v364_v39 = vpop.permute.xlu0 %363 }
  0xc0   : > { %v663_v9 = vsel %vm639_vm0, %v2096_v45, %v366_v5  ;;  %v660_v23 = vsel %vm639_vm0, %v2108_v53, %v364_v39 }
  0xc1   : > { %v1550_v47 = vcombine.low %v660_v23, %v663_v9 }
  0xc3   : > { %v518_v58 = vpop.permute.xlu1 %517  ;;  %1208 = vmatmul.mubr.bf16.gmra.mrb[12].mxu0 %v1550_v47  ;;  %v516_v46 = vpop.permute.xlu0 %515 }
  0xc4   : > { %v711_v51 = vsel %vm639_vm0, %v494_v36, %v518_v58  ;;  %v708_v28 = vsel %vm639_vm0, %v487_v29, %v516_v46  ;;  %1694 = vmatprep.mubr.msk.bf16.mxu0 %vm639_vm0, %v2198_v30  ;;  %v1534_v30 = vld [vmem:[%s2337_s2] ss:$0 sm:$0xff] }
  0xc5   : > { %v1552_v11 = vcombine.low %v708_v28, %v711_v51 }
  0xc7   : > { %1273 = vmatmul.mubr.bf16.gmra.mrb[12].mxu1 %v1552_v11 }
  0xc8   : > { %1698 = vmatprep.mubr.msk.bf16.mxu1 %vm639_vm0, %v2206_v62 }
  0xcb   : > { %1695 = vmatmul.mubr.msk.bf16.vlgmr.msra.gmra.mrb[16].mxu0 %vm639_vm0, %v1996_v10 }
  0xcf   : > { %1699 = vmatmul.mubr.msk.bf16.vlgmr.msra.gmra.mrb[16].mxu1 %vm639_vm0, %v2082_v15 }
 0x16b   : > { %v1654_v45 = vpop.f32.mrb[0].mxu1 }
 0x16c   : > { %v1655_v53 = vpop.f32.mrb[1].mxu1 }
 0x16d   : > { %v1656_v57 = vadd.f32 %v1655_v53, %v1654_v45  ;;  %v1657_v16 = vpop.f32.mrb[2].mxu1 }
 0x16e   : > { %v1614_v13 = vpop.f32.mrb[0].mxu0  ;;  %v1658_v21 = vpop.f32.mrb[3].mxu1 }
 0x16f   : > { %v1659_v27 = vadd.f32 %v1658_v21, %v1657_v16  ;;  %v1615_v12 = vpop.f32.mrb[1].mxu0 }
 0x170   : > { %v1616_v55 = vadd.f32 %v1615_v12, %v1614_v13  ;;  %v1617_v62 = vpop.f32.mrb[2].mxu0 }
 0x171   : > { %v1618_v61 = vpop.f32.mrb[3].mxu0 }
 0x172   : > { %v1186_v1 = vadd.f32 %v1616_v55, %v1534_v30  ;;  %v1619_v10 = vadd.f32 %v1618_v61, %v1617_v62 }
 0x174   : > { %v1189_v17 = vadd.f32 %v1619_v10, %v1534_v30  ;;  %v1251_v7 = vadd.f32 %v1656_v57, %v1186_v1 }
 0x176   : > { %v1620_v15 = vpop.f32.mrb[4].mxu0  ;;  %v1254_v32 = vadd.f32 %v1659_v27, %v1189_v17 }
 0x177   : > { %v1621_v25 = vpop.f32.mrb[5].mxu0 }
 0x178   : > { %v1622_v8 = vadd.f32 %v1621_v25, %v1620_v15  ;;  %v1623_v33 = vpop.f32.mrb[6].mxu0 }
 0x179   : > { %v1624_v35 = vpop.f32.mrb[7].mxu0 }
 0x17a   : > { %v1625_v6 = vadd.f32 %v1624_v35, %v1623_v33  ;;  %v1660_v44 = vpop.f32.mrb[4].mxu1  ;;  %v1194_v50 = vadd.f32 %v1622_v8, %v1534_v30 }
 0x17b   : > { %v1661_v40 = vpop.f32.mrb[5].mxu1 }
 0x17c   : > { %v1662_v14 = vadd.f32 %v1661_v40, %v1660_v44  ;;  %v1663_v60 = vpop.f32.mrb[6].mxu1  ;;  %v1197_v48 = vadd.f32 %v1625_v6, %v1534_v30 }
 0x17d   : > { %v1664_v19 = vpop.f32.mrb[7].mxu1 }
 0x17e   : > { %v1665_v24 = vadd.f32 %v1664_v19, %v1663_v60  ;;  %v1259_v34 = vadd.f32 %v1662_v14, %v1194_v50 }
 0x180   : > { %v1262_v49 = vadd.f32 %v1665_v24, %v1197_v48 }
 0x186   : > { %v1626_v18 = vpop.f32.mrb[8].mxu0 }
 0x187   : > { %v1627_v26 = vpop.f32.mrb[9].mxu0 }
 0x188   : > { %v1628_v31 = vadd.f32 %v1627_v26, %v1626_v18  ;;  %v1629_v54 = vpop.f32.mrb[10].mxu0 }
 0x189   : > { %v1630_v38 = vpop.f32.mrb[11].mxu0 }
 0x18a   : > { %v1631_v52 = vadd.f32 %v1630_v38, %v1629_v54  ;;  %v1666_v56 = vpop.f32.mrb[8].mxu1  ;;  %v1202_v42 = vadd.f32 %v1628_v31, %v1534_v30 }
 0x18b   : > { %v1667_v59 = vpop.f32.mrb[9].mxu1 }
 0x18c   : > { %v1668_v63 = vadd.f32 %v1667_v59, %v1666_v56  ;;  %v1669_v0 = vpop.f32.mrb[10].mxu1  ;;  %v1205_v3 = vadd.f32 %v1631_v52, %v1534_v30 }
 0x18d   : > { %v1670_v37 = vpop.f32.mrb[11].mxu1 }
 0x18e   : > { %v1671_v22 = vadd.f32 %v1670_v37, %v1669_v0  ;;  %v1267_v41 = vadd.f32 %v1668_v63, %v1202_v42 }
 0x190   : > { %v1270_v43 = vadd.f32 %v1671_v22, %v1205_v3 }
 0x196   : > { %v1632_v2 = vpop.f32.mrb[12].mxu0 }
 0x197   : > { %v1633_v4 = vpop.f32.mrb[13].mxu0 }
 0x198   : > { %v1634_v20 = vadd.f32 %v1633_v4, %v1632_v2  ;;  %v1635_v5 = vpop.f32.mrb[14].mxu0 }
 0x199   : > { %v1636_v39 = vpop.f32.mrb[15].mxu0 }
 0x19a   : > { %v1637_v9 = vadd.f32 %v1636_v39, %v1635_v5  ;;  %v1672_v23 = vpop.f32.mrb[12].mxu1  ;;  %v1210_v29 = vadd.f32 %v1634_v20, %v1534_v30 }
 0x19b   : > { %v1673_v36 = vpop.f32.mrb[13].mxu1 }
 0x19c   : > { %v1674_v47 = vadd.f32 %v1673_v36, %v1672_v23  ;;  %v1675_v58 = vpop.f32.mrb[14].mxu1  ;;  %v1213_v51 = vadd.f32 %v1637_v9, %v1534_v30 }
 0x19d   : > { %v1676_v46 = vpop.f32.mrb[15].mxu1 }
 0x19e   : > { %v1677_v28 = vadd.f32 %v1676_v46, %v1675_v58  ;;  %v1696_v11 = vpop.f32.mrb[16].mxu0  ;;  %v1275_v45 = vadd.f32 %v1674_v47, %v1210_v29 }
 0x19f   : > { %v1324_v53 = vadd.f32 %v1696_v11, %v1259_v34  ;;  %v1315_v57 = vpop.f32.mrb[17].mxu0 }
 0x1a0   : > { %v1316_v16 = vadd.f32 %v1315_v57, %v1251_v7  ;;  %v1697_v13 = vpop.f32.mrb[18].mxu0  ;;  %v1278_v21 = vadd.f32 %v1677_v28, %v1213_v51 }
 0x1a1   : > { %v1348_v27 = vmax.f32 %v1324_v53, 0.0  ;;  %v1327_v12 = vadd.f32 %v1697_v13, %v1262_v49  ;;  %v1318_v55 = vpop.f32.mrb[19].mxu0 }
 0x1a2   : > { %v1346_v30 = vmax.f32 %v1316_v16, 0.0  ;;  %v1319_v62 = vadd.f32 %v1318_v55, %v1254_v32  ;;  %v1700_v61 = vpop.f32.mrb[16].mxu1 }
 0x1a3   : > { %v1356_v1 = vpack.c.bf16 %v1348_v27, %v1348_v27  ;;  %v1349_v10 = vmax.f32 %v1327_v12, 0.0  ;;  %v1340_v17 = vadd.f32 %v1700_v61, %v1275_v45  ;;  %v1331_v7 = vpop.f32.mrb[17].mxu1 }
 0x1a4   : > { %v1354_v15 = vpack.c.bf16 %v1346_v30, %v1346_v30  ;;  %v1347_v25 = vmax.f32 %v1319_v62, 0.0  ;;  %v1332_v8 = vadd.f32 %v1331_v7, %v1267_v41  ;;  %v1701_v33 = vpop.f32.mrb[18].mxu1 }
 0x1a5   : > { %1365 = vst.msk [vmem:[%s2308_s6 + $0x8] sm:$0xf] %vm1362_vm1, %v1356_v1  ;;  %v1357_v35 = vpack.c.bf16 %v1349_v10, %v1349_v10  ;;  %v1352_v6 = vmax.f32 %v1340_v17, 0.0  ;;  %v1343_v44 = vadd.f32 %v1701_v33, %v1278_v21  ;;  %v1334_v32 = vpop.f32.mrb[19].mxu1 }
 0x1a6   : > { %1363 = vst.msk [vmem:[%s2308_s6] sm:$0xf] %vm1362_vm1, %v1354_v15  ;;  %v1355_v40 = vpack.c.bf16 %v1347_v25, %v1347_v25  ;;  %v1350_v50 = vmax.f32 %v1332_v8, 0.0  ;;  %v1335_v14 = vadd.f32 %v1334_v32, %v1270_v43 }
 0x1a7   : > { %1366 = vst.msk [vmem:[%s2308_s6 + $0xc] sm:$0xf] %vm1362_vm1, %v1357_v35  ;;  %v1360_v60 = vpack.c.bf16 %v1352_v6, %v1352_v6  ;;  %v1353_v19 = vmax.f32 %v1343_v44, 0.0 }
 0x1a8   : > { %1364 = vst.msk [vmem:[%s2308_s6 + $0x4] sm:$0xf] %vm1362_vm1, %v1355_v40  ;;  %v1358_v48 = vpack.c.bf16 %v1350_v50, %v1350_v50  ;;  %v1351_v24 = vmax.f32 %v1335_v14, 0.0 }
 0x1a9   : > { %1369 = vst.msk [vmem:[%s2308_s6 + $0x18] sm:$0xf] %vm1362_vm1, %v1360_v60  ;;  %v1361_v34 = vpack.c.bf16 %v1353_v19, %v1353_v19 }
 0x1aa   : > { %1367 = vst.msk [vmem:[%s2308_s6 + $0x10] sm:$0xf] %vm1362_vm1, %v1358_v48  ;;  %v1359_v49 = vpack.c.bf16 %v1351_v24, %v1351_v24 }
 0x1ab   : > { %1370 = vst.msk [vmem:[%s2308_s6 + $0x1c] sm:$0xf] %vm1362_vm1, %v1361_v34 }
 0x1ac   : > { %1368 = vst.msk [vmem:[%s2308_s6 + $0x14] sm:$0xf] %vm1362_vm1, %v1359_v49 }
 0x1ad PF: > { %s13_s14 = sadd.s32 1, %s1826_s14   ;;  %s2339_s12 = smov %s1822_s13 }
 0x1ae   : > { %p10_p5 = scmp.ge.s32.totalorder %s13_s14, 4   ;;  %s2340_s13 = smov %s2342_s15 }
 0x1b0   :  { %12 = sbr.rel (!%p10_p5) target bundleno = 2 (0x2), region = 65 }

// kernel: _lambda_.5
= control target key start
LH: loop header
LB: loop body
LE: loop exit
PB: predicated region body
PF: predicated region fallthrough
CT: control target
= control target key end

     0   :  { %s3623_s24 = smov 0   ;;  %s3625_s25 = smov 0   ;;  %s4631_s0 = inlined_call_operand.vmem [shape: bf16[2,18,18,32], index: 0, kind: input, shape index: {}]   ;;  %s4632_s1 = inlined_call_operand.vmem [shape: bf16[2,18,18,16], index: 1, kind: input, shape index: {}]   ;;  %s4633_s2 = inlined_call_operand.vmem [shape: bf16[288,16], index: 2, kind: input, shape index: {}]   ;;  %s4634_s3 = inlined_call_operand.vmem [shape: bf16[144,16], index: 3, kind: input, shape index: {}]   ;;  %s4635_s4 = inlined_call_operand.vmem [shape: f32[1,16], index: 4, kind: input, shape index: {}]   ;;  %s4636_s5 = inlined_call_operand.vmem [shape: bf16[16,4], index: 5, kind: input, shape index: {}]   ;;  %s4637_s6 = inlined_call_operand.vmem [shape: f32[1,4], index: 6, kind: input, shape index: {}]   ;;  %s4638_s7 = inlined_call_operand.vmem [shape: f32[2,16,16,4], index: 7, kind: output, shape index: {}]  }
   0x1   :  { %s3627_s26 = smov 0   ;;  %s3629_s27 = smov 0  }
   0x2   :  { %s3631_s28 = smov 0  }
   0x3 LB: > { %s26_s29 = sadd.s32 1, %s3565_s26  ;;  %s29_s30 = sadd.s32 1, %s3569_s27  ;;  %s3573_s28 = sphi %s3631_s28, %s17_s28   ;;  %s3569_s27 = sphi %s3629_s27, %s4642_s27   ;;  %s3565_s26 = sphi %s3627_s26, %s4641_s26   ;;  %s3561_s25 = sphi %s3625_s25, %s4640_s25   ;;  %s3557_s24 = sphi %s3623_s24, %s4639_s24  }
   0x4   : > { %p27_p0 = scmp.ge.s32.totalorder %s26_s29, 2  ;;  %p2929_p1 = scmp.ge.s32.totalorder %s3573_s28, 1 }
   0x5   : > { %p261_p2 = scmp.lt.s32.totalorder %s3573_s28, 5 }
   0x6   : > { %s4644_s29 = smov (%p27_p0, %s26_s29), 0  ;;  %s4646_s30 = smov (!%p27_p0, %s29_s30), %s3569_s27 }
   0x7   : > { %p262_p3 = pnand %p2929_p1, %p261_p2  ;;  %p31_p4 = scmp.ge.s32.totalorder %s4646_s30, 2 }
   0x8   : > { %p303_p5 = scmp.lt.s32.totalorder (!%p262_p3), %s3561_s25, 1  ;;  %v3418_v0 = vld [vmem:[%s4633_s2 + $0x40] sm:$0xff] (!%p262_p3)   ;;  %s3196_s12 = smul.u32 (!%p262_p3), 96, %s3557_s24  ;;  %v3423_v2 = vld [vmem:[%s4633_s2 + $0x48] sm:$0xff] (!%p262_p3)   ;;  %vm586_vm0 = vcmask (!%p262_p3), 1046528   ;;  %v3428_v4 = vld [vmem:[%s4633_s2 + $0x50] sm:$0xff] (!%p262_p3)  }
   0x9   : > { %s4648_s30 = smov (%p31_p4, %s4646_s30), 0  ;;  %265 = sbr.rel (%p262_p3) target bundleno = 786 (0x312), region = 48 }
   0xa   : > { %3198 = vmatprep.subr.bf16.mxu1 (!%p262_p3), %v3418_v0  ;;  %v3419_v1 = vld [vmem:[%s4633_s2] sm:$0xff] (!%p262_p3)   ;;  %v3424_v3 = vld [vmem:[%s4633_s2 + $0x8] sm:$0xff] (!%p262_p3)   ;;  %v3429_v5 = vld [vmem:[%s4633_s2 + $0x10] sm:$0xff] (!%p262_p3)   ;;  %s3575_s10 = smov (!%p262_p3), 64   ;;  %vm473_vm1 = vsmask.f32 (!%p262_p3), 7424 }
   0xb   : > { %3199 = vmatpush3.bf16.msra.mxu1 (!%p262_p3), %v3419_v1  ;;  %s3576_s11 = smov (!%p262_p3), 96   ;;  %s3577_s14 = smov (!%p262_p3), 32   ;;  %vm1059_vm2 = vcmask (!%p262_p3), 261120   ;;  %vm1076_vm3 = vcmask (!%p262_p3), 523264   ;;  %vm1093_vm4 = vcmask (!%p262_p3), 785408   ;;  %vm1924_vm5 = vcmask (!%p262_p3), 130048  }
   0xc   : > { %3200 = vmatprep.subr.bf16.mxu1 (!%p262_p3), %v3423_v2  ;;  %s3580_s19 = smov (!%p262_p3), 80   ;;  %vm1957_vm6 = vcmask (!%p262_p3), 392192   ;;  %vm1990_vm7 = vcmask (!%p262_p3), 654336   ;;  %vm2023_vm8 = vcmask (!%p262_p3), 916480   ;;  %vm2786_vm9 = vcmask (!%p262_p3), 31744  }
   0xf   : > { %3201 = vmatpush3.bf16.msra.mxu1 (!%p262_p3), %v3424_v3 }
  0x10   : > { %s4650_s25 = smov (!%p303_p5, %s3561_s25), 1  ;;  %3202 = vmatprep.subr.bf16.mxu1 %v3428_v4 }
  0x11   : > { %s3319_s13 = smul.u32 216, %s4650_s25 }
  0x13   : > { %s307_s20 = scalar_lea.vmem %s4631_s0, %s3319_s13  ;;  %3203 = vmatpush3.bf16.msra.mxu1 %v3429_v5  ;;  %s312_s17 = scalar_lea.vmem %s4632_s1, %s3319_s13 }
  0x14   : > { %s3681_s23 = scalar_lea.vmem %s307_s20, %s3196_s12  ;;  %s3754_s18 = scalar_lea.vmem %s312_s17, %s3196_s12 }
  0x15   : > { %v3687_v6 = vld [vmem:[%s3681_s23 + $0x24] sm:$0xff]   ;;  %v3369_v7 = vld [vmem:[%s3681_s23 + $0x18] sm:$0xff]   ;;  %v3693_v8 = vld [vmem:[%s3681_s23 + $0xc] sm:$0xff]   ;;  %s3578_s12 = smov 16   ;;  %s3579_s13 = smov 48  }
  0x16   : > { %885 = vrot.lane.b32.xlu0 %v3687_v6, %s3575_s10  ;;  %v936_v9 = vshrl.u32 %v3687_v6, 16  ;;  %883 = vrot.lane.b32.xlu1 %v3369_v7, %s3575_s10  ;;  %v3698_v10 = vld [vmem:[%s3681_s23 + $0x14] ss:$0 sps:$4 sm:$0x11]   ;;  %v3701_v11 = vld [vmem:[%s3681_s23 + $0x18] sm:$0xff]   ;;  %v803_v12 = vrot.slane %v3693_v8, 1 }
  0x17   : > { %v3374_v13 = vld [vmem:[%s3681_s23] sm:$0xff]   ;;  %v804_v14 = vrot.slane %v3698_v10, 1  ;;  %v806_v16 = vrot.slane %v3701_v11, 1  ;;  %v3375_v20 = vld [vmem:[%s3681_s23 + $0x8] ss:$0 sps:$4 sm:$0x11]  }
  0x18   : > { %v3373_v15 = vld [vmem:[%s3681_s23 + $0x20] ss:$0 sps:$4 sm:$0x11]   ;;  %v587_v17 = vrot.slane %v3374_v13, 1  ;;  %v588_v22 = vrot.slane %v3375_v20, 1  ;;  %v3376_v23 = vld [vmem:[%s3681_s23 + $0xc] sm:$0xff]  }
  0x19   : > { %v805_v18 = vsel %vm586_vm0, %v803_v12, %v804_v14  ;;  %v807_v19 = vrot.slane %v3373_v15, 1  ;;  %v3377_v24 = vld [vmem:[%s3681_s23 + $0x14] ss:$0 sps:$4 sm:$0x11]   ;;  %v475_v25 = vshrl.u32 %v3374_v13, 16  ;;  %v477_v26 = vshll.u32 %v3374_v13, 16 }
  0x1a   : > { %667 = vrot.lane.b32.xlu1 %v3693_v8, %s3576_s11  ;;  %827 = vrot.lane.b32.xlu0 %v805_v18, %s3577_s14  ;;  %v482_v27 = vshll.u32 %v3375_v20, 16  ;;  %v924_v28 = vshrl.u32 %v3369_v7, 16  ;;  %v926_v29 = vshll.u32 %v3369_v7, 16  ;;  %v589_v30 = vsel %vm586_vm0, %v587_v17, %v588_v22  ;;  %v3378_v34 = vld [vmem:[%s3681_s23 + $0x20] ss:$0 sps:$4 sm:$0x11]  }
  0x1b   : > { %v808_v21 = vsel %vm586_vm0, %v806_v16, %v807_v19  ;;  %v590_v31 = vrot.slane %v3376_v23, 1  ;;  %v591_v32 = vrot.slane %v3377_v24, 1  ;;  %v487_v33 = vshrl.u32 %v3376_v23, 16  ;;  %v3379_v42 = vld [vmem:[%s3681_s23 + $0x2c] ss:$0 sps:$4 sm:$0x11]  }
  0x1c   : > { %v479_v35 = vrot.slane %v477_v26, 1  ;;  %v484_v36 = vrot.slane %v482_v27, 1  ;;  %v489_v37 = vshll.u32 %v3376_v23, 16  ;;  %v494_v38 = vshll.u32 %v3377_v24, 16  ;;  %v3380_v51 = vld [vmem:[%s3681_s23 + $0x18] sm:$0xff]   ;;  %v3382_v62 = vld [vmem:[%s3681_s23 + $0x24] sm:$0xff]  }
  0x1d   : > { %v592_v39 = vsel %vm586_vm0, %v590_v31, %v591_v32  ;;  %v928_v40 = vrot.slane %v926_v29, 1  ;;  %v931_v41 = vshll.u32 %v3378_v34, 16  ;;  %v938_v43 = vshll.u32 %v3687_v6, 16  ;;  %v3381_v54 = vld [vmem:[%s3681_s23 + $0x20] ss:$0 sps:$4 sm:$0x11]  }
  0x1e   : > { %829 = vrot.lane.b32.xlu0 %v808_v21, %s3577_s14  ;;  %611 = vrot.lane.b32.xlu1 %v589_v30, %s3575_s10  ;;  %v480_v44 = vor.u32 %v479_v35, %v475_v25  ;;  %v491_v45 = vrot.slane %v489_v37, 1  ;;  %v496_v46 = vrot.slane %v494_v38, 1  ;;  %v943_v50 = vshll.u32 %v3379_v42, 16  ;;  %v3383_v63 = vld [vmem:[%s3681_s23 + $0x2c] ss:$0 sps:$4 sm:$0x11]  }
  0x1f   : > { %v929_v47 = vor.u32 %v928_v40, %v924_v28  ;;  %v933_v48 = vrot.slane %v931_v41, 1  ;;  %v940_v49 = vrot.slane %v938_v43, 1  ;;  %v499_v57 = vshrl.u32 %v3380_v51, 16  ;;  %v3384_v3 = vld [vmem:[%s3681_s23 + $0x30] sm:$0xff]   ;;  %v3386_v5 = vld [vmem:[%s3681_s23 + $0x24] sm:$0xff]   ;;  %v3390_v30 = vld [vmem:[%s3681_s23 + $0x3c] sm:$0xff]  }
  0x20   : > { %v485_v52 = vsel %vm473_vm1, %v480_v44, %v484_v36  ;;  %v492_v53 = vor.u32 %v491_v45, %v487_v33  ;;  %v945_v56 = vrot.slane %v943_v50, 1  ;;  %v501_v60 = vshll.u32 %v3380_v51, 16  ;;  %v3385_v4 = vld [vmem:[%s3681_s23 + $0x38] ss:$0 sps:$4 sm:$0x11]   ;;  %v3388_v22 = vld [vmem:[%s3681_s23 + $0x30] sm:$0xff]  }
  0x21   : > { %v934_v55 = vsel %vm473_vm1, %v929_v47, %v933_v48  ;;  %v941_v59 = vor.u32 %v940_v49, %v936_v9  ;;  %v506_v61 = vshll.u32 %v3381_v54, 16  ;;  %v809_v2 = vrot.slane %v3382_v62, 1  ;;  %v3387_v14 = vld [vmem:[%s3681_s23 + $0x2c] ss:$0 sps:$4 sm:$0x11]   ;;  %v3392_v38 = vld [vmem:[%s3754_s18] sm:$0xff]  }
  0x22   : > { %613 = vrot.lane.b32.xlu1 %v592_v39, %s3575_s10  ;;  %570 = vrot.lane.b32.xlu0 %v485_v52, %s3577_s14  ;;  %v497_v58 = vsel %vm473_vm1, %v492_v53, %v496_v46  ;;  %v503_v0 = vrot.slane %v501_v60, 1  ;;  %v810_v9 = vrot.slane %v3383_v63, 1  ;;  %v950_v12 = vshll.u32 %v3384_v3, 16  ;;  %v3389_v24 = vld [vmem:[%s3681_s23 + $0x38] ss:$0 sps:$4 sm:$0x11]  }
  0x23   : > { %v508_v1 = vrot.slane %v506_v61, 1  ;;  %v946_v6 = vsel %vm473_vm1, %v941_v59, %v945_v56  ;;  %v593_v13 = vrot.slane %v3380_v51, 1  ;;  %v594_v16 = vrot.slane %v3381_v54, 1  ;;  %v3391_v35 = vld [vmem:[%s3681_s23 + $0x44] ss:$0 sps:$4 sm:$0x11]  }
  0x24   : > { %v504_v7 = vor.u32 %v503_v0, %v499_v57  ;;  %v513_v17 = vshll.u32 %v3386_v5, 16  ;;  %v811_v18 = vsel %vm586_vm0, %v809_v2, %v810_v9  ;;  %v948_v19 = vshrl.u32 %v3384_v3, 16  ;;  %v3393_v44 = vld [vmem:[%s3754_s18 + $0x8] ss:$0 sps:$4 sm:$0x11]   ;;  %v3773_v52 = vld [vmem:[%s3681_s23 + $0x30] sm:$0xff]  }
  0x25   : > { %v952_v20 = vrot.slane %v950_v12, 1  ;;  %v955_v21 = vshll.u32 %v3385_v4, 16  ;;  %v511_v23 = vshrl.u32 %v3386_v5, 16  ;;  %v595_v25 = vsel %vm586_vm0, %v593_v13, %v594_v16  ;;  %v3396_v56 = vld [vmem:[%s3754_s18 + $0xc] sm:$0xff]   ;;  %v3779_v59 = vld [vmem:[%s3681_s23 + $0x3c] sm:$0xff]   ;;  %s3581_s20 = smov 112  }
  0x26   : > { %572 = vrot.lane.b32.xlu1 %v497_v58, %s3577_s14  ;;  %1019 = vrot.lane.b32.xlu0 %v934_v55, %s3576_s11  ;;  %v509_v15 = vsel %vm473_vm1, %v504_v7, %v508_v1  ;;  %v515_v26 = vrot.slane %v513_v17, 1  ;;  %v518_v27 = vshll.u32 %v3387_v14, 16  ;;  %v812_v33 = vrot.slane %v3388_v22, 1  ;;  %v3395_v55 = vld [vmem:[%s3681_s23 + $0x44] ss:$0 sps:$4 sm:$0x11]  }
  0x27   : > { %v953_v28 = vor.u32 %v952_v20, %v948_v19  ;;  %v957_v29 = vrot.slane %v955_v21, 1  ;;  %v813_v34 = vrot.slane %v3389_v24, 1  ;;  %v962_v37 = vshll.u32 %v3390_v30, 16  ;;  %v3783_v60 = vld [vmem:[%s3681_s23 + $0x38] ss:$0 sps:$4 sm:$0x11]  }
  0x28   : > { %v516_v31 = vor.u32 %v515_v26, %v511_v23  ;;  %v520_v32 = vrot.slane %v518_v27, 1  ;;  %v596_v39 = vrot.slane %v3386_v5, 1  ;;  %v597_v41 = vrot.slane %v3387_v14, 1  ;;  %v3399_v1 = vld [vmem:[%s3754_s18 + $0x14] ss:$0 sps:$4 sm:$0x11]  }
  0x29   : > { %v958_v36 = vsel %vm473_vm1, %v953_v28, %v957_v29  ;;  %v960_v42 = vshrl.u32 %v3390_v30, 16  ;;  %v967_v43 = vshll.u32 %v3391_v35, 16  ;;  %v814_v45 = vsel %vm586_vm0, %v812_v33, %v813_v34  ;;  %v3400_v13 = vld [vmem:[%s3681_s23 + $0x48] sm:$0xff]   ;;  %v3401_v17 = vld [vmem:[%s3681_s23 + $0x50] ss:$0 sps:$4 sm:$0x11]  }
  0x2a   : > { %669 = vrot.lane.b32.xlu1 %v3701_v11, %s3576_s11  ;;  %1021 = vrot.lane.b32.xlu0 %v946_v6, %s3576_s11  ;;  %v521_v40 = vsel %vm473_vm1, %v516_v31, %v520_v32  ;;  %v964_v46 = vrot.slane %v962_v37, 1  ;;  %v1327_v47 = vshll.u32 %v3392_v38, 16  ;;  %v598_v48 = vsel %vm586_vm0, %v596_v39, %v597_v41  ;;  %v3808_v32 = vld [vmem:[%s3754_s18 + $0x18] sm:$0xff]  }
  0x2b   : > { %v969_v49 = vrot.slane %v967_v43, 1  ;;  %v1325_v50 = vshrl.u32 %v3392_v38, 16  ;;  %v1332_v51 = vshll.u32 %v3393_v44, 16  ;;  %v1436_v57 = vrot.slane %v3392_v38, 1  ;;  %v3824_v43 = vld [vmem:[%s3754_s18 + $0x18] sm:$0xff]  }
  0x2c   : > { %v965_v53 = vor.u32 %v964_v46, %v960_v42  ;;  %v1329_v54 = vrot.slane %v1327_v47, 1  ;;  %v1437_v58 = vrot.slane %v3393_v44, 1  ;;  %v525_v61 = vshll.u32 %v3773_v52, 16  ;;  %v3404_v38 = vld [vmem:[%s3754_s18 + $0x14] ss:$0 sps:$4 sm:$0x11]  }
  0x2d   : > { %v1334_v0 = vrot.slane %v1332_v51, 1  ;;  %v1559_v2 = vshll.u32 %v3396_v56, 16  ;;  %v815_v4 = vrot.slane %v3779_v59, 1  ;;  %v816_v5 = vrot.slane %v3395_v55, 1 }
  0x2e   : > { %574 = vrot.lane.b32.xlu1 %v509_v15, %s3577_s14  ;;  %831 = vrot.lane.b32.xlu0 %v811_v18, %s3577_s14  ;;  %v1330_v63 = vor.u32 %v1329_v54, %v1325_v50  ;;  %v523_v6 = vshrl.u32 %v3773_v52, 16  ;;  %v527_v7 = vrot.slane %v525_v61, 1  ;;  %v530_v9 = vshll.u32 %v3783_v60, 16  ;;  %v3833_v51 = vld [vmem:[%s3754_s18 + $0x20] ss:$0 sps:$4 sm:$0x11]  }
  0x2f   : > { %v1557_v12 = vshrl.u32 %v3396_v56, 16  ;;  %v1561_v15 = vrot.slane %v1559_v2, 1  ;;  %v1564_v16 = vshll.u32 %v3399_v1, 16  ;;  %v817_v18 = vsel %vm586_vm0, %v815_v4, %v816_v5  ;;  %v3409_v61 = vld [vmem:[%s3681_s23 + $0x50] ss:$0 sps:$4 sm:$0x11]  }
  0x30   : > { %v1335_v14 = vsel %vm473_vm1, %v1330_v63, %v1334_v0  ;;  %v528_v19 = vor.u32 %v527_v7, %v523_v6  ;;  %v532_v20 = vrot.slane %v530_v9, 1  ;;  %v974_v21 = vshll.u32 %v3400_v13, 16  ;;  %v3432_v0 = vld [vmem:[%s4633_s2 + $0x18] sm:$0xff]   ;;  %v3434_v7 = vld [vmem:[%s4633_s2 + $0x60] sm:$0xff]  }
  0x31   : > { %v1566_v23 = vrot.slane %v1564_v16, 1  ;;  %v1668_v24 = vrot.slane %v3396_v56, 1  ;;  %v1669_v27 = vrot.slane %v3399_v1, 1  ;;  %v972_v28 = vshrl.u32 %v3400_v13, 16  ;;  %v3410_v16 = vld [vmem:[%s3681_s23 + $0x54] sm:$0xff]  }
  0x32   : > { %615 = vrot.lane.b32.xlu1 %v595_v25, %s3575_s10  ;;  %887 = vrot.lane.b32.xlu0 %v3384_v3, %s3575_s10  ;;  %v1438_v3 = vsel %vm586_vm0, %v1436_v57, %v1437_v58  ;;  %v979_v25 = vshll.u32 %v3401_v17, 16  ;;  %v533_v26 = vsel %vm473_vm1, %v528_v19, %v532_v20  ;;  %v976_v29 = vrot.slane %v974_v21, 1  ;;  %v3839_v58 = vld [vmem:[%s3681_s23 + $0x48] sm:$0xff]  }
  0x33   : > { %v599_v33 = vrot.slane %v3773_v52, 1  ;;  %v600_v35 = vrot.slane %v3783_v60, 1  ;;  %v1791_v41 = vshll.u32 %v3808_v32, 16  ;;  %v1344_v46 = vshll.u32 %v3404_v38, 16  ;;  %v3842_v60 = vld [vmem:[%s3681_s23 + $0x3c] sm:$0xff]   ;;  %v3413_v21 = vld [vmem:[%s3754_s18 + $0x24] sm:$0xff]  }
  0x34   : > { %v981_v34 = vrot.slane %v979_v25, 1  ;;  %v977_v37 = vor.u32 %v976_v29, %v972_v28  ;;  %v1569_v54 = vshrl.u32 %v3824_v43, 16  ;;  %v1571_v55 = vshll.u32 %v3824_v43, 16 }
  0x35   : > { %v601_v47 = vsel %vm586_vm0, %v599_v33, %v600_v35  ;;  %v1576_v63 = vshll.u32 %v3833_v51, 16  ;;  %v1440_v5 = vrot.slane %v3404_v38, 1  ;;  %v537_v6 = vshll.u32 %v3842_v60, 16 }
  0x36   : > { %671 = vrot.lane.b32.xlu1 %v3382_v62, %s3576_s11  ;;  %1023 = vrot.lane.b32.xlu0 %v958_v36, %s3576_s11  ;;  %v970_v62 = vsel %vm473_vm1, %v965_v53, %v969_v49  ;;  %v1670_v36 = vsel %vm586_vm0, %v1668_v24, %v1669_v27  ;;  %v982_v44 = vsel %vm473_vm1, %v977_v37, %v981_v34  ;;  %v1793_v49 = vrot.slane %v1791_v41, 1  ;;  %v3438_v24 = vld [vmem:[%s4633_s2 + $0x28] sm:$0xff]   ;;  %v3442_v41 = vld [vmem:[%s4633_s2 + $0x70] sm:$0xff]  }
  0x37   : > { %v1346_v53 = vrot.slane %v1344_v46, 1  ;;  %v1573_v2 = vrot.slane %v1571_v55, 1  ;;  %v1578_v9 = vrot.slane %v1576_v63, 1  ;;  %v535_v17 = vshrl.u32 %v3842_v60, 16 }
  0x38   : > { %v539_v19 = vrot.slane %v537_v6, 1  ;;  %v602_v33 = vrot.slane %v3842_v60, 1  ;;  %v1672_v34 = vrot.slane %v3833_v51, 1  ;;  %v1801_v37 = vshrl.u32 %v3413_v21, 16 }
  0x39   : > { %v1803_v38 = vshll.u32 %v3413_v21, 16 }
  0x3a   : > { %576 = vrot.lane.b32.xlu1 %v521_v40, %s3577_s14  ;;  %833 = vrot.lane.b32.xlu0 %v814_v45, %s3577_s14  ;;  %v3818_v40 = vld [vmem:[%s3754_s18 + $0x20] ss:$0 sps:$4 sm:$0x11]   ;;  %v540_v28 = vor.u32 %v539_v19, %v535_v17 }
  0x3b   : > { %v1796_v50 = vshll.u32 %v3818_v40, 16 }
  0x3d   : > { %v1798_v57 = vrot.slane %v1796_v50, 1  ;;  %v3446_v50 = vld [vmem:[%s4633_s2 + $0x38] sm:$0xff]  }
  0x3e   : > { %617 = vrot.lane.b32.xlu1 %v598_v48, %s3575_s10  ;;  %889 = vrot.lane.b32.xlu0 %v3390_v30, %s3575_s10  ;;  %v3804_v30 = vld [vmem:[%s3754_s18 + $0xc] sm:$0xff]   ;;  %v1789_v48 = vshrl.u32 %v3808_v32, 16 }
  0x3f   : > { %v1339_v39 = vshll.u32 %v3804_v30, 16  ;;  %v1337_v42 = vshrl.u32 %v3804_v30, 16 }
  0x41   : > { %v1341_v45 = vrot.slane %v1339_v39, 1  ;;  %v3416_v39 = vld [vmem:[%s3754_s18 + $0x18] sm:$0xff]  }
  0x42   : > { %673 = vrot.lane.b32.xlu1 %v3388_v22, %s3576_s11  ;;  %1025 = vrot.lane.b32.xlu0 %v970_v62, %s3576_s11  ;;  %v1562_v22 = vor.u32 %v1561_v15, %v1557_v12  ;;  %v3431_v62 = vld [vmem:[%s4633_s2 + $0x58] sm:$0xff]   ;;  %v818_v12 = vrot.slane %v3839_v58, 1  ;;  %v1574_v15 = vor.u32 %v1573_v2, %v1569_v54  ;;  %v1351_v55 = vshll.u32 %v3416_v39, 16 }
  0x43   : > { %v1342_v52 = vor.u32 %v1341_v45, %v1337_v42  ;;  %3204 = vmatprep.subr.bf16.mxu1 %v3431_v62  ;;  %v3918_v62 = vld [vmem:[%s3681_s23 + $0x48] sm:$0xff]   ;;  %v1442_v2 = vrot.slane %v3416_v39, 1 }
  0x44   : > { %v1567_v31 = vsel %vm473_vm1, %v1562_v22, %v1566_v23  ;;  %3205 = vmatpush3.bf16.msra.mxu1 %v3432_v0  ;;  %v3437_v22 = vld [vmem:[%s4633_s2 + $0x68] sm:$0xff]   ;;  %v3414_v23 = vld [vmem:[%s3681_s23 + $0x5c] ss:$0 sps:$4 sm:$0x11]   ;;  %v1579_v25 = vsel %vm473_vm1, %v1574_v15, %v1578_v9  ;;  %v1353_v0 = vrot.slane %v1351_v55, 1  ;;  %v549_v9 = vshll.u32 %v3918_v62, 16 }
  0x45   : > { %v1347_v1 = vsel %vm473_vm1, %v1342_v52, %v1346_v53  ;;  %3206 = vmatprep.subr.bf16.mxu1 %v3434_v7  ;;  %v991_v45 = vshll.u32 %v3414_v23, 16  ;;  %v3932_v7 = vld [vmem:[%s3681_s23 + $0x50] ss:$0 sps:$4 sm:$0x11]  }
  0x46   : > { %1460 = vrot.lane.b32.xlu1 %v1438_v3, %s3577_s14  ;;  %1420 = vrot.lane.b32.xlu0 %v1335_v14, %s3578_s12  ;;  %v3858_v3 = vld [vmem:[%s3681_s23 + $0x44] ss:$0 sps:$4 sm:$0x11]   ;;  %v551_v19 = vrot.slane %v549_v9, 1 }
  0x47   : > { %v3435_v14 = vld [vmem:[%s4633_s2 + $0x20] sm:$0xff]   ;;  %v542_v20 = vshll.u32 %v3858_v3, 16  ;;  %v603_v35 = vrot.slane %v3858_v3, 1  ;;  %v993_v54 = vrot.slane %v991_v45, 1 }
  0x48   : > { %3207 = vmatpush3.bf16.msra.mxu1 %v3435_v14  ;;  %v3421_v3 = vld [vmem:[%s3681_s23 + $0x5c] ss:$0 sps:$4 sm:$0x11]   ;;  %v3969_v45 = vld [vmem:[%s3754_s18 + $0x24] sm:$0xff]  }
  0x49   : > { %3208 = vmatprep.subr.bf16.mxu1 %v3437_v22  ;;  %v544_v29 = vrot.slane %v542_v20, 1  ;;  %v604_v51 = vsel %vm586_vm0, %v602_v33, %v603_v35  ;;  %v822_v17 = vrot.slane %v3421_v3, 1  ;;  %v554_v20 = vshll.u32 %v3932_v7, 16  ;;  %v3460_v35 = vld [vmem:[%s4634_s3 + $0x8] sm:$0xff]  }
  0x4a   : > { %835 = vrot.lane.b32.xlu1 %v817_v18, %s3577_s14  ;;  %1516 = vrot.lane.b32.xlu0 %v3396_v56, %s3579_s13  ;;  %v1794_v56 = vor.u32 %v1793_v49, %v1789_v48  ;;  %v3445_v48 = vld [vmem:[%s4633_s2 + $0x78] sm:$0xff]   ;;  %v1805_v49 = vrot.slane %v1803_v38, 1  ;;  %v1363_v55 = vshll.u32 %v3969_v45, 16 }
  0x4c   : > { %v1799_v4 = vsel %vm473_vm1, %v1794_v56, %v1798_v57  ;;  %3209 = vmatpush3.bf16.msra.mxu1 %v3438_v24  ;;  %v1349_v57 = vshrl.u32 %v3416_v39, 16  ;;  %v1806_v60 = vor.u32 %v1805_v49, %v1801_v37  ;;  %v715_v49 = vshll.u32 %v3698_v10, 16 }
  0x4d   : > { %3210 = vmatprep.subr.bf16.mxu1 %v3442_v41  ;;  %v1365_v3 = vrot.slane %v1363_v55, 1  ;;  %v4069_v55 = vld [vmem:[%s3681_s23 + $0x6c] sm:$0xff]  }
  0x4e   : > { %578 = vrot.lane.b32.xlu1 %v533_v26, %s3577_s14  ;;  %1652 = vrot.lane.b32.xlu0 %v1567_v31, %s3575_s10  ;;  %v986_v26 = vshll.u32 %v3410_v16, 16  ;;  %v3415_v31 = vld [vmem:[%s3754_s18 + $0x2c] ss:$0 sps:$4 sm:$0x11]  }
  0x4f   : > { %v1808_v46 = vshll.u32 %v3415_v31, 16  ;;  %v3582_v31 = vmov 0  }
  0x50   : > { %v988_v42 = vrot.slane %v986_v26, 1  ;;  %v3458_v26 = vld [vmem:[%s4634_s3] sm:$0xff]   ;;  %2180 = vmatprep.subr.bf16.mxu0 %v3582_v31 }
  0x51   : > { %v1810_v56 = vrot.slane %v1808_v46, 1  ;;  %2181 = vmatpush1.bf16.msra.mxu0 %v3458_v26 }
  0x52   : > { %1692 = vrot.lane.b32.xlu1 %v1670_v36, %s3580_s19  ;;  %891 = vrot.lane.b32.xlu0 %v3400_v13, %s3575_s10  ;;  %v819_v13 = vrot.slane %v3409_v61, 1  ;;  %v984_v36 = vshrl.u32 %v3410_v16, 16 }
  0x53   : > { %2182 = vmatprep.subr.bf16.mxu0 %v3582_v31 }
  0x54   : > { %v820_v27 = vsel %vm586_vm0, %v818_v12, %v819_v13  ;;  %v989_v53 = vor.u32 %v988_v42, %v984_v36  ;;  %v1354_v12 = vor.u32 %v1353_v0, %v1349_v57  ;;  %v3427_v13 = vld [vmem:[%s3754_s18 + $0x2c] ss:$0 sps:$4 sm:$0x11]   ;;  %v3465_v57 = vld [vmem:[%s4634_s3 + $0x18] sm:$0xff]   ;;  %v1361_v0 = vshrl.u32 %v3969_v45, 16 }
  0x55   : > { %v1675_v37 = vrot.slane %v3427_v13, 1  ;;  %2183 = vmatpush1.bf16.msra.mxu0 %v3460_v35 }
  0x56   : > { %1027 = vrot.lane.b32.xlu1 %v982_v44, %s3576_s11  ;;  %619 = vrot.lane.b32.xlu0 %v601_v47, %s3575_s10  ;;  %v545_v44 = vsel %vm473_vm1, %v540_v28, %v544_v29  ;;  %v3417_v47 = vld [vmem:[%s3754_s18 + $0x20] ss:$0 sps:$4 sm:$0x11]   ;;  %v994_v63 = vsel %vm473_vm1, %v989_v53, %v993_v54  ;;  %v556_v29 = vrot.slane %v554_v20, 1 }
  0x57   : > { %v1356_v61 = vshll.u32 %v3417_v47, 16  ;;  %2184 = vmatprep.subr.bf16.mxu0 %v3582_v31 }
  0x59   : > { %v1358_v6 = vrot.slane %v1356_v61, 1  ;;  %v3492_v61 = vld [vmem:[%s3681_s23 + $0xc] sm:$0xff]  }
  0x5a   : > { %675 = vrot.lane.b32.xlu1 %v3779_v59, %s3576_s11  ;;  %1748 = vrot.lane.b32.xlu0 %v3808_v32, %s3576_s11  ;;  %v1439_v59 = vrot.slane %v3804_v30, 1  ;;  %v1671_v30 = vrot.slane %v3824_v43, 1 }
  0x5b   : > { %v1359_v22 = vsel %vm473_vm1, %v1354_v12, %v1358_v6  ;;  %v4009_v6 = vld [vmem:[%s3754_s18 + $0x30] sm:$0xff]  }
  0x5c   : > { %v1441_v18 = vsel %vm586_vm0, %v1439_v59, %v1440_v5  ;;  %v1673_v52 = vsel %vm586_vm0, %v1671_v30, %v1672_v34  ;;  %v3927_v59 = vld [vmem:[%s3681_s23 + $0x54] sm:$0xff]   ;;  %v1811_v5 = vsel %vm473_vm1, %v1806_v60, %v1810_v56  ;;  %v3997_v60 = vrot.slane %v715_v49, 1 }
  0x5d   : > { %v3987_v56 = vld [vmem:[%s3754_s18 + $0x38] ss:$0 sps:$4 sm:$0x11]  }
  0x5e   : > { %1422 = vrot.lane.b32.xlu1 %v1347_v1, %s3578_s12  ;;  %1884 = vrot.lane.b32.xlu0 %v1799_v4, %s3581_s20  ;;  %v3922_v1 = vld [vmem:[%s3754_s18 + $0x24] sm:$0xff]   ;;  %v1443_v4 = vrot.slane %v3417_v47, 1  ;;  %v606_v47 = vrot.slane %v3932_v7, 1 }
  0x5f   : > { %v1583_v14 = vshll.u32 %v3922_v1, 16  ;;  %v1581_v23 = vshrl.u32 %v3922_v1, 16  ;;  %v1674_v36 = vrot.slane %v3922_v1, 1 }
  0x60   : > { %v1444_v15 = vsel %vm586_vm0, %v1442_v2, %v1443_v4 }
  0x61   : > { %v1585_v24 = vrot.slane %v1583_v14, 1  ;;  %v1676_v53 = vsel %vm586_vm0, %v1674_v36, %v1675_v37  ;;  %v3493_v14 = vld [vmem:[%s3681_s23 + $0x18] sm:$0xff]  }
  0x62   : > { %1518 = vrot.lane.b32.xlu1 %v3824_v43, %s3579_s13  ;;  %1462 = vrot.lane.b32.xlu0 %v1441_v18, %s3577_s14  ;;  %v3443_v43 = vld [vmem:[%s4633_s2 + $0x30] sm:$0xff]   ;;  %v547_v18 = vshrl.u32 %v3918_v62, 16  ;;  %v4048_v37 = vld [vmem:[%s3681_s23 + $0x5c] ss:$0 sps:$4 sm:$0x11]  }
  0x63   : > { %3211 = vmatpush3.bf16.msra.mxu1 %v3443_v43  ;;  %v1586_v33 = vor.u32 %v1585_v24, %v1581_v23  ;;  %v605_v43 = vrot.slane %v3918_v62, 1  ;;  %v708_v62 = vshrl.u32 %v3492_v61, 16  ;;  %v1595_v24 = vshll.u32 %v4009_v6, 16 }
  0x64   : > { %3212 = vmatprep.subr.bf16.mxu1 %v3445_v48  ;;  %v552_v28 = vor.u32 %v551_v19, %v547_v18  ;;  %v3462_v48 = vld [vmem:[%s4634_s3 + $0x10] sm:$0xff]   ;;  %v3494_v18 = vld [vmem:[%s3681_s23 + $0x20] ss:$0 sps:$4 sm:$0x11]  }
  0x65   : > { %2185 = vmatpush1.bf16.msra.mxu0 %v3462_v48  ;;  %v607_v7 = vsel %vm586_vm0, %v605_v43, %v606_v47  ;;  %v727_v19 = vshll.u32 %v3494_v18, 16  ;;  %v1597_v36 = vrot.slane %v1595_v24, 1 }
  0x66   : > { %1654 = vrot.lane.b32.xlu1 %v1579_v25, %s3575_s10  ;;  %837 = vrot.lane.b32.xlu0 %v820_v27, %s3577_s14  ;;  %v1588_v25 = vshll.u32 %v3427_v13, 16  ;;  %v557_v41 = vsel %vm473_vm1, %v552_v28, %v556_v29  ;;  %v3468_v13 = vld [vmem:[%s4634_s3 + $0x20] sm:$0xff]   ;;  %v3471_v29 = vld [vmem:[%s4634_s3 + $0x28] sm:$0xff]  }
  0x67   : > { %3213 = vmatpush3.bf16.msra.mxu1 %v3446_v50  ;;  %v3978_v50 = vld [vmem:[%s3754_s18 + $0x2c] ss:$0 sps:$4 sm:$0x11]   ;;  %2186 = vmatprep.subr.bf16.mxu0 %v3582_v31  ;;  %v4032_v28 = vld [vmem:[%s3681_s23 + $0x60] sm:$0xff]   ;;  %v729_v47 = vrot.slane %v727_v19, 1 }
  0x68   : > { %v1590_v34 = vrot.slane %v1588_v25, 1  ;;  %v1368_v4 = vshll.u32 %v3978_v50, 16  ;;  %v4028_v25 = vld [vmem:[%s3681_s23 + $0x54] sm:$0xff]   ;;  %v1446_v43 = vrot.slane %v3978_v50, 1 }
  0x69   : > { %2187 = vmatpush1.bf16.msra.mxu0 %v3465_v57 }
  0x6a   : > { %893 = vrot.lane.b32.xlu1 %v3410_v16, %s3575_s10  ;;  %580 = vrot.lane.b32.xlu0 %v545_v44, %s3577_s14  ;;  %v821_v16 = vrot.slane %v3927_v59, 1  ;;  %v3966_v44 = vld [vmem:[%s3754_s18 + $0x30] sm:$0xff]   ;;  %v1591_v46 = vsel %vm473_vm1, %v1586_v33, %v1590_v34  ;;  %v4039_v33 = vld [vmem:[%s3681_s23 + $0x68] ss:$0 sps:$4 sm:$0x11]  }
  0x6b   : > { %v1815_v10 = vshll.u32 %v3966_v44, 16  ;;  %v1813_v9 = vshrl.u32 %v3966_v44, 16  ;;  %2188 = vmatprep.subr.bf16.mxu0 %v3582_v31 }
  0x6c   : > { %v823_v27 = vsel %vm586_vm0, %v821_v16, %v822_v17  ;;  %v4018_v16 = vld [vmem:[%s3754_s18 + $0x38] ss:$0 sps:$4 sm:$0x11]  }
  0x6d   : > { %v1817_v12 = vrot.slane %v1815_v10, 1  ;;  %2189 = vmatpush1.bf16.msra.mxu0 %v3468_v13  ;;  %v559_v10 = vshrl.u32 %v4028_v25, 16  ;;  %v4091_v13 = vld [vmem:[%s3754_s18 + $0x3c] sm:$0xff]  }
  0x6e   : > { %621 = vrot.lane.b32.xlu1 %v604_v51, %s3575_s10  ;;  %1694 = vrot.lane.b32.xlu0 %v1673_v52, %s3580_s19  ;;  %v710_v52 = vshll.u32 %v3693_v8, 16 }
  0x6f   : > { %2190 = vmatprep.subr.bf16.mxu0 %v3582_v31 }
  0x71   : > { %2191 = vmatpush1.bf16.msra.mxu0 %v3471_v29 }
  0x72   : > { %1750 = vrot.lane.b32.xlu1 %v3413_v21, %s3576_s11  ;;  %1029 = vrot.lane.b32.xlu0 %v994_v63, %s3576_s11  ;;  %v3430_v21 = vld [vmem:[%s3681_s23 + $0x60] sm:$0xff]   ;;  %v722_v63 = vshll.u32 %v3701_v11, 16  ;;  %v712_v11 = vrot.slane %v710_v52, 1  ;;  %v566_v52 = vshll.u32 %v4048_v37, 16 }
  0x73   : > { %v998_v30 = vshll.u32 %v3430_v21, 16  ;;  %v996_v38 = vshrl.u32 %v3430_v21, 16  ;;  %2192 = vmatprep.subr.bf16.mxu0 %v3582_v31 }
  0x74   : > { %v724_v17 = vrot.slane %v722_v63, 1  ;;  %v713_v34 = vor.u32 %v712_v11, %v708_v62 }
  0x75   : > { %v1000_v42 = vrot.slane %v998_v30, 1  ;;  %v1600_v30 = vshll.u32 %v4018_v16, 16 }
  0x76   : > { %1886 = vrot.lane.b32.xlu1 %v1811_v5, %s3581_s20  ;;  %677 = vrot.lane.b32.xlu0 %v3839_v58, %s3576_s11  ;;  %v3433_v58 = vld [vmem:[%s3681_s23 + $0x68] ss:$0 sps:$4 sm:$0x11]   ;;  %v1820_v5 = vshll.u32 %v3987_v56, 16  ;;  %v718_v49 = vsel %vm473_vm1, %v713_v34, %v3997_v60  ;;  %v3477_v60 = vld [vmem:[%s4634_s3 + $0x38] sm:$0xff]  }
  0x77   : > { %v1003_v39 = vshll.u32 %v3433_v58, 16  ;;  %v1001_v54 = vor.u32 %v1000_v42, %v996_v38  ;;  %v1818_v58 = vor.u32 %v1817_v12, %v1813_v9  ;;  %v1445_v42 = vrot.slane %v3969_v45, 1  ;;  %v4114_v34 = vld [vmem:[%s3754_s18 + $0x44] ss:$0 sps:$4 sm:$0x11]  }
  0x78   : > { %v1822_v23 = vrot.slane %v1820_v5, 1  ;;  %v1602_v48 = vrot.slane %v1600_v30, 1  ;;  %v824_v45 = vrot.slane %v4032_v28, 1  ;;  %v3497_v5 = vld [vmem:[%s3681_s23 + $0x2c] ss:$0 sps:$4 sm:$0x11]  }
  0x79   : > { %v1005_v51 = vrot.slane %v1003_v39, 1  ;;  %v568_v12 = vrot.slane %v566_v52, 1 }
  0x7a   : > { %1464 = vrot.lane.b32.xlu1 %v1444_v15, %s3577_s14  ;;  %1424 = vrot.lane.b32.xlu0 %v1359_v22, %s3578_s12  ;;  %v720_v15 = vshrl.u32 %v3493_v14, 16  ;;  %v1370_v22 = vrot.slane %v1368_v4, 1  ;;  %v4094_v14 = vld [vmem:[%s3681_s23 + $0x74] ss:$0 sps:$4 sm:$0x11]  }
  0x7b   : > { %v1006_v2 = vsel %vm473_vm1, %v1001_v54, %v1005_v51  ;;  %v825_v51 = vrot.slane %v4039_v33, 1  ;;  %v1447_v54 = vsel %vm586_vm0, %v1445_v42, %v1446_v43 }
  0x7d   : > { %v826_v9 = vsel %vm586_vm0, %v824_v45, %v825_v51 }
  0x7e   : > { %839 = vrot.lane.b32.xlu1 %v823_v27, %s3577_s14  ;;  %1520 = vrot.lane.b32.xlu0 %v3922_v1, %s3579_s13  ;;  %v1593_v27 = vshrl.u32 %v4009_v6, 16 }
  0x80   : > { %v1598_v50 = vor.u32 %v1597_v36, %v1593_v27  ;;  %v1677_v27 = vrot.slane %v4009_v6, 1 }
  0x82   : > { %582 = vrot.lane.b32.xlu1 %v557_v41, %s3577_s14  ;;  %1656 = vrot.lane.b32.xlu0 %v1591_v46, %s3575_s10  ;;  %v1823_v41 = vsel %vm473_vm1, %v1818_v58, %v1822_v23  ;;  %v561_v46 = vshll.u32 %v4028_v25, 16  ;;  %v1603_v11 = vsel %vm473_vm1, %v1598_v50, %v1602_v48  ;;  %v1901_v23 = vrot.slane %v3818_v40, 1 }
  0x83   : > { %v609_v58 = vrot.slane %v4048_v37, 1  ;;  %v1678_v40 = vrot.slane %v4018_v16, 1  ;;  %v1015_v37 = vshll.u32 %v4094_v14, 16  ;;  %v1825_v48 = vshrl.u32 %v4091_v13, 16 }
  0x84   : > { %v563_v57 = vrot.slane %v561_v46, 1 }
  0x85   : > { %v1679_v51 = vsel %vm586_vm0, %v1677_v27, %v1678_v40  ;;  %v3501_v40 = vld [vmem:[%s3681_s23 + $0x18] sm:$0xff]  }
  0x86   : > { %1696 = vrot.lane.b32.xlu1 %v1676_v53, %s3580_s19  ;;  %895 = vrot.lane.b32.xlu0 %v3430_v21, %s3575_s10  ;;  %v1366_v21 = vor.u32 %v1365_v3, %v1361_v0  ;;  %v3495_v0 = vld [vmem:[%s3681_s23] sm:$0xff]   ;;  %v564_v19 = vor.u32 %v563_v57, %v559_v10 }
  0x87   : > { %v4083_v3 = vld [vmem:[%s3681_s23 + $0x24] sm:$0xff]  }
  0x88   : > { %v3995_v8 = vpop.permute.xlu0 %885  ;;  %v4003_v1 = vpop.permute.xlu1 %883  ;;  %v1371_v35 = vsel %vm473_vm1, %v1366_v21, %v1370_v22  ;;  %v734_v4 = vshll.u32 %v4083_v3, 16  ;;  %v1010_v21 = vshll.u32 %v4069_v55, 16  ;;  %v3479_v22 = vld [vmem:[%s4634_s3 + $0x40] sm:$0xff]   ;;  %v569_v36 = vsel %vm473_vm1, %v564_v19, %v568_v12 }
  0x89   : > { %v3489_v12 = vld [vmem:[%s4633_s2 + $0x80] sm:$0xff]  }
  0x8a   : > { %1031 = vrot.lane.b32.xlu1 %v1006_v2, %s3576_s11  ;;  %623 = vrot.lane.b32.xlu0 %v607_v7, %s3575_s10  ;;  %v739_v7 = vshll.u32 %v3497_v5, 16  ;;  %v1012_v16 = vrot.slane %v1010_v21, 1  ;;  %v736_v42 = vrot.slane %v734_v4, 1 }
  0x8b   : > { %3281 = vmatprep.subr.bf16.mxu1 %v3489_v12 }
  0x8c   : > { %v4024_v20 = vpop.permute.xlu1 %667  ;;  %v828_v26 = vpop.permute.xlu0 %827  ;;  %v741_v46 = vrot.slane %v739_v7, 1 }
  0x8d   : > { %v1120_v63 = vsel %vm1059_vm2, %v718_v49, %v828_v26  ;;  %v1832_v49 = vshll.u32 %v4114_v34, 16 }
  0x8e   : > { %679 = vrot.lane.b32.xlu1 %v3927_v59, %s3576_s11  ;;  %1752 = vrot.lane.b32.xlu0 %v3966_v44, %s3576_s11  ;;  %v3473_v59 = vld [vmem:[%s4634_s3 + $0x30] sm:$0xff]   ;;  %v725_v44 = vor.u32 %v724_v17, %v720_v15  ;;  %v1900_v15 = vrot.slane %v3808_v32, 1  ;;  %v1143_v26 = vsel %vm1076_vm3, %v1120_v63, %v4003_v1  ;;  %v608_v32 = vrot.slane %v4028_v25, 1 }
  0x8f   : > { %2193 = vmatpush1.bf16.msra.mxu0 %v3473_v59  ;;  %v1827_v25 = vshll.u32 %v4091_v13, 16  ;;  %v1834_v7 = vrot.slane %v1832_v49, 1  ;;  %v4191_v49 = vld [vmem:[%s3754_s18 + $0x44] ss:$0 sps:$4 sm:$0x11]  }
  0x90   : > { %v830_v38 = vpop.permute.xlu0 %829  ;;  %v612_v39 = vpop.permute.xlu1 %611  ;;  %v730_v61 = vsel %vm473_vm1, %v725_v44, %v729_v47  ;;  %2194 = vmatprep.subr.bf16.mxu0 %v3582_v31  ;;  %v1902_v1 = vsel %vm586_vm0, %v1900_v15, %v1901_v23  ;;  %v610_v59 = vsel %vm586_vm0, %v608_v32, %v609_v58  ;;  %v4136_v44 = vld [vmem:[%s3754_s18 + $0x3c] sm:$0xff]   ;;  %v3498_v47 = vld [vmem:[%s3681_s23 + $0xc] sm:$0xff]  }
  0x91   : > { %v1123_v29 = vsel %vm1059_vm2, %v730_v61, %v830_v38  ;;  %v4125_v38 = vld [vmem:[%s3754_s18 + $0x30] sm:$0xff]   ;;  %3149 = vmatprep.mubr.msk.bf16.mxu0 %vm1924_vm5, %v1902_v1  ;;  %v1829_v45 = vrot.slane %v1827_v25, 1  ;;  %v1605_v27 = vshrl.u32 %v4136_v44, 16  ;;  %v4179_v25 = vld [vmem:[%s3754_s18 + $0x3c] sm:$0xff]  }
  0x92   : > { %1426 = vrot.lane.b32.xlu1 %v1371_v35, %s3578_s12  ;;  %1888 = vrot.lane.b32.xlu0 %v1823_v41, %s3581_s20  ;;  %v732_v41 = vshrl.u32 %v4083_v3, 16  ;;  %v1375_v10 = vshll.u32 %v4125_v38, 16  ;;  %v3499_v61 = vld [vmem:[%s3681_s23 + $0x30] sm:$0xff]   ;;  %v1607_v3 = vshll.u32 %v4136_v44, 16  ;;  %v1448_v32 = vrot.slane %v4125_v38, 1 }
  0x93   : > { %2195 = vmatpush1.bf16.msra.mxu0 %v3477_v60  ;;  %v746_v63 = vshll.u32 %v3499_v61, 16  ;;  %v1830_v5 = vor.u32 %v1829_v45, %v1825_v48 }
  0x94   : > { %v4065_v53 = vpop.permute.xlu1 %613  ;;  %v571_v62 = vpop.permute.xlu0 %570  ;;  %2196 = vmatprep.subr.bf16.mxu0 %v3582_v31  ;;  %v1008_v31 = vshrl.u32 %v4069_v55, 16  ;;  %v737_v57 = vor.u32 %v736_v42, %v732_v41  ;;  %v1377_v19 = vrot.slane %v1375_v10, 1 }
  0x95   : > { %v1061_v2 = vsel %vm1059_vm2, %v3495_v0, %v571_v62  ;;  %v744_v62 = vshrl.u32 %v3499_v61, 16  ;;  %v1910_v61 = vrot.slane %v4114_v34, 1 }
  0x96   : > { %1522 = vrot.lane.b32.xlu1 %v4009_v6, %s3579_s13  ;;  %1466 = vrot.lane.b32.xlu0 %v1447_v54, %s3577_s14  ;;  %v1078_v18 = vsel %vm1076_vm3, %v1061_v2, %v612_v39  ;;  %v1013_v52 = vor.u32 %v1012_v16, %v1008_v31  ;;  %v1017_v54 = vrot.slane %v1015_v37, 1  ;;  %v4151_v2 = vld [vmem:[%s3754_s18 + $0x44] ss:$0 sps:$4 sm:$0x11]   ;;  %v742_v23 = vsel %vm473_vm1, %v737_v57, %v741_v46 }
  0x97   : > { %v1095_v6 = vsel %vm1093_vm4, %v1078_v18, %v4024_v20  ;;  %2197 = vmatpush1.bf16.msra.mxu0 %v3479_v22  ;;  %v1145_v20 = vsel %vm1076_vm3, %v1123_v29, %v3995_v8  ;;  %v1373_v18 = vshrl.u32 %v4125_v38, 16  ;;  %v4166_v22 = vld [vmem:[%s3754_s18 + $0x48] sm:$0xff]   ;;  %v1609_v29 = vrot.slane %v1607_v3, 1  ;;  %v3464_v46 = vld [vmem:[%s3754_s18 + $0x50] ss:$0 sps:$4 sm:$0x11]  }
  0x98   : > { %v573_v17 = vpop.permute.xlu1 %572  ;;  %v1020_v24 = vpop.permute.xlu0 %1019  ;;  %v1837_v57 = vshrl.u32 %v4166_v22, 16 }
  0x99   : > { %v1159_v30 = vsel %vm1093_vm4, %v1143_v26, %v1020_v24  ;;  %v1063_v8 = vsel %vm1059_vm2, %v3498_v47, %v573_v17  ;;  %v1018_v17 = vsel %vm473_vm1, %v1013_v52, %v1017_v54  ;;  %v748_v26 = vrot.slane %v746_v63, 1 }
  0x9a   : > { %1658 = vrot.lane.b32.xlu1 %v1603_v11, %s3575_s10  ;;  %841 = vrot.lane.b32.xlu0 %v826_v9, %s3577_s14  ;;  %v1080_v0 = vsel %vm1076_vm3, %v1063_v8, %v4065_v53  ;;  %v3500_v11 = vld [vmem:[%s3681_s23 + $0x38] ss:$0 sps:$4 sm:$0x11]   ;;  %v3490_v53 = vld [vmem:[%s4633_s2 + $0x88] sm:$0xff]   ;;  %v1378_v37 = vor.u32 %v1377_v19, %v1373_v18  ;;  %v1610_v48 = vor.u32 %v1609_v29, %v1605_v27  ;;  %v794_v52 = vshll.u32 %v4032_v28, 16 }
  0x9b   : > { %2441 = vmatprep.mubr.bf16.mxu1 %v1159_v30  ;;  %v751_v9 = vshll.u32 %v3500_v11, 16  ;;  %v1612_v30 = vshll.u32 %v4151_v2, 16  ;;  %v799_v54 = vshll.u32 %v4039_v33, 16  ;;  %v1385_v33 = vshrl.u32 %v4179_v25, 16  ;;  %v4230_v29 = vld [vmem:[%s3754_s18 + $0x54] sm:$0xff]  }
  0x9c   : > { %2442 = vmatmul.mubr.bf16.vlgmr.msra.gmra.mrb[0].mxu1 %v1095_v6  ;;  %v670_v35 = vpop.permute.xlu1 %669  ;;  %v1022_v39 = vpop.permute.xlu0 %1021  ;;  %v1835_v6 = vsel %vm473_vm1, %v1830_v5, %v1834_v7  ;;  %v796_v3 = vrot.slane %v794_v52, 1  ;;  %v1392_v5 = vshll.u32 %v4191_v49, 16  ;;  %v1912_v11 = vrot.slane %v4166_v22, 1 }
  0x9d   : > { %v1162_v43 = vsel %vm1093_vm4, %v1145_v20, %v1022_v39  ;;  %v1098_v4 = vsel %vm1093_vm4, %v1080_v0, %v670_v35  ;;  %3282 = vmatpush3.bf16.msra.mxu1 %v3489_v12  ;;  %v753_v31 = vrot.slane %v751_v9, 1  ;;  %v1614_v45 = vrot.slane %v1612_v30, 1 }
  0x9e   : > { %897 = vrot.lane.b32.xlu1 %v4069_v55, %s3575_s10  ;;  %584 = vrot.lane.b32.xlu0 %v569_v36, %s3577_s14  ;;  %v3457_v55 = vld [vmem:[%s3754_s18 + $0x38] ss:$0 sps:$4 sm:$0x11]   ;;  %v1844_v0 = vshll.u32 %v3464_v46, 16  ;;  %v1913_v9 = vrot.slane %v3464_v46, 1  ;;  %v1394_v27 = vrot.slane %v1392_v5, 1 }
  0x9f   : > { %2449 = vmatprep.mubr.bf16.mxu1 %v1162_v43  ;;  %v1380_v21 = vshll.u32 %v3457_v55, 16  ;;  %v1449_v58 = vrot.slane %v3457_v55, 1  ;;  %3283 = vmatprep.subr.bf16.mxu1 %v3490_v53  ;;  %v749_v43 = vor.u32 %v748_v26, %v744_v62 }
  0xa0   : > { %v575_v50 = vpop.permute.xlu1 %574  ;;  %v832_v60 = vpop.permute.xlu0 %831  ;;  %v1846_v26 = vrot.slane %v1844_v0, 1  ;;  %v1849_v0 = vshrl.u32 %v4230_v29, 16 }
  0xa1   : > { %v1065_v1 = vsel %vm1059_vm2, %v3501_v40, %v575_v50  ;;  %v1126_v35 = vsel %vm1059_vm2, %v742_v23, %v832_v60  ;;  %v1382_v39 = vrot.slane %v1380_v21, 1  ;;  %v1450_v8 = vsel %vm586_vm0, %v1448_v32, %v1449_v58  ;;  %3284 = vmatpush3.bf16.msra.mxu1 %v3490_v53  ;;  %v3502_v32 = vld [vmem:[%s3681_s23 + $0x24] sm:$0xff]  }
  0xa2   : > { %625 = vrot.lane.b32.xlu1 %v610_v59, %s3575_s10  ;;  %1698 = vrot.lane.b32.xlu0 %v1679_v51, %s3580_s19  ;;  %v1839_v59 = vshll.u32 %v4166_v22, 16  ;;  %v1387_v50 = vshll.u32 %v4179_v25, 16  ;;  %v792_v51 = vshrl.u32 %v4032_v28, 16  ;;  %v1909_v60 = vrot.slane %v4091_v13, 1 }
  0xa3   : > { %v1383_v10 = vsel %vm473_vm1, %v1378_v37, %v1382_v39  ;;  %v1680_v53 = vrot.slane %v4136_v44, 1  ;;  %v754_v18 = vsel %vm473_vm1, %v749_v43, %v753_v31  ;;  %v4222_v23 = vsel %vm586_vm0, %v1912_v11, %v1913_v9  ;;  %v3470_v31 = vld [vmem:[%s3754_s18 + $0x50] ss:$0 sps:$4 sm:$0x11]  }
  0xa4   : > { %2450 = vmatmul.mubr.bf16.gmra.mrb[4].mxu1 %v1098_v4  ;;  %v616_v15 = vpop.permute.xlu1 %615  ;;  %v888_v24 = vpop.permute.xlu0 %887  ;;  %v1841_v63 = vrot.slane %v1839_v59, 1  ;;  %v801_v4 = vrot.slane %v799_v54, 1  ;;  %v4208_v7 = vsel %vm586_vm0, %v1909_v60, %v1910_v61  ;;  %v797_v34 = vor.u32 %v796_v3, %v792_v51  ;;  %v3474_v43 = vld [vmem:[%s3754_s18 + $0x5c] ss:$0 sps:$4 sm:$0x11]   ;;  %v4263_v61 = vld [vmem:[%s3754_s18 + $0x54] sm:$0xff]  }
  0xa5   : > { %v1082_v36 = vsel %vm1076_vm3, %v1065_v1, %v616_v15  ;;  %v1147_v20 = vsel %vm1076_vm3, %v1126_v35, %v888_v24  ;;  %v1681_v15 = vrot.slane %v4151_v2, 1  ;;  %v1452_v59 = vrot.slane %v4191_v49, 1 }
  0xa6   : > { %1754 = vrot.lane.b32.xlu1 %v4091_v13, %s3576_s11  ;;  %1033 = vrot.lane.b32.xlu0 %v1018_v17, %s3576_s11  ;;  %v1389_v13 = vrot.slane %v1387_v50, 1  ;;  %v4215_v17 = vld [vmem:[%s3754_s18 + $0x48] sm:$0xff]   ;;  %v4219_v21 = vsel %vm473_vm1, %v797_v34, %v801_v4  ;;  %v1842_v24 = vor.u32 %v1841_v63, %v1837_v57  ;;  %v1915_v51 = vrot.slane %v4230_v29, 1  ;;  %v3476_v34 = vld [vmem:[%s3754_s18 + $0x50] ss:$0 sps:$4 sm:$0x11]  }
  0xa7   : > { %v1619_v35 = vshll.u32 %v4215_v17, 16  ;;  %v4254_v50 = vld [vmem:[%s3754_s18 + $0x48] sm:$0xff]   ;;  %v1916_v52 = vrot.slane %v3474_v43, 1  ;;  %v1683_v60 = vrot.slane %v4215_v17, 1  ;;  %v1684_v63 = vrot.slane %v3470_v31, 1 }
  0xa8   : > { %v672_v16 = vpop.permute.xlu1 %671  ;;  %v1024_v41 = vpop.permute.xlu0 %1023  ;;  %v1390_v2 = vor.u32 %v1389_v13, %v1385_v33  ;;  %v1847_v39 = vsel %vm473_vm1, %v1842_v24, %v1846_v26  ;;  %v1856_v4 = vshll.u32 %v3474_v43, 16  ;;  %v1399_v11 = vshll.u32 %v4254_v50, 16  ;;  %v3482_v43 = vld [vmem:[%s3754_s18 + $0x68] ss:$0 sps:$4 sm:$0x11]  }
  0xa9   : > { %v1101_v42 = vsel %vm1093_vm4, %v1082_v36, %v672_v16  ;;  %v1165_v47 = vsel %vm1093_vm4, %v1147_v20, %v1024_v41  ;;  %v3503_v20 = vld [vmem:[%s3681_s23 + $0x3c] sm:$0xff]  }
  0xaa   : > { %1890 = vrot.lane.b32.xlu1 %v1835_v6, %s3581_s20  ;;  %681 = vrot.lane.b32.xlu0 %v4032_v28, %s3576_s11  ;;  %v1615_v28 = vsel %vm473_vm1, %v1610_v48, %v1614_v45  ;;  %v1682_v6 = vsel %vm586_vm0, %v1680_v53, %v1681_v15  ;;  %v758_v41 = vshll.u32 %v3503_v20, 16  ;;  %v1395_v46 = vsel %vm473_vm1, %v1390_v2, %v1394_v27  ;;  %v4278_v53 = vld [vmem:[%s3754_s18 + $0x5c] ss:$0 sps:$4 sm:$0x11]  }
  0xab   : > { %2457 = vmatprep.mubr.bf16.mxu1 %v1165_v47  ;;  %v1617_v47 = vshrl.u32 %v4215_v17, 16  ;;  %v1621_v48 = vrot.slane %v1619_v35, 1  ;;  %v1624_v45 = vshll.u32 %v3470_v31, 16  ;;  %v1631_v15 = vshll.u32 %v4263_v61, 16 }
  0xac   : > { %2458 = vmatmul.mubr.bf16.gmra.mrb[8].mxu1 %v1101_v42  ;;  %v577_v55 = vpop.permute.xlu1 %576  ;;  %v834_v62 = vpop.permute.xlu0 %833  ;;  %v1451_v42 = vrot.slane %v4179_v25, 1  ;;  %v760_v49 = vrot.slane %v758_v41, 1  ;;  %v1858_v26 = vrot.slane %v1856_v4, 1  ;;  %v1397_v2 = vshrl.u32 %v4254_v50, 16 }
  0xad   : > { %v1067_v58 = vsel %vm1059_vm2, %v3502_v32, %v577_v55  ;;  %v1129_v30 = vsel %vm1059_vm2, %v754_v18, %v834_v62  ;;  %v756_v55 = vshrl.u32 %v3503_v20, 16  ;;  %v4266_v62 = vsel %vm586_vm0, %v1915_v51, %v1916_v52 }
  0xae   : > { %1468 = vrot.lane.b32.xlu1 %v1450_v8, %s3577_s14  ;;  %1428 = vrot.lane.b32.xlu0 %v1383_v10, %s3578_s12  ;;  %v3504_v10 = vld [vmem:[%s3681_s23 + $0x44] ss:$0 sps:$4 sm:$0x11]   ;;  %v1453_v33 = vsel %vm586_vm0, %v1451_v42, %v1452_v59  ;;  %v1622_v5 = vor.u32 %v1621_v48, %v1617_v47  ;;  %v1626_v13 = vrot.slane %v1624_v45, 1  ;;  %v1401_v27 = vrot.slane %v1399_v11, 1 }
  0xaf   : > { %v763_v57 = vshll.u32 %v3504_v10, 16  ;;  %v761_v18 = vor.u32 %v760_v49, %v756_v55  ;;  %v1633_v31 = vrot.slane %v1631_v15, 1  ;;  %v1636_v35 = vshll.u32 %v4278_v53, 16  ;;  %v4308_v45 = vld [vmem:[%s3754_s18 + $0x5c] ss:$0 sps:$4 sm:$0x11]  }
  0xb0   : > { %v618_v12 = vpop.permute.xlu1 %617  ;;  %v890_v19 = vpop.permute.xlu0 %889  ;;  %v1402_v20 = vor.u32 %v1401_v27, %v1397_v2  ;;  %v1919_v55 = vrot.slane %v3482_v43, 1  ;;  %v3507_v27 = vld [vmem:[%s3754_s18 + $0x24] sm:$0xff]  }
  0xb1   : > { %v1084_v40 = vsel %vm1076_vm3, %v1067_v58, %v618_v12  ;;  %v1149_v36 = vsel %vm1076_vm3, %v1129_v30, %v890_v19  ;;  %v765_v12 = vrot.slane %v763_v57, 1  ;;  %v1685_v19 = vsel %vm586_vm0, %v1683_v60, %v1684_v63 }
  0xb2   : > { %1660 = vrot.lane.b32.xlu1 %v1615_v28, %s3575_s10  ;;  %1524 = vrot.lane.b32.xlu0 %v4136_v44, %s3579_s13  ;;  %v1627_v58 = vsel %vm473_vm1, %v1622_v5, %v1626_v13  ;;  %v1638_v47 = vrot.slane %v1636_v35, 1  ;;  %v3506_v13 = vld [vmem:[%s3681_s23 + $0x30] sm:$0xff]  }
  0xb4   : > { %v674_v1 = vpop.permute.xlu1 %673  ;;  %v1026_v16 = vpop.permute.xlu0 %1025 }
  0xb5   : > { %v1104_v44 = vsel %vm1093_vm4, %v1084_v40, %v674_v1  ;;  %v1168_v37 = vsel %vm1093_vm4, %v1149_v36, %v1026_v16  ;;  %v1454_v40 = vrot.slane %v4254_v50, 1  ;;  %v1455_v1 = vrot.slane %v3476_v34, 1  ;;  %v4292_v36 = vld [vmem:[%s3754_s18 + $0x60] sm:$0xff]  }
  0xb6   : > { %1756 = vrot.lane.b32.xlu1 %v4166_v22, %s3576_s11  ;;  %1700 = vrot.lane.b32.xlu0 %v1682_v6, %s3580_s19  ;;  %v1851_v22 = vshll.u32 %v4230_v29, 16  ;;  %v1629_v6 = vshrl.u32 %v4263_v61, 16  ;;  %v1918_v52 = vrot.slane %v4292_v36, 1 }
  0xb7   : > { %2465 = vmatprep.mubr.bf16.mxu1 %v1168_v37  ;;  %v766_v37 = vsel %vm473_vm1, %v761_v18, %v765_v12 }
  0xb8   : > { %2466 = vmatmul.mubr.bf16.gmra.mrb[12].mxu1 %v1104_v44  ;;  %v4251_v8 = vpop.permute.xlu1 %1460  ;;  %v4257_v54 = vpop.permute.xlu0 %1420  ;;  %v1853_v3 = vrot.slane %v1851_v22, 1  ;;  %v4297_v44 = vld [vmem:[%s3754_s18 + $0x54] sm:$0xff]   ;;  %v1634_v59 = vor.u32 %v1633_v31, %v1629_v6  ;;  %v1863_v22 = vshll.u32 %v4292_v36, 16 }
  0xb9   : > { %v1411_v51 = vshll.u32 %v4297_v44, 16  ;;  %v1409_v5 = vshrl.u32 %v4297_v44, 16 }
  0xba   : > { %1430 = vrot.lane.b32.xlu1 %v1395_v46, %s3578_s12  ;;  %1892 = vrot.lane.b32.xlu0 %v1847_v39, %s3581_s20  ;;  %v1854_v24 = vor.u32 %v1853_v3, %v1849_v0  ;;  %v1456_v46 = vsel %vm586_vm0, %v1454_v40, %v1455_v1  ;;  %v1861_v0 = vshrl.u32 %v4292_v36, 16  ;;  %v3505_v3 = vld [vmem:[%s3754_s18] sm:$0xff]   ;;  %v1865_v11 = vrot.slane %v1863_v22, 1  ;;  %v3508_v40 = vld [vmem:[%s3754_s18 + $0x2c] ss:$0 sps:$4 sm:$0x11]  }
  0xbb   : > { %v1926_v4 = vsel %vm1924_vm5, %v3505_v3, %v4257_v54  ;;  %v1413_v12 = vrot.slane %v1411_v51, 1  ;;  %v1416_v54 = vshll.u32 %v4308_v45, 16  ;;  %v1904_v1 = vrot.slane %v3508_v40, 1  ;;  %v3488_v22 = vld [vmem:[%s3754_s18 + $0x74] ss:$0 sps:$4 sm:$0x11]  }
  0xbc   : > { %v836_v28 = vpop.permute.xlu1 %835  ;;  %v4273_v9 = vpop.permute.xlu0 %1516  ;;  %v1859_v16 = vsel %vm473_vm1, %v1854_v24, %v1858_v26  ;;  %v1687_v24 = vrot.slane %v4278_v53, 1  ;;  %v4333_v26 = vld [vmem:[%s3754_s18 + $0x60] sm:$0xff]   ;;  %v1866_v31 = vor.u32 %v1865_v11, %v1861_v0 }
  0xbd   : > { %v1132_v48 = vsel %vm1059_vm2, %v766_v37, %v836_v28  ;;  %v1639_v28 = vsel %vm473_vm1, %v1634_v59, %v1638_v47  ;;  %v1414_v35 = vor.u32 %v1413_v12, %v1409_v5  ;;  %v4348_v37 = vld [vmem:[%s3754_s18 + $0x6c] sm:$0xff]   ;;  %v1457_v47 = vrot.slane %v4297_v44, 1 }
  0xbe   : > { %1526 = vrot.lane.b32.xlu1 %v4215_v17, %s3579_s13  ;;  %1470 = vrot.lane.b32.xlu0 %v1453_v33, %s3577_s14  ;;  %v1404_v17 = vshll.u32 %v3476_v34, 16  ;;  %v1868_v33 = vshll.u32 %v3482_v43, 16  ;;  %v1643_v43 = vshll.u32 %v4333_v26, 16  ;;  %v1689_v3 = vrot.slane %v4333_v26, 1 }
  0xc0   : > { %v579_v32 = vpop.permute.xlu1 %578  ;;  %v4285_v30 = vpop.permute.xlu0 %1652  ;;  %v1406_v41 = vrot.slane %v1404_v17, 1  ;;  %v1903_v17 = vrot.slane %v3507_v27, 1  ;;  %v1870_v53 = vrot.slane %v1868_v33, 1  ;;  %v1873_v33 = vshrl.u32 %v4348_v37, 16 }
  0xc1   : > { %v1069_v34 = vsel %vm1059_vm2, %v3506_v13, %v579_v32  ;;  %v1942_v32 = vsel %vm1059_vm2, %v1926_v4, %v4251_v8  ;;  %v1880_v13 = vshll.u32 %v3488_v22, 16 }
  0xc2   : > { %1702 = vrot.lane.b32.xlu1 %v1685_v19, %s3580_s19  ;;  %1662 = vrot.lane.b32.xlu0 %v1627_v58, %s3575_s10  ;;  %v1407_v57 = vsel %vm473_vm1, %v1402_v20, %v1406_v41  ;;  %v1686_v19 = vrot.slane %v4263_v61, 1  ;;  %v1959_v6 = vsel %vm1957_vm6, %v1942_v32, %v4273_v9  ;;  %v1905_v59 = vsel %vm586_vm0, %v1903_v17, %v1904_v1 }
  0xc3   : > { %v1975_v8 = vsel %vm1076_vm3, %v1959_v6, %v4285_v30  ;;  %v1882_v27 = vrot.slane %v1880_v13, 1 }
  0xc4   : > { %v1693_v39 = vpop.permute.xlu1 %1692  ;;  %v892_v42 = vpop.permute.xlu0 %891  ;;  %v1688_v41 = vsel %vm586_vm0, %v1686_v19, %v1687_v24  ;;  %v3510_v19 = vld [vmem:[%s3681_s23 + $0x50] ss:$0 sps:$4 sm:$0x11]  }
  0xc5   : > { %v1151_v49 = vsel %vm1076_vm3, %v1132_v48, %v892_v42  ;;  %v1992_v20 = vsel %vm1990_vm7, %v1975_v8, %v1693_v39  ;;  %v3486_v42 = vld [vmem:[%s3754_s18 + $0x68] ss:$0 sps:$4 sm:$0x11]   ;;  %v1458_v39 = vrot.slane %v4308_v45, 1  ;;  %v1871_v48 = vsel %vm473_vm1, %v1866_v31, %v1870_v53  ;;  %v3511_v31 = vld [vmem:[%s3754_s18 + $0xc] sm:$0xff]  }
  0xc6   : > { %1894 = vrot.lane.b32.xlu1 %v1859_v16, %s3581_s20  ;;  %1758 = vrot.lane.b32.xlu0 %v4230_v29, %s3576_s11  ;;  %v4317_v29 = vsel %vm586_vm0, %v1918_v52, %v1919_v55  ;;  %v1418_v16 = vrot.slane %v1416_v54, 1  ;;  %v1641_v52 = vshrl.u32 %v4333_v26, 16  ;;  %v1875_v55 = vshll.u32 %v4348_v37, 16 }
  0xc7   : > { %v1922_v45 = vrot.slane %v3488_v22, 1  ;;  %v1459_v11 = vsel %vm586_vm0, %v1457_v47, %v1458_v39  ;;  %v775_v24 = vshll.u32 %v3510_v19, 16 }
  0xc8   : > { %v1028_v10 = vpop.permute.xlu1 %1027  ;;  %v620_v60 = vpop.permute.xlu0 %619  ;;  %v1419_v51 = vsel %vm473_vm1, %v1414_v35, %v1418_v16  ;;  %v1877_v5 = vrot.slane %v1875_v55, 1 }
  0xc9   : > { %v1171_v63 = vsel %vm1093_vm4, %v1151_v49, %v1028_v10  ;;  %v1086_v15 = vsel %vm1076_vm3, %v1069_v34, %v620_v60  ;;  %v1645_v10 = vrot.slane %v1643_v43, 1  ;;  %v777_v6 = vrot.slane %v775_v24, 1 }
  0xca   : > { %2473 = vmatprep.mubr.bf16.mxu1 %v1171_v63  ;;  %1472 = vrot.lane.b32.xlu1 %v1456_v46, %s3577_s14  ;;  %v3509_v63 = vld [vmem:[%s3681_s23 + $0x48] sm:$0xff]  }
  0xcb   : > { %1432 = vrot.lane.b32.xlu0 %v1407_v57, %s3578_s12  ;;  %v1921_v57 = vrot.slane %v4348_v37, 1  ;;  %v770_v0 = vshll.u32 %v3509_v63, 16  ;;  %v1646_v12 = vor.u32 %v1645_v10, %v1641_v52 }
  0xcc   : > { %v676_v18 = vpop.permute.xlu1 %675  ;;  %v1749_v58 = vpop.permute.xlu0 %1748 }
  0xcd   : > { %v1107_v2 = vsel %vm1093_vm4, %v1086_v15, %v676_v18  ;;  %v2008_v46 = vsel %vm1093_vm4, %v1992_v20, %v1749_v58  ;;  %v4373_v4 = vsel %vm586_vm0, %v1921_v57, %v1922_v45  ;;  %v768_v15 = vshrl.u32 %v3509_v63, 16 }
  0xce   : > { %2474 = vmatmul.mubr.bf16.gmra.mrb[16].mxu1 %v1107_v2  ;;  %1664 = vrot.lane.b32.xlu1 %v1639_v28, %s3575_s10  ;;  %v1690_v28 = vrot.slane %v3486_v42, 1  ;;  %v772_v18 = vrot.slane %v770_v0, 1  ;;  %v1878_v2 = vor.u32 %v1877_v5, %v1873_v33  ;;  %v3515_v33 = vld [vmem:[%s3681_s23 + $0x5c] ss:$0 sps:$4 sm:$0x11]  }
  0xcf   : > { %1528 = vrot.lane.b32.xlu0 %v4263_v61, %s3579_s13  ;;  %v787_v5 = vshll.u32 %v3515_v33, 16 }
  0xd0   : > { %v1423_v9 = vpop.permute.xlu1 %1422  ;;  %v1885_v30 = vpop.permute.xlu0 %1884  ;;  %v1691_v58 = vsel %vm586_vm0, %v1689_v3, %v1690_v28  ;;  %v773_v1 = vor.u32 %v772_v18, %v768_v15  ;;  %v1883_v8 = vsel %vm473_vm1, %v1878_v2, %v1882_v27 }
  0xd1   : > { %v2025_v61 = vsel %vm2023_vm8, %v2008_v46, %v1885_v30  ;;  %v1928_v35 = vsel %vm1924_vm5, %v3511_v31, %v1423_v9  ;;  %v3512_v46 = vld [vmem:[%s3754_s18 + $0x30] sm:$0xff]  }
  0xd2   : > { %1760 = vrot.lane.b32.xlu1 %v4292_v36, %s3576_s11  ;;  %2213 = vmatmul.mubr.bf16.vlgmr.msra.gmra.mrb[0].mxu0 %v2025_v61  ;;  %v1648_v36 = vshll.u32 %v3486_v42, 16  ;;  %v778_v16 = vsel %vm473_vm1, %v773_v1, %v777_v6  ;;  %v1906_v30 = vrot.slane %v3512_v46, 1  ;;  %v3517_v6 = vld [vmem:[%s3681_s23 + $0x48] sm:$0xff]  }
  0xd3   : > { %1704 = vrot.lane.b32.xlu0 %v1688_v41, %s3580_s19  ;;  %3150 = vmatprep.mubr.msk.bf16.mxu0 %vm1924_vm5, %v1905_v59  ;;  %v1907_v59 = vrot.slane %v3987_v56, 1 }
  0xd4   : > { %v1519_v49 = vpop.permute.xlu1 %1518  ;;  %v1463_v60 = vpop.permute.xlu0 %1462  ;;  %v1650_v54 = vrot.slane %v1648_v36, 1 }
  0xd5   : > { %v1944_v41 = vsel %vm1059_vm2, %v1928_v35, %v1463_v60  ;;  %v1908_v55 = vsel %vm586_vm0, %v1906_v30, %v1907_v59  ;;  %v3514_v60 = vld [vmem:[%s3681_s23 + $0x54] sm:$0xff]  }
  0xd6   : > { %1434 = vrot.lane.b32.xlu1 %v1419_v51, %s3578_s12  ;;  %v1651_v40 = vsel %vm473_vm1, %v1646_v12, %v1650_v54  ;;  %v1961_v9 = vsel %vm1957_vm6, %v1944_v41, %v1519_v49  ;;  %v782_v63 = vshll.u32 %v3514_v60, 16  ;;  %v780_v3 = vshrl.u32 %v3514_v60, 16 }
  0xd7   : > { %1896 = vrot.lane.b32.xlu0 %v1871_v48, %s3581_s20  ;;  %v789_v12 = vrot.slane %v787_v5, 1  ;;  %v3521_v5 = vld [vmem:[%s3681_s23 + $0x54] sm:$0xff]  }
  0xd8   : > { %v1655_v34 = vpop.permute.xlu1 %1654  ;;  %v838_v32 = vpop.permute.xlu0 %837  ;;  %v784_v28 = vrot.slane %v782_v63, 1  ;;  %v3520_v63 = vld [vmem:[%s3681_s23 + $0x20] ss:$0 sps:$4 sm:$0x11]  }
  0xd9   : > { %v1135_v42 = vsel %vm1059_vm2, %v778_v16, %v838_v32  ;;  %v1977_v39 = vsel %vm1076_vm3, %v1961_v9, %v1655_v34 }
  0xda   : > { %1530 = vrot.lane.b32.xlu1 %v4333_v26, %s3579_s13  ;;  %s2934_s13 = sshll.u32 %s4650_s25, 5 }
  0xdb   : > { %1474 = vrot.lane.b32.xlu0 %v1459_v11, %s3577_s14  ;;  %v785_v11 = vor.u32 %v784_v28, %v780_v3 }
  0xdc   : > { %v894_v17 = vpop.permute.xlu1 %893  ;;  %v581_v53 = vpop.permute.xlu0 %580 }
  0xdd   : > { %v1153_v61 = vsel %vm1076_vm3, %v1135_v42, %v894_v17  ;;  %v790_v18 = vsel %vm473_vm1, %v785_v11, %v789_v12 }
  0xde   : > { %1706 = vrot.lane.b32.xlu1 %v1691_v58, %s3580_s19 }
  0xdf   : > { %1666 = vrot.lane.b32.xlu0 %v1651_v40, %s3575_s10  ;;  %v3516_v40 = vld [vmem:[%s3754_s18 + $0x18] sm:$0xff]  }
  0xe0   : > { %v622_v26 = vpop.permute.xlu1 %621  ;;  %v1695_v20 = vpop.permute.xlu0 %1694 }
  0xe1   : > { %v1994_v48 = vsel %vm1990_vm7, %v1977_v39, %v1695_v20 }
  0xe2   : > { %1898 = vrot.lane.b32.xlu1 %v1883_v8, %s3581_s20 }
  0xe3   : > { %1762 = vrot.lane.b32.xlu0 %v4348_v37, %s3576_s11  ;;  %v3513_v37 = vld [vmem:[%s3681_s23 + $0x3c] sm:$0xff]  }
  0xe4   : > { %v1751_v43 = vpop.permute.xlu1 %1750  ;;  %v1030_v47 = vpop.permute.xlu0 %1029  ;;  %v1071_v51 = vsel %vm1059_vm2, %v3513_v37, %v581_v53 }
  0xe5   : > { %v1174_v22 = vsel %vm1093_vm4, %v1153_v61, %v1030_v47  ;;  %v2010_v52 = vsel %vm1093_vm4, %v1994_v48, %v1751_v43  ;;  %v1088_v49 = vsel %vm1076_vm3, %v1071_v51, %v622_v26  ;;  %v3518_v51 = vld [vmem:[%s3754_s18 + $0x24] sm:$0xff]   ;;  %s2932_s18 = sshll.u32 %s3557_s24, 3 }
  0xe6   : > { %2481 = vmatprep.mubr.bf16.mxu1 %v1174_v22  ;;  %p316_p6 = scmp.lt.s32.totalorder %s2932_s18, 15 }
  0xe8   : > { %v1887_v56 = vpop.permute.xlu1 %1886  ;;  %v678_v10 = vpop.permute.xlu0 %677  ;;  %s4652_s18 = smov (!%p316_p6, %s2932_s18), 15 }
  0xe9   : > { %v2028_v36 = vsel %vm2023_vm8, %v2010_v52, %v1887_v56  ;;  %v1110_v57 = vsel %vm1093_vm4, %v1088_v49, %v678_v10  ;;  %s2933_s12 = sshll.u32 %s4652_s18, 1 }
  0xea   : > { %2221 = vmatmul.mubr.bf16.gmra.mrb[4].mxu0 %v2028_v36  ;;  %2482 = vmatmul.mubr.bf16.gmra.mrb[20].mxu1 %v1110_v57  ;;  %s320_s19 = sadd.s32 %s2934_s13, %s2933_s12 }
  0xeb   : > { %3151 = vmatprep.mubr.msk.bf16.mxu0 %vm1924_vm5, %v1908_v55  ;;  %s2935_s20 = sshll.u32 %s320_s19, 3 }
  0xec   : > { %v1465_v45 = vpop.permute.xlu1 %1464  ;;  %v1425_v0 = vpop.permute.xlu0 %1424  ;;  %s4582_s9 = scalar_lea.vmem %s4638_s7, %s2935_s20 }
  0xed   : > { %v1930_v1 = vsel %vm1924_vm5, %v3516_v40, %v1425_v0  ;;  %v1036_v0 = vrot.slane %v3520_v63, 1 }
  0xee   : > { %v1946_v31 = vsel %vm1059_vm2, %v1930_v1, %v1465_v45  ;;  %v3519_v45 = vld [vmem:[%s3681_s23 + $0x18] sm:$0xff]  }
  0xef   : > { %v1035_v60 = vrot.slane %v3519_v45, 1  ;;  %v3525_v1 = vld [vmem:[%s3681_s23 + $0x38] ss:$0 sps:$4 sm:$0x11]  }
  0xf0   : > { %v840_v13 = vpop.permute.xlu1 %839  ;;  %v1521_v34 = vpop.permute.xlu0 %1520 }
  0xf1   : > { %v1138_v32 = vsel %vm1059_vm2, %v790_v18, %v840_v13  ;;  %v1963_v20 = vsel %vm1957_vm6, %v1946_v31, %v1521_v34 }
  0xf4   : > { %v583_v54 = vpop.permute.xlu1 %582  ;;  %v1657_v15 = vpop.permute.xlu0 %1656 }
  0xf5   : > { %v1073_v53 = vsel %vm1059_vm2, %v3517_v6, %v583_v54  ;;  %v1979_v41 = vsel %vm1076_vm3, %v1963_v20, %v1657_v15  ;;  %v1037_v15 = vsel %vm586_vm0, %v1035_v60, %v1036_v0  ;;  %v1042_v6 = vrot.slane %v3525_v1, 1  ;;  %v3532_v60 = vld [vmem:[%s3681_s23 + $0x60] sm:$0xff]   ;;  %v3533_v0 = vld [vmem:[%s3681_s23 + $0x68] ss:$0 sps:$4 sm:$0x11]  }
  0xf6   : > { %v1053_v63 = vrot.slane %v3532_v60, 1 }
  0xf8   : > { %v1697_v19 = vpop.permute.xlu1 %1696  ;;  %v896_v24 = vpop.permute.xlu0 %895 }
  0xf9   : > { %v1155_v58 = vsel %vm1076_vm3, %v1138_v32, %v896_v24  ;;  %v1996_v42 = vsel %vm1990_vm7, %v1979_v41, %v1697_v19  ;;  %v3522_v19 = vld [vmem:[%s3681_s23 + $0x2c] ss:$0 sps:$4 sm:$0x11]   ;;  %v3526_v41 = vld [vmem:[%s3681_s23 + $0x3c] sm:$0xff]  }
  0xfa   : > { %v1039_v24 = vrot.slane %v3522_v19, 1 }
  0xfc   : > { %v1032_v2 = vpop.permute.xlu1 %1031  ;;  %v624_v27 = vpop.permute.xlu0 %623 }
  0xfd   : > { %v1177_v17 = vsel %vm1093_vm4, %v1155_v58, %v1032_v2  ;;  %v1090_v8 = vsel %vm1076_vm3, %v1073_v53, %v624_v27  ;;  %v3523_v58 = vld [vmem:[%s3681_s23 + $0x24] sm:$0xff]  }
  0xfe   : > { %2489 = vmatprep.mubr.bf16.mxu1 %v1177_v17  ;;  %v1038_v2 = vrot.slane %v3523_v58, 1  ;;  %v3524_v17 = vld [vmem:[%s3681_s23 + $0x30] sm:$0xff]  }
  0xff   : > { %v1041_v40 = vrot.slane %v3524_v17, 1 }
 0x100   : > { %v680_v26 = vpop.permute.xlu1 %679  ;;  %v1753_v35 = vpop.permute.xlu0 %1752 }
 0x101   : > { %v1113_v16 = vsel %vm1093_vm4, %v1090_v8, %v680_v26  ;;  %v2012_v46 = vsel %vm1093_vm4, %v1996_v42, %v1753_v35  ;;  %v1043_v35 = vsel %vm586_vm0, %v1041_v40, %v1042_v6  ;;  %v1044_v42 = vrot.slane %v3526_v41, 1 }
 0x102   : > { %2490 = vmatmul.mubr.bf16.gmra.mrb[24].mxu1 %v1113_v16 }
 0x104   : > { %v1427_v43 = vpop.permute.xlu1 %1426  ;;  %v1889_v30 = vpop.permute.xlu0 %1888 }
 0x105   : > { %v2031_v59 = vsel %vm2023_vm8, %v2012_v46, %v1889_v30  ;;  %v1932_v52 = vsel %vm1924_vm5, %v3518_v51, %v1427_v43 }
 0x106   : > { %2229 = vmatmul.mubr.bf16.gmra.mrb[8].mxu0 %v2031_v59  ;;  %v3528_v59 = vld [vmem:[%s3681_s23 + $0x48] sm:$0xff]  }
 0x107   : > { %3152 = vmatprep.mubr.msk.bf16.mxu0 %vm1924_vm5, %v4208_v7 }
 0x108   : > { %v1523_v9 = vpop.permute.xlu1 %1522  ;;  %v1467_v61 = vpop.permute.xlu0 %1466 }
 0x109   : > { %v1948_v55 = vsel %vm1059_vm2, %v1932_v52, %v1467_v61  ;;  %v3529_v61 = vld [vmem:[%s3681_s23 + $0x50] ss:$0 sps:$4 sm:$0x11]  }
 0x10a   : > { %v1965_v7 = vsel %vm1957_vm6, %v1948_v55, %v1523_v9  ;;  %v1047_v9 = vrot.slane %v3528_v59, 1 }
 0x10c   : > { %v1659_v47 = vpop.permute.xlu1 %1658  ;;  %v842_v39 = vpop.permute.xlu0 %841 }
 0x10d   : > { %v1141_v49 = vsel %vm1059_vm2, %v4219_v21, %v842_v39  ;;  %v1981_v3 = vsel %vm1076_vm3, %v1965_v7, %v1659_v47  ;;  %v1048_v47 = vrot.slane %v3529_v61, 1  ;;  %v3531_v7 = vld [vmem:[%s3681_s23 + $0x5c] ss:$0 sps:$4 sm:$0x11]  }
 0x10f   : > { %v1049_v52 = vsel %vm586_vm0, %v1047_v9, %v1048_v47 }
 0x110   : > { %v898_v22 = vpop.permute.xlu1 %897  ;;  %v585_v48 = vpop.permute.xlu0 %584 }
 0x111   : > { %v1157_v36 = vsel %vm1076_vm3, %v1141_v49, %v898_v22  ;;  %v1075_v21 = vsel %vm1059_vm2, %v3521_v5, %v585_v48  ;;  %v3530_v49 = vld [vmem:[%s3681_s23 + $0x54] sm:$0xff]  }
 0x114   : > { %v626_v37 = vpop.permute.xlu1 %625  ;;  %v1699_v56 = vpop.permute.xlu0 %1698 }
 0x115   : > { %v1998_v33 = vsel %vm1990_vm7, %v1981_v3, %v1699_v56  ;;  %v1092_v11 = vsel %vm1076_vm3, %v1075_v21, %v626_v37  ;;  %v1054_v3 = vrot.slane %v3533_v0, 1 }
 0x118   : > { %v1755_v10 = vpop.permute.xlu1 %1754  ;;  %v1034_v57 = vpop.permute.xlu0 %1033 }
 0x119   : > { %v1180_v28 = vsel %vm1093_vm4, %v1157_v36, %v1034_v57  ;;  %v2014_v13 = vsel %vm1093_vm4, %v1998_v33, %v1755_v10  ;;  %v1050_v10 = vrot.slane %v3530_v49, 1  ;;  %v1051_v36 = vrot.slane %v3531_v7, 1 }
 0x11a   : > { %2497 = vmatprep.mubr.bf16.mxu1 %v1180_v28 }
 0x11b   : > { %v1052_v5 = vsel %vm586_vm0, %v1050_v10, %v1051_v36 }
 0x11c   : > { %v1891_v34 = vpop.permute.xlu1 %1890  ;;  %v682_v12 = vpop.permute.xlu0 %681 }
 0x11d   : > { %v2034_v54 = vsel %vm2023_vm8, %v2014_v13, %v1891_v34  ;;  %v1116_v18 = vsel %vm1093_vm4, %v1092_v11, %v682_v12  ;;  %v1055_v34 = vsel %vm586_vm0, %v1053_v63, %v1054_v3  ;;  %v3534_v11 = vld [vmem:[%s3681_s23 + $0x6c] sm:$0xff]  }
 0x11e   : > { %2237 = vmatmul.mubr.bf16.gmra.mrb[12].mxu0 %v2034_v54  ;;  %2498 = vmatmul.mubr.bf16.gmra.mrb[28].mxu1 %v1116_v18  ;;  %v1056_v12 = vrot.slane %v3534_v11, 1  ;;  %v1057_v54 = vrot.slane %v4094_v14, 1 }
 0x11f   : > { %3153 = vmatprep.mubr.msk.bf16.mxu0 %vm1924_vm5, %v4222_v23  ;;  %3285 = vmatprep.mubr.msk.bf16.mxu1 %vm1059_vm2, %v1037_v15  ;;  %v1040_v23 = vsel %vm586_vm0, %v1038_v2, %v1039_v24 }
 0x120   : > { %v1469_v32 = vpop.permute.xlu1 %1468  ;;  %v1429_v27 = vpop.permute.xlu0 %1428  ;;  %v1058_v58 = vsel %vm586_vm0, %v1056_v12, %v1057_v54 }
 0x121   : > { %v1934_v53 = vsel %vm1924_vm5, %v4125_v38, %v1429_v27  ;;  %v3527_v38 = vld [vmem:[%s3681_s23 + $0x44] ss:$0 sps:$4 sm:$0x11]  }
 0x122   : > { %v1950_v26 = vsel %vm1059_vm2, %v1934_v53, %v1469_v32  ;;  %v1045_v43 = vrot.slane %v3527_v38, 1 }
 0x124   : > { %v1661_v8 = vpop.permute.xlu1 %1660  ;;  %v1525_v31 = vpop.permute.xlu0 %1524  ;;  %v1046_v48 = vsel %vm586_vm0, %v1044_v42, %v1045_v43 }
 0x125   : > { %v1967_v16 = vsel %vm1957_vm6, %v1950_v26, %v1525_v31 }
 0x126   : > { %3286 = vmatmul.mubr.msk.bf16.vlgmr.msra.gmra.mrb[32].mxu1 %vm1059_vm2, %v1040_v23  ;;  %v1983_v46 = vsel %vm1076_vm3, %v1967_v16, %v1661_v8 }
 0x127   : > { %3289 = vmatprep.mubr.msk.bf16.mxu1 %vm1059_vm2, %v1043_v35 }
 0x128   : > { %v1757_v20 = vpop.permute.xlu1 %1756  ;;  %v1701_v30 = vpop.permute.xlu0 %1700 }
 0x129   : > { %v2000_v39 = vsel %vm1990_vm7, %v1983_v46, %v1701_v30 }
 0x12a   : > { %v2016_v37 = vsel %vm1093_vm4, %v2000_v39, %v1757_v20 }
 0x12c   : > { %v1431_v22 = vpop.permute.xlu1 %1430  ;;  %v1893_v51 = vpop.permute.xlu0 %1892 }
 0x12d   : > { %v2037_v56 = vsel %vm2023_vm8, %v2016_v37, %v1893_v51  ;;  %v1936_v57 = vsel %vm1924_vm5, %v4179_v25, %v1431_v22 }
 0x12e   : > { %2245 = vmatmul.mubr.bf16.gmra.mrb[16].mxu0 %v2037_v56  ;;  %3290 = vmatmul.mubr.msk.bf16.gmra.mrb[36].mxu1 %vm1059_vm2, %v1046_v48 }
 0x12f   : > { %3293 = vmatprep.mubr.msk.bf16.mxu1 %vm1059_vm2, %v1049_v52  ;;  %3154 = vmatprep.mubr.msk.bf16.mxu0 %vm1924_vm5, %v4266_v62 }
 0x130   : > { %v1527_v55 = vpop.permute.xlu1 %1526  ;;  %v1471_v45 = vpop.permute.xlu0 %1470 }
 0x131   : > { %v1952_v28 = vsel %vm1059_vm2, %v1936_v57, %v1471_v45 }
 0x132   : > { %v1969_v21 = vsel %vm1957_vm6, %v1952_v28, %v1527_v55 }
 0x134   : > { %v1703_v33 = vpop.permute.xlu1 %1702  ;;  %v1663_v13 = vpop.permute.xlu0 %1662 }
 0x135   : > { %v1985_v62 = vsel %vm1076_vm3, %v1969_v21, %v1663_v13 }
 0x136   : > { %3294 = vmatmul.mubr.msk.bf16.gmra.mrb[40].mxu1 %vm1059_vm2, %v1052_v5  ;;  %v2002_v15 = vsel %vm1990_vm7, %v1985_v62, %v1703_v33 }
 0x137   : > { %3297 = vmatprep.mubr.msk.bf16.mxu1 %vm1059_vm2, %v1055_v34 }
 0x138   : > { %v1895_v25 = vpop.permute.xlu1 %1894  ;;  %v1759_v18 = vpop.permute.xlu0 %1758 }
 0x139   : > { %v2018_v19 = vsel %vm1093_vm4, %v2002_v15, %v1759_v18 }
 0x13a   : > { %v2040_v24 = vsel %vm2023_vm8, %v2018_v19, %v1895_v25 }
 0x13b   : > { %2253 = vmatmul.mubr.bf16.gmra.mrb[20].mxu0 %v2040_v24 }
 0x13c   : > { %v1473_v32 = vpop.permute.xlu1 %1472  ;;  %3155 = vmatprep.mubr.msk.bf16.mxu0 %vm1924_vm5, %v4317_v29 }
 0x13d   : > { %v1433_v2 = vpop.permute.xlu0 %1432 }
 0x13e   : > { %v1938_v27 = vsel %vm1924_vm5, %v4254_v50, %v1433_v2  ;;  %3298 = vmatmul.mubr.msk.bf16.gmra.mrb[44].mxu1 %vm1059_vm2, %v1058_v58 }
 0x13f   : > { %v1954_v17 = vsel %vm1059_vm2, %v1938_v27, %v1473_v32 }
 0x140   : > { %v1665_v14 = vpop.permute.xlu1 %1664 }
 0x141   : > { %v1529_v40 = vpop.permute.xlu0 %1528 }
 0x142   : > { %v1971_v1 = vsel %vm1957_vm6, %v1954_v17, %v1529_v40 }
 0x143   : > { %v1987_v53 = vsel %vm1076_vm3, %v1971_v1, %v1665_v14 }
 0x144   : > { %v1761_v6 = vpop.permute.xlu1 %1760 }
 0x145   : > { %v1705_v8 = vpop.permute.xlu0 %1704 }
 0x146   : > { %v2004_v23 = vsel %vm1990_vm7, %v1987_v53, %v1705_v8 }
 0x147   : > { %v2020_v29 = vsel %vm1093_vm4, %v2004_v23, %v1761_v6 }
 0x148   : > { %v1435_v26 = vpop.permute.xlu1 %1434 }
 0x149   : > { %v1897_v31 = vpop.permute.xlu0 %1896  ;;  %v1940_v16 = vsel %vm1924_vm5, %v4297_v44, %v1435_v26  ;;  %v3491_v44 = vld [vmem:[%s4636_s5] sm:$0xff]  }
 0x14a   : > { %v2043_v50 = vsel %vm2023_vm8, %v2020_v29, %v1897_v31  ;;  %3301 = vmatprep.subr.bf16.mxu0 %v3491_v44 }
 0x14b   : > { %2261 = vmatmul.mubr.bf16.gmra.mrb[24].mxu0 %v2043_v50 }
 0x14c   : > { %v1531_v35 = vpop.permute.xlu1 %1530  ;;  %3156 = vmatprep.mubr.msk.bf16.mxu0 %vm1924_vm5, %v4373_v4  ;;  %3302 = vmatpush3.bf16.msra.mxu0 %v3491_v44 }
 0x14d   : > { %v1475_v20 = vpop.permute.xlu0 %1474 }
 0x14e   : > { %v1956_v41 = vsel %vm1059_vm2, %v1940_v16, %v1475_v20 }
 0x14f   : > { %v1973_v38 = vsel %vm1957_vm6, %v1956_v41, %v1531_v35 }
 0x150   : > { %v1707_v42 = vpop.permute.xlu1 %1706 }
 0x151   : > { %v1667_v43 = vpop.permute.xlu0 %1666 }
 0x152   : > { %v1989_v46 = vsel %vm1076_vm3, %v1973_v38, %v1667_v43 }
 0x153   : > { %v2006_v59 = vsel %vm1990_vm7, %v1989_v46, %v1707_v42 }
 0x154   : > { %v1899_v30 = vpop.permute.xlu1 %1898 }
 0x155   : > { %v1763_v9 = vpop.permute.xlu0 %1762 }
 0x156   : > { %v2022_v61 = vsel %vm1093_vm4, %v2006_v59, %v1763_v9 }
 0x157   : > { %v2046_v4 = vsel %vm2023_vm8, %v2022_v61, %v1899_v30 }
 0x158   : > { %2269 = vmatmul.mubr.bf16.gmra.mrb[28].mxu0 %v2046_v4 }
 0x16f   : > { %v3214_v47 = vpop.f32.mrb[0].mxu1 }
 0x170   : > { %v3215_v39 = vpop.f32.mrb[1].mxu1 }
 0x171   : > { %v3216_v22 = vadd.f32 %v3215_v39, %v3214_v47  ;;  %v3217_v48 = vpop.f32.mrb[2].mxu1 }
 0x172   : > { %v3218_v37 = vpop.f32.mrb[3].mxu1 }
 0x173   : > { %v3219_v51 = vadd.f32 %v3218_v37, %v3217_v48 }
 0x177   : > { %v3220_v52 = vpop.f32.mrb[4].mxu1 }
 0x178   : > { %v3221_v56 = vpop.f32.mrb[5].mxu1 }
 0x179   : > { %v3222_v55 = vadd.f32 %v3221_v56, %v3220_v52  ;;  %v3223_v49 = vpop.f32.mrb[6].mxu1 }
 0x17a   : > { %v3224_v10 = vpop.f32.mrb[7].mxu1 }
 0x17b   : > { %v3225_v7 = vadd.f32 %v3224_v10, %v3223_v49  ;;  %v4540_v49 = vld [vmem:[%s4635_s4] ss:$0 sm:$0xff] }
 0x17f   : > { %v3226_v36 = vpop.f32.mrb[8].mxu1 }
 0x180   : > { %v3227_v57 = vpop.f32.mrb[9].mxu1 }
 0x181   : > { %v3228_v45 = vadd.f32 %v3227_v57, %v3226_v36  ;;  %v3229_v60 = vpop.f32.mrb[10].mxu1 }
 0x182   : > { %v3230_v63 = vpop.f32.mrb[11].mxu1 }
 0x183   : > { %v3231_v0 = vadd.f32 %v3230_v63, %v3229_v60 }
 0x18b   : > { %v3232_v3 = vpop.f32.mrb[12].mxu1 }
 0x18c   : > { %v3233_v28 = vpop.f32.mrb[13].mxu1 }
 0x18d   : > { %v3234_v33 = vadd.f32 %v3233_v28, %v3232_v3  ;;  %v3235_v5 = vpop.f32.mrb[14].mxu1 }
 0x18e   : > { %v3236_v21 = vpop.f32.mrb[15].mxu1 }
 0x18f   : > { %v3237_v13 = vadd.f32 %v3236_v21, %v3235_v5 }
 0x1a1   : > { %v3238_v34 = vpop.f32.mrb[16].mxu1 }
 0x1a2   : > { %v3239_v62 = vpop.f32.mrb[17].mxu1 }
 0x1a3   : > { %v4521_v25 = vadd.f32 %v3239_v62, %v3238_v34  ;;  %v3241_v11 = vpop.f32.mrb[18].mxu1 }
 0x1a4   : > { %v3242_v12 = vpop.f32.mrb[19].mxu1 }
 0x1a5   : > { %v4523_v54 = vadd.f32 %v3242_v12, %v3241_v11  ;;  %v2214_v15 = vpop.f32.mrb[0].mxu0 }
 0x1a6   : > { %v2444_v18 = vadd.f32 %v3216_v22, %v2214_v15  ;;  %v2216_v19 = vpop.f32.mrb[1].mxu0 }
 0x1a7   : > { %v2217_v24 = vpop.f32.mrb[2].mxu0 }
 0x1a8   : > { %v2447_v32 = vadd.f32 %v3219_v51, %v2217_v24  ;;  %v2219_v58 = vpop.f32.mrb[3].mxu0 }
 0x1bd   : > { %v2222_v2 = vpop.f32.mrb[4].mxu0  ;;  %v3244_v14 = vpop.f32.mrb[20].mxu1 }
 0x1be   : > { %v2452_v27 = vadd.f32 %v3222_v55, %v2222_v2  ;;  %v2224_v17 = vpop.f32.mrb[5].mxu0  ;;  %v3245_v40 = vpop.f32.mrb[21].mxu1 }
 0x1bf   : > { %v2225_v1 = vpop.f32.mrb[6].mxu0  ;;  %v4525_v6 = vadd.f32 %v3245_v40, %v3244_v14  ;;  %v3247_v8 = vpop.f32.mrb[22].mxu1 }
 0x1c0   : > { %v2455_v53 = vadd.f32 %v3225_v7, %v2225_v1  ;;  %v2227_v23 = vpop.f32.mrb[7].mxu0  ;;  %v3248_v26 = vpop.f32.mrb[23].mxu1 }
 0x1c1   : > { %v4527_v29 = vadd.f32 %v3248_v26, %v3247_v8 }
 0x1d5   : > { %v3250_v31 = vpop.f32.mrb[24].mxu1 }
 0x1d6   : > { %v3251_v50 = vpop.f32.mrb[25].mxu1 }
 0x1d7   : > { %v4529_v35 = vadd.f32 %v3251_v50, %v3250_v31  ;;  %v3253_v16 = vpop.f32.mrb[26].mxu1 }
 0x1d8   : > { %v3254_v20 = vpop.f32.mrb[27].mxu1 }
 0x1d9   : > { %v4531_v41 = vadd.f32 %v3254_v20, %v3253_v16  ;;  %v2230_v42 = vpop.f32.mrb[8].mxu0 }
 0x1da   : > { %v2460_v38 = vadd.f32 %v3228_v45, %v2230_v42  ;;  %v2232_v43 = vpop.f32.mrb[9].mxu0 }
 0x1db   : > { %v2233_v46 = vpop.f32.mrb[10].mxu0 }
 0x1dc   : > { %v2463_v30 = vadd.f32 %v3231_v0, %v2233_v46  ;;  %v2235_v59 = vpop.f32.mrb[11].mxu0 }
 0x1f1   : > { %v2238_v9 = vpop.f32.mrb[12].mxu0  ;;  %v3256_v4 = vpop.f32.mrb[28].mxu1 }
 0x1f2   : > { %v2468_v61 = vadd.f32 %v3234_v33, %v2238_v9  ;;  %v2240_v44 = vpop.f32.mrb[13].mxu0  ;;  %v3257_v47 = vpop.f32.mrb[29].mxu1 }
 0x1f3   : > { %v2241_v39 = vpop.f32.mrb[14].mxu0  ;;  %v4533_v22 = vadd.f32 %v3257_v47, %v3256_v4  ;;  %v3259_v37 = vpop.f32.mrb[30].mxu1 }
 0x1f4   : > { %v2471_v48 = vadd.f32 %v3237_v13, %v2241_v39  ;;  %v2243_v51 = vpop.f32.mrb[15].mxu0  ;;  %v3260_v52 = vpop.f32.mrb[31].mxu1 }
 0x1f5   : > { %v4535_v56 = vadd.f32 %v3260_v52, %v3259_v37 }
 0x1f9   : > { %v3287_v55 = vpop.f32.mrb[32].mxu1 }
 0x1fa   : > { %v2549_v10 = vadd.f32 %v3287_v55, %v2452_v27  ;;  %v2540_v7 = vpop.f32.mrb[33].mxu1 }
 0x1fb   : > { %v2541_v36 = vadd.f32 %v2540_v7, %v2444_v18  ;;  %v3288_v57 = vpop.f32.mrb[34].mxu1 }
 0x1fc   : > { %v2612_v45 = vadd.f32 %v4540_v49, %v2549_v10  ;;  %v2552_v60 = vadd.f32 %v3288_v57, %v2455_v53  ;;  %v2543_v63 = vpop.f32.mrb[35].mxu1 }
 0x1fd   : > { %v2610_v0 = vadd.f32 %v4540_v49, %v2541_v36  ;;  %v2544_v3 = vadd.f32 %v2543_v63, %v2447_v32 }
 0x1fe   : > { %v2613_v28 = vadd.f32 %v4540_v49, %v2552_v60  ;;  %v2628_v5 = vmax.f32 %v2612_v45, 0.0 }
 0x1ff   : > { %v2611_v33 = vadd.f32 %v4540_v49, %v2544_v3  ;;  %v2626_v13 = vmax.f32 %v2610_v0, 0.0 }
 0x200   : > { %v2629_v21 = vmax.f32 %v2613_v28, 0.0 }
 0x201   : > { %v2627_v34 = vmax.f32 %v2611_v33, 0.0  ;;  %v2246_v62 = vpop.f32.mrb[16].mxu0  ;;  %v3291_v11 = vpop.f32.mrb[36].mxu1 }
 0x202   : > { %v2643_v12 = vpack.c.bf16 %v2629_v21, %v2628_v5  ;;  %v2476_v15 = vadd.f32 %v4521_v25, %v2246_v62  ;;  %v2565_v18 = vadd.f32 %v3291_v11, %v2468_v61  ;;  %v2248_v19 = vpop.f32.mrb[17].mxu0  ;;  %v2556_v24 = vpop.f32.mrb[37].mxu1 }
 0x203   : > { %v2642_v58 = vpack.c.bf16 %v2627_v34, %v2626_v13  ;;  %v2557_v2 = vadd.f32 %v2556_v24, %v2460_v38  ;;  %v2249_v27 = vpop.f32.mrb[18].mxu0  ;;  %v3292_v32 = vpop.f32.mrb[38].mxu1 }
 0x204   : > { %v2616_v14 = vadd.f32 %v4540_v49, %v2565_v18  ;;  %v2479_v17 = vadd.f32 %v4523_v54, %v2249_v27  ;;  %v2568_v40 = vadd.f32 %v3292_v32, %v2471_v48  ;;  %v2251_v1 = vpop.f32.mrb[19].mxu0  ;;  %v2559_v53 = vpop.f32.mrb[39].mxu1 }
 0x205   : > { %v2614_v8 = vadd.f32 %v4540_v49, %v2557_v2  ;;  %v2560_v23 = vadd.f32 %v2559_v53, %v2463_v30  ;;  %3303 = vmatprep.mubr.msk.bf16.mxu0 %vm1924_vm5, %v2642_v58 }
 0x206   : > { %v2617_v25 = vadd.f32 %v4540_v49, %v2568_v40  ;;  %3304 = vmatmul.mubr.msk.bf16.vlgmr.msra.gmra.mrb[32].mxu0 %vm1924_vm5, %v2643_v12  ;;  %v2632_v31 = vmax.f32 %v2616_v14, 0.0 }
 0x207   : > { %v2615_v26 = vadd.f32 %v4540_v49, %v2560_v23  ;;  %v2630_v16 = vmax.f32 %v2614_v8, 0.0 }
 0x208   : > { %v2633_v50 = vmax.f32 %v2617_v25, 0.0 }
 0x209   : > { %v2631_v20 = vmax.f32 %v2615_v26, 0.0  ;;  %v3295_v42 = vpop.f32.mrb[40].mxu1 }
 0x20a   : > { %v2645_v54 = vpack.c.bf16 %v2633_v50, %v2632_v31  ;;  %v2572_v38 = vpop.f32.mrb[41].mxu1 }
 0x20b   : > { %v2644_v43 = vpack.c.bf16 %v2631_v20, %v2630_v16  ;;  %v2573_v46 = vadd.f32 %v2572_v38, %v2476_v15  ;;  %v3296_v59 = vpop.f32.mrb[42].mxu1 }
 0x20c   : > { %v2575_v9 = vpop.f32.mrb[43].mxu1 }
 0x20d   : > { %v2618_v30 = vadd.f32 %v4540_v49, %v2573_v46  ;;  %v2576_v61 = vadd.f32 %v2575_v9, %v2479_v17  ;;  %3307 = vmatprep.mubr.msk.bf16.mxu0 %vm1924_vm5, %v2644_v43 }
 0x20e   : > { %v2254_v4 = vpop.f32.mrb[20].mxu0  ;;  %3308 = vmatmul.mubr.msk.bf16.gmra.mrb[36].mxu0 %vm1924_vm5, %v2645_v54 }
 0x20f   : > { %v2619_v44 = vadd.f32 %v4540_v49, %v2576_v61  ;;  %v2484_v47 = vadd.f32 %v4525_v6, %v2254_v4  ;;  %v2256_v39 = vpop.f32.mrb[21].mxu0  ;;  %v2634_v37 = vmax.f32 %v2618_v30, 0.0 }
 0x210   : > { %v2257_v48 = vpop.f32.mrb[22].mxu0 }
 0x211   : > { %v2635_v51 = vmax.f32 %v2619_v44, 0.0  ;;  %v2581_v52 = vadd.f32 %v3295_v42, %v2484_v47  ;;  %v2487_v55 = vadd.f32 %v4527_v29, %v2257_v48  ;;  %v2259_v10 = vpop.f32.mrb[23].mxu0  ;;  %v3299_v7 = vpop.f32.mrb[44].mxu1 }
 0x212   : > { %v2588_v36 = vpop.f32.mrb[45].mxu1 }
 0x213   : > { %v2646_v57 = vpack.c.bf16 %v2635_v51, %v2634_v37  ;;  %v2620_v45 = vadd.f32 %v4540_v49, %v2581_v52  ;;  %v2584_v60 = vadd.f32 %v3296_v59, %v2487_v55  ;;  %v3300_v63 = vpop.f32.mrb[46].mxu1 }
 0x214   : > { %v2591_v0 = vpop.f32.mrb[47].mxu1 }
 0x215   : > { %v2621_v3 = vadd.f32 %v4540_v49, %v2584_v60  ;;  %3311 = vmatprep.mubr.msk.bf16.mxu0 %vm1924_vm5, %v2646_v57  ;;  %v2636_v6 = vmax.f32 %v2620_v45, 0.0 }
 0x217   : > { %v2637_v28 = vmax.f32 %v2621_v3, 0.0 }
 0x219   : > { %v2647_v33 = vpack.c.bf16 %v2637_v28, %v2636_v6 }
 0x21b   : > { %3312 = vmatmul.mubr.msk.bf16.gmra.mrb[40].mxu0 %vm1924_vm5, %v2647_v33 }
 0x21e   : > { %v2262_v5 = vpop.f32.mrb[24].mxu0 }
 0x21f   : > { %v2492_v29 = vadd.f32 %v4529_v35, %v2262_v5  ;;  %v2264_v21 = vpop.f32.mrb[25].mxu0 }
 0x220   : > { %v2265_v13 = vpop.f32.mrb[26].mxu0 }
 0x221   : > { %v2495_v34 = vadd.f32 %v4531_v41, %v2265_v13  ;;  %v2589_v62 = vadd.f32 %v2588_v36, %v2492_v29  ;;  %v2267_v11 = vpop.f32.mrb[27].mxu0 }
 0x223   : > { %v2622_v12 = vadd.f32 %v4540_v49, %v2589_v62  ;;  %v2592_v15 = vadd.f32 %v2591_v0, %v2495_v34 }
 0x225   : > { %v2623_v18 = vadd.f32 %v4540_v49, %v2592_v15  ;;  %v2638_v19 = vmax.f32 %v2622_v12, 0.0 }
 0x227   : > { %v2639_v24 = vmax.f32 %v2623_v18, 0.0 }
 0x229   : > { %v2648_v58 = vpack.c.bf16 %v2639_v24, %v2638_v19 }
 0x22b   : > { %v2270_v2 = vpop.f32.mrb[28].mxu0  ;;  %3315 = vmatprep.mubr.msk.bf16.mxu0 %vm1924_vm5, %v2648_v58 }
 0x22c   : > { %v2500_v35 = vadd.f32 %v4533_v22, %v2270_v2  ;;  %v2272_v27 = vpop.f32.mrb[29].mxu0  ;;  %v3184_v22 = vld [vmem:[%s4637_s6] ss:$0 sm:$0xff] }
 0x22d   : > { %v2273_v32 = vpop.f32.mrb[30].mxu0 }
 0x22e   : > { %v2597_v41 = vadd.f32 %v3299_v7, %v2500_v35  ;;  %v2503_v14 = vadd.f32 %v4535_v56, %v2273_v32  ;;  %v2275_v17 = vpop.f32.mrb[31].mxu0 }
 0x230   : > { %v2624_v40 = vadd.f32 %v4540_v49, %v2597_v41  ;;  %v2600_v1 = vadd.f32 %v3300_v63, %v2503_v14 }
 0x232   : > { %v2625_v53 = vadd.f32 %v4540_v49, %v2600_v1  ;;  %v2640_v8 = vmax.f32 %v2624_v40, 0.0 }
 0x234   : > { %v2641_v23 = vmax.f32 %v2625_v53, 0.0 }
 0x236   : > { %v2649_v25 = vpack.c.bf16 %v2641_v23, %v2640_v8 }
 0x238   : > { %3316 = vmatmul.mubr.msk.bf16.gmra.mrb[44].mxu0 %vm1924_vm5, %v2649_v25 }
 0x2d9   : > { %v3305_v56 = vpop.f32.mrb[32].mxu0 }
 0x2da   : > { %v2732_v49 = vadd.f32 %v3305_v56, %v3184_v22  ;;  %v2723_v26 = vpop.f32.mrb[33].mxu0 }
 0x2db   : > { %v2724_v31 = vadd.f32 %v3184_v22, %v2723_v26  ;;  %v3306_v50 = vpop.f32.mrb[34].mxu0 }
 0x2dc   : > { %2789 = vst.msk [vmem:[%s4582_s9 + $0x10] sm:$0xff] %vm2786_vm9, %v2732_v49  ;;  %v2735_v16 = vadd.f32 %v3306_v50, %v3184_v22  ;;  %v2726_v20 = vpop.f32.mrb[35].mxu0 }
 0x2dd   : > { %2787 = vst.msk [vmem:[%s4582_s9] sm:$0xff] %vm2786_vm9, %v2724_v31  ;;  %v2727_v42 = vadd.f32 %v3184_v22, %v2726_v20 }
 0x2de   : > { %2790 = vst.msk [vmem:[%s4582_s9 + $0x18] sm:$0xff] %vm2786_vm9, %v2735_v16 }
 0x2df   : > { %2788 = vst.msk [vmem:[%s4582_s9 + $0x8] sm:$0xff] %vm2786_vm9, %v2727_v42 }
 0x2e1   : > { %v3309_v54 = vpop.f32.mrb[36].mxu0 }
 0x2e2   : > { %v2748_v38 = vadd.f32 %v3309_v54, %v3184_v22  ;;  %v2739_v43 = vpop.f32.mrb[37].mxu0 }
 0x2e3   : > { %v2740_v46 = vadd.f32 %v3184_v22, %v2739_v43  ;;  %v3310_v59 = vpop.f32.mrb[38].mxu0 }
 0x2e4   : > { %2793 = vst.msk [vmem:[%s4582_s9 + $0x30] sm:$0xff] %vm2786_vm9, %v2748_v38  ;;  %v2751_v9 = vadd.f32 %v3310_v59, %v3184_v22  ;;  %v2742_v30 = vpop.f32.mrb[39].mxu0 }
 0x2e5   : > { %2791 = vst.msk [vmem:[%s4582_s9 + $0x20] sm:$0xff] %vm2786_vm9, %v2740_v46  ;;  %v2743_v61 = vadd.f32 %v3184_v22, %v2742_v30 }
 0x2e6   : > { %2794 = vst.msk [vmem:[%s4582_s9 + $0x38] sm:$0xff] %vm2786_vm9, %v2751_v9 }
 0x2e7   : > { %2792 = vst.msk [vmem:[%s4582_s9 + $0x28] sm:$0xff] %vm2786_vm9, %v2743_v61 }
 0x2ee   : > { %v3313_v4 = vpop.f32.mrb[40].mxu0 }
 0x2ef   : > { %v2764_v44 = vadd.f32 %v3313_v4, %v3184_v22  ;;  %v2755_v47 = vpop.f32.mrb[41].mxu0 }
 0x2f0   : > { %v2756_v39 = vadd.f32 %v3184_v22, %v2755_v47  ;;  %v3314_v48 = vpop.f32.mrb[42].mxu0 }
 0x2f1   : > { %2797 = vst.msk [vmem:[%s4582_s9 + $0x50] sm:$0xff] %vm2786_vm9, %v2764_v44  ;;  %v2767_v37 = vadd.f32 %v3314_v48, %v3184_v22  ;;  %v2758_v51 = vpop.f32.mrb[43].mxu0 }
 0x2f2   : > { %2795 = vst.msk [vmem:[%s4582_s9 + $0x40] sm:$0xff] %vm2786_vm9, %v2756_v39  ;;  %v2759_v52 = vadd.f32 %v3184_v22, %v2758_v51 }
 0x2f3   : > { %2798 = vst.msk [vmem:[%s4582_s9 + $0x58] sm:$0xff] %vm2786_vm9, %v2767_v37 }
 0x2f4   : > { %2796 = vst.msk [vmem:[%s4582_s9 + $0x48] sm:$0xff] %vm2786_vm9, %v2759_v52 }
 0x30b   : > { %v3317_v55 = vpop.f32.mrb[44].mxu0 }
 0x30c   : > { %v2780_v10 = vadd.f32 %v3317_v55, %v3184_v22  ;;  %v2771_v7 = vpop.f32.mrb[45].mxu0 }
 0x30d   : > { %v2772_v36 = vadd.f32 %v3184_v22, %v2771_v7  ;;  %v3318_v57 = vpop.f32.mrb[46].mxu0 }
 0x30e   : > { %2801 = vst.msk [vmem:[%s4582_s9 + $0x70] sm:$0xff] %vm2786_vm9, %v2780_v10  ;;  %v2783_v45 = vadd.f32 %v3318_v57, %v3184_v22  ;;  %v2774_v60 = vpop.f32.mrb[47].mxu0 }
 0x30f   : > { %2799 = vst.msk [vmem:[%s4582_s9 + $0x60] sm:$0xff] %vm2786_vm9, %v2772_v36  ;;  %v2775_v63 = vadd.f32 %v3184_v22, %v2774_v60 }
 0x310   : > { %2802 = vst.msk [vmem:[%s4582_s9 + $0x78] sm:$0xff] %vm2786_vm9, %v2783_v45 }
 0x311   : > { %2800 = vst.msk [vmem:[%s4582_s9 + $0x68] sm:$0xff] %vm2786_vm9, %v2775_v63 }
 0x312 PF: > { %s17_s28 = sadd.s32 1, %s3573_s28   ;;  %s4639_s24 = smov %s3565_s26 }
 0x313   : > { %p14_p7 = scmp.ge.s32.totalorder %s17_s28, 6   ;;  %s4640_s25 = smov %s3569_s27 }
 0x314   : > { %s4641_s26 = smov %s4644_s29  ;;  %s4642_s27 = smov %s4648_s30 }
 0x315   :  { %16 = sbr.rel (!%p14_p7) target bundleno = 3 (0x3), region = 87 }

</bundles_post_ra>
